<compile_context>
chip_gen: v7x
topology: tpu7x:2x2x1
jax: 0.10.0
libtpu: 0.0.40
codegen_flags: <defaults>
</compile_context>

<pallas_src>
import functools

import jax
import jax.numpy as jnp
from jax import lax
from jax.experimental import pallas as pl
from jax.experimental.pallas import tpu as pltpu


def _round_up(n, m):
    return (n + m - 1) // m * m


# ----------------------------------------------------------------------------
# Pallas kernels
# ----------------------------------------------------------------------------
def _lstm_cell(gates, c, Hp):
    """PyTorch gate order [i | f | g | o], each Hp (multiple of 128) lanes wide. f32 math."""
    i = jax.nn.sigmoid(gates[:, 0 * Hp:1 * Hp])
    f = jax.nn.sigmoid(gates[:, 1 * Hp:2 * Hp])
    g = jnp.tanh(gates[:, 2 * Hp:3 * Hp])
    o = jax.nn.sigmoid(gates[:, 3 * Hp:4 * Hp])
    c_new = f * c + i * g
    h_new = o * jnp.tanh(c_new)
    return h_new, c_new


def _bilstm_layer_kernel(x_ref, wih_ref, whhf_ref, whhb_ref, b_ref, out_ref, gx_ref,
                         *, T, Hp, unroll):
    """One fused bidirectional LSTM layer (one batch tile) with full per-step output.

    x_ref:    (T, Bt, Din)   bf16 time-major input tile
    wih_ref:  (Din, 8*Hp)    bf16 [fwd i|f|g|o | bwd i|f|g|o] input->hidden weights
    whhf_ref: (Hp, 4*Hp)     bf16 forward recurrent weights
    whhb_ref: (Hp, 4*Hp)     bf16 backward recurrent weights
    b_ref:    (1, 8*Hp)      f32  b_ih + b_hh for both directions
    out_ref:  (T, Bt, 2*Hp)  bf16 [h_fwd | h_bwd] for every time step
    gx_ref:   (T, Bt, 8*Hp)  bf16 VMEM scratch for the hoisted input projection
    """
    Bt = x_ref.shape[1]
    Din = x_ref.shape[2]
    G = 4 * Hp

    # Hoisted input projection + bias: one large bf16 MXU matmul (f32 accumulation).
    # TODO(synk): time-chunk this and interleave with the recurrence for v7x VMEM sizes.
    x2d = x_ref[...].reshape(T * Bt, Din)
    gx = jnp.dot(x2d, wih_ref[...], preferred_element_type=jnp.float32) + b_ref[...]
    gx_ref[...] = gx.astype(jnp.bfloat16).reshape(T, Bt, 8 * Hp)

    whhf = whhf_ref[...]
    whhb = whhb_ref[...]

    def step(s, carry):
        h_f, c_f, h_b, c_b = carry
        tb = T - 1 - s
        # Two independent per-direction recurrent dots (half the MXU passes vs block-diag).
        rec_f = jnp.dot(h_f, whhf, preferred_element_type=jnp.float32)
        rec_b = jnp.dot(h_b, whhb, preferred_element_type=jnp.float32)
        gx_f = gx_ref[s]     # (Bt, 8Hp) bf16
        gx_b = gx_ref[tb]
        gates_f = gx_f[:, 0:G].astype(jnp.float32) + rec_f
        gates_b = gx_b[:, G:2 * G].astype(jnp.float32) + rec_b
        hf32, c_f = _lstm_cell(gates_f, c_f, Hp)
        hb32, c_b = _lstm_cell(gates_b, c_b, Hp)
        h_f = hf32.astype(jnp.bfloat16)
        h_b = hb32.astype(jnp.bfloat16)
        # Lane-aligned (128-multiple) full-tile stores.
        out_ref[s, :, 0:Hp] = h_f
        out_ref[tb, :, Hp:2 * Hp] = h_b
        return h_f, c_f, h_b, c_b

    hz = jnp.zeros((Bt, Hp), jnp.bfloat16)
    cz = jnp.zeros((Bt, Hp), jnp.float32)
    lax.fori_loop(0, T, step, (hz, cz, hz, cz), unroll=unroll)


def _bilstm_last_head_kernel(x_ref, wihf_ref, bf_ref, wihb_ref, bb_ref, whhf_ref,
                             w1f_ref, w1b_ref, b1_ref, w2_ref, b2_ref,
                             out_ref, gxf_ref, *, T, Hp, unroll):
    """Last bidirectional LSTM layer fused with the h2r -> r2o -> relu head.

    The head only consumes o[-1] = [h_fwd(T-1) | h_bwd(T-1)], so:
      * the full (T, Bt, 2Hp) layer output is never materialized,
      * the backward direction runs exactly ONE cell step (zero initial state on x[T-1]).
    """
    Bt = x_ref.shape[1]
    Din = x_ref.shape[2]

    # Hoisted forward input projection (+bias) as one big bf16 MXU matmul.
    x2d = x_ref[...].reshape(T * Bt, Din)
    gxf = jnp.dot(x2d, wihf_ref[...], preferred_element_type=jnp.float32) + bf_ref[...]
    gxf_ref[...] = gxf.astype(jnp.bfloat16).reshape(T, Bt, 4 * Hp)

    # Backward direction: single step from zero state at position T-1.
    x_last = x_ref[T - 1]                                       # (Bt, Din) bf16
    gates_b = (jnp.dot(x_last, wihb_ref[...], preferred_element_type=jnp.float32)
               + bb_ref[...])
    h_b, _ = _lstm_cell(gates_b, jnp.zeros((Bt, Hp), jnp.float32), Hp)   # f32

    # Forward recurrence.
    whhf = whhf_ref[...]

    def step(s, carry):
        h, c = carry
        gates = (gxf_ref[s].astype(jnp.float32)
                 + jnp.dot(h, whhf, preferred_element_type=jnp.float32))
        h32, c = _lstm_cell(gates, c, Hp)
        return h32.astype(jnp.bfloat16), c

    hz = jnp.zeros((Bt, Hp), jnp.bfloat16)
    cz = jnp.zeros((Bt, Hp), jnp.float32)
    h_f, _ = lax.fori_loop(0, T, step, (hz, cz), unroll=unroll)

    # Fused head: h2r (split across the two direction halves) -> r2o -> relu, in f32.
    lin = (jnp.dot(h_f.astype(jnp.float32), w1f_ref[...],
                   preferred_element_type=jnp.float32)
           + jnp.dot(h_b, w1b_ref[...], preferred_element_type=jnp.float32)
           + b1_ref[...])
    conc = jnp.dot(lin, w2_ref[...], preferred_element_type=jnp.float32) + b2_ref[...]
    out_ref[...] = jnp.maximum(conc, 0.0)


# ----------------------------------------------------------------------------
# pallas_call wrappers (batch grid, parallel semantics, explicit VMEM limit)
# ----------------------------------------------------------------------------
_COMPILER_PARAMS = pltpu.CompilerParams(
    dimension_semantics=("parallel",),
    vmem_limit_bytes=64 * 1024 * 1024,
)


def bilstm_layer(x, wih, whhf, whhb, b, *, T, B, Bt, Hp, unroll):
    Din = x.shape[-1]
    return pl.pallas_call(
        functools.partial(_bilstm_layer_kernel, T=T, Hp=Hp, unroll=unroll),
        out_shape=jax.ShapeDtypeStruct((T, B, 2 * Hp), jnp.bfloat16),
        grid_spec=pltpu.PrefetchScalarGridSpec(
            num_scalar_prefetch=0,
            grid=(B // Bt,),
            in_specs=[
                pl.BlockSpec((T, Bt, Din), lambda i: (0, i, 0)),
                pl.BlockSpec((Din, 8 * Hp), lambda i: (0, 0)),
                pl.BlockSpec((Hp, 4 * Hp), lambda i: (0, 0)),
                pl.BlockSpec((Hp, 4 * Hp), lambda i: (0, 0)),
                pl.BlockSpec((1, 8 * Hp), lambda i: (0, 0)),
            ],
            out_specs=pl.BlockSpec((T, Bt, 2 * Hp), lambda i: (0, i, 0)),
            scratch_shapes=[pltpu.VMEM((T, Bt, 8 * Hp), jnp.bfloat16)],
        ),
        compiler_params=_COMPILER_PARAMS,
    )(x, wih, whhf, whhb, b)


def bilstm_last_head(x, wihf, bf, wihb, bb, whhf, w1f, w1b, b1, w2, b2,
                     *, T, B, Bt, Hp, H, unroll):
    Din = x.shape[-1]
    return pl.pallas_call(
        functools.partial(_bilstm_last_head_kernel, T=T, Hp=Hp, unroll=unroll),
        out_shape=jax.ShapeDtypeStruct((B, 1), jnp.float32),
        grid_spec=pltpu.PrefetchScalarGridSpec(
            num_scalar_prefetch=0,
            grid=(B // Bt,),
            in_specs=[
                pl.BlockSpec((T, Bt, Din), lambda i: (0, i, 0)),
                pl.BlockSpec((Din, 4 * Hp), lambda i: (0, 0)),
                pl.BlockSpec((1, 4 * Hp), lambda i: (0, 0)),
                pl.BlockSpec((Din, 4 * Hp), lambda i: (0, 0)),
                pl.BlockSpec((1, 4 * Hp), lambda i: (0, 0)),
                pl.BlockSpec((Hp, 4 * Hp), lambda i: (0, 0)),
                pl.BlockSpec((Hp, H), lambda i: (0, 0)),
                pl.BlockSpec((Hp, H), lambda i: (0, 0)),
                pl.BlockSpec((1, H), lambda i: (0, 0)),
                pl.BlockSpec((H, 1), lambda i: (0, 0)),
                pl.BlockSpec((1, 1), lambda i: (0, 0)),
            ],
            out_specs=pl.BlockSpec((Bt, 1), lambda i: (i, 0)),
            scratch_shapes=[pltpu.VMEM((T, Bt, 4 * Hp), jnp.bfloat16)],
        ),
        compiler_params=_COMPILER_PARAMS,
    )(x, wihf, bf, wihb, bb, whhf, w1f, w1b, b1, w2, b2)


# ----------------------------------------------------------------------------
# Model wrapper (parameter setup + glue in plain JAX)
# ----------------------------------------------------------------------------
class PureLstmPallas:
    """Matches PureLstm.forward: embedding -> Dropout2d (identity at inference)
    -> bidirectional multi-layer LSTM -> h2r -> r2o -> relu, returns (out, None)."""

    def __init__(self, embedding_matrix, hidden_size, num_layers, key):
        self.embedding = jnp.asarray(embedding_matrix, jnp.float32)  # frozen
        E = self.embedding.shape[1]
        H = hidden_size
        # Pad each gate block to a full 128-lane boundary -> lane-dense slices and stores.
        Hp = _round_up(H, 128)
        self.H, self.Hp, self.num_layers = H, Hp, num_layers

        keys = iter(jax.random.split(key, 8 * num_layers + 4))
        s = 1.0 / float(H) ** 0.5

        def gate_pad_cols(w_t):
            # (D, 4H) -> (D, 4Hp): zero-pad each [i|f|g|o] gate block from H to Hp.
            D = w_t.shape[0]
            out = jnp.zeros((D, 4 * Hp), jnp.float32)
            for k in range(4):
                out = out.at[:, k * Hp:k * Hp + H].set(w_t[:, k * H:(k + 1) * H])
            return out

        def hidden_pad_rows(w_t):
            # (2H, C) -> (2Hp, C): rows are the previous layer's [fwd | bwd] output lanes.
            C = w_t.shape[1]
            out = jnp.zeros((2 * Hp, C), jnp.float32)
            out = out.at[0:H, :].set(w_t[0:H, :])
            out = out.at[Hp:Hp + H, :].set(w_t[H:2 * H, :])
            return out

        def prep_dir(l):
            # PyTorch-layout params for one direction of layer l -> padded/transposed.
            d_in = E if l == 0 else 2 * H
            w_ih = jax.random.uniform(next(keys), (4 * H, d_in), jnp.float32, -s, s)
            w_hh = jax.random.uniform(next(keys), (4 * H, H), jnp.float32, -s, s)
            b_ih = jax.random.uniform(next(keys), (4 * H,), jnp.float32, -s, s)
            b_hh = jax.random.uniform(next(keys), (4 * H,), jnp.float32, -s, s)
            wih_t = w_ih.T                                   # (Din, 4H)
            if l > 0:
                wih_t = hidden_pad_rows(wih_t)               # (2Hp, 4H)
            wih_t = gate_pad_cols(wih_t)                     # (Din_pad, 4Hp)
            whh_t = jnp.zeros((Hp, 4 * H), jnp.float32).at[0:H, :].set(w_hh.T)
            whh_t = gate_pad_cols(whh_t)                     # (Hp, 4Hp)
            b_p = gate_pad_cols((b_ih + b_hh).reshape(1, 4 * H))   # (1, 4Hp) f32
            return wih_t, whh_t, b_p

        bf16 = jnp.bfloat16

        # Layers 0 .. L-2: fused-direction kernel with full per-step output.
        self.mid_layers = []
        for l in range(num_layers - 1):
            wf, uf, bfz = prep_dir(l)
            wb, ub, bbz = prep_dir(l)
            wih_cat = jnp.concatenate([wf, wb], axis=1).astype(bf16)  # (Din_pad, 8Hp)
            b_cat = jnp.concatenate([bfz, bbz], axis=1)               # (1, 8Hp) f32
            self.mid_layers.append((wih_cat, uf.astype(bf16), ub.astype(bf16), b_cat))

        # Last layer: fused with the head; backward direction only needs one step.
        last = num_layers - 1
        wf, uf, bfz = prep_dir(last)
        wb, _ub, bbz = prep_dir(last)
        self.last_layer = (wf.astype(bf16), bfz, wb.astype(bf16), bbz, uf.astype(bf16))

        # Head: h2r Linear(2H -> H), r2o Linear(H -> 1). Kept in f32 (tiny, one-shot).
        s1 = 1.0 / float(2 * H) ** 0.5
        w1 = jax.random.uniform(next(keys), (H, 2 * H), jnp.float32, -s1, s1)
        b1 = jax.random.uniform(next(keys), (H,), jnp.float32, -s1, s1)
        s2 = 1.0 / float(H) ** 0.5
        w2 = jax.random.uniform(next(keys), (1, H), jnp.float32, -s2, s2)
        b2 = jax.random.uniform(next(keys), (1,), jnp.float32, -s2, s2)
        w1_t = w1.T                                          # (2H, H)
        w1f = jnp.zeros((Hp, H), jnp.float32).at[0:H, :].set(w1_t[0:H, :])
        w1b = jnp.zeros((Hp, H), jnp.float32).at[0:H, :].set(w1_t[H:2 * H, :])
        self.head = (w1f, w1b, b1.reshape(1, H), w2.T, b2.reshape(1, 1))

    def __call__(self, x, x_length=None, mask=None):
        # x_length / mask are accepted but unused, exactly as in the torch forward.
        B0, T = x.shape
        Hp, H = self.Hp, self.H
        emb = jnp.take(self.embedding, x, axis=0)                # (B, T, E) lookup
        # Dropout2d(0.1): identity at inference time.
        h = jnp.transpose(emb, (1, 0, 2))                        # (T, B, E) time-major
        # Batch tile: multiple of 16 (bf16 sublane packing); cap at 128 per grid program.
        Bt = min(128, _round_up(B0, 16))
        B = _round_up(B0, Bt)
        if B != B0:
            h = jnp.pad(h, ((0, 0), (0, B - B0), (0, 0)))
        h = h.astype(jnp.bfloat16)
        unroll = max(1, min(T, 8))                               # capped unroll

        for wih, whhf, whhb, b in self.mid_layers:
            h = bilstm_layer(h, wih, whhf, whhb, b,
                             T=T, B=B, Bt=Bt, Hp=Hp, unroll=unroll)  # (T, B, 2Hp) bf16

        wf, bfz, wb, bbz, uf = self.last_layer
        w1f, w1b, b1, w2, b2 = self.head
        out = bilstm_last_head(h, wf, bfz, wb, bbz, uf, w1f, w1b, b1, w2, b2,
                               T=T, B=B, Bt=Bt, Hp=Hp, H=H, unroll=unroll)  # (B_pad, 1)
        return out[:B0], None


# ----------------------------------------------------------------------------
# Demo
# ----------------------------------------------------------------------------
if __name__ == "__main__":
    B, T, E, H, L, V = 2, 8, 32, 32, 2, 50   # batch, seq, embed, hidden, layers, vocab

    key = jax.random.PRNGKey(0)
    k_emb, k_x, k_p = jax.random.split(key, 3)

    embedding_matrix = jax.random.normal(k_emb, (V, E), jnp.float32) * 0.1
    model = PureLstmPallas(embedding_matrix, hidden_size=H, num_layers=L, key=k_p)

    x = jax.random.randint(k_x, (B, T), 0, V, dtype=jnp.int32)
    x_length = jnp.full((B,), T, dtype=jnp.int32)
    mask = jnp.ones((B, T), dtype=jnp.float32)

    out, _ = model(x, x_length, mask)
    jax.block_until_ready(out)
    assert out.shape == (B, 1) and out.dtype == jnp.float32
    assert bool(jnp.all(out >= 0.0))  # ReLU output
    print("KERNEL_OK")
</pallas_src>

<mosaic_0001>
module attributes {stable_mosaic.version = 11 : i64} {
  func.func @_bilstm_layer_kernel(%arg0: i32, %arg1: memref<8x16x32xbf16, #tpu.memory_space<vmem>>, %arg2: memref<32x1024xbf16, #tpu.memory_space<vmem>>, %arg3: memref<128x512xbf16, #tpu.memory_space<vmem>>, %arg4: memref<128x512xbf16, #tpu.memory_space<vmem>>, %arg5: memref<1x1024xf32, #tpu.memory_space<vmem>>, %arg6: memref<8x16x256xbf16, #tpu.memory_space<vmem>>, %arg7: memref<8x16x1024xbf16, #tpu.memory_space<vmem>>) attributes {dimension_semantics = [#tpu.dimension_semantics<parallel>], iteration_bounds = array<i64: 1>, scalar_prefetch = 0 : i64, scratch_operands = 1 : i64, tpu.core_type = #tpu.core_type<tc>, window_params = [{transform_indices = @transform_0, window_bounds = array<i64: 8, 16, 32>}, {pipeline_mode = #tpu.pipeline_mode<synchronous>, transform_indices = @transform_1, window_bounds = array<i64: 32, 1024>}, {pipeline_mode = #tpu.pipeline_mode<synchronous>, transform_indices = @transform_2, window_bounds = array<i64: 128, 512>}, {pipeline_mode = #tpu.pipeline_mode<synchronous>, transform_indices = @transform_3, window_bounds = array<i64: 128, 512>}, {pipeline_mode = #tpu.pipeline_mode<synchronous>, transform_indices = @transform_4, window_bounds = array<i64: 1, 1024>}, {transform_indices = @transform_5, window_bounds = array<i64: 8, 16, 256>}]} {
    %c0 = arith.constant 0 : index
    %c0_0 = arith.constant 0 : index
    %c0_1 = arith.constant 0 : index
    %0 = vector.load %arg1[%c0, %c0_0, %c0_1] : memref<8x16x32xbf16, #tpu.memory_space<vmem>>, vector<8x16x32xbf16>
    %1 = vector.shape_cast %0 : vector<8x16x32xbf16> to vector<128x32xbf16>
    %c0_2 = arith.constant 0 : index
    %c0_3 = arith.constant 0 : index
    %2 = vector.load %arg2[%c0_2, %c0_3] : memref<32x1024xbf16, #tpu.memory_space<vmem>>, vector<32x1024xbf16>
    %cst = arith.constant dense<0.000000e+00> : vector<128x1024xf32>
    %3 = tpu.matmul %1, %2, %cst {dimension_numbers = #tpu.dot_dimension_numbers<[1], [0], [0], [1], [0, 0, 1, 1], [], []>} : vector<128x32xbf16>, vector<32x1024xbf16>, vector<128x1024xf32> -> vector<128x1024xf32>
    %c0_4 = arith.constant 0 : index
    %c0_5 = arith.constant 0 : index
    %4 = vector.load %arg5[%c0_4, %c0_5] : memref<1x1024xf32, #tpu.memory_space<vmem>>, vector<1x1024xf32>
    %5 = vector.broadcast %4 : vector<1x1024xf32> to vector<128x1024xf32>
    %6 = arith.addf %3, %5 : vector<128x1024xf32>
    %7 = arith.truncf %6 : vector<128x1024xf32> to vector<128x1024xbf16>
    %8 = vector.shape_cast %7 : vector<128x1024xbf16> to vector<8x16x1024xbf16>
    %c0_6 = arith.constant 0 : index
    %c0_7 = arith.constant 0 : index
    %c0_8 = arith.constant 0 : index
    %9 = vector.load %arg7[%c0_6, %c0_7, %c0_8] : memref<8x16x1024xbf16, #tpu.memory_space<vmem>>, vector<8x16x1024xbf16>
    tpu.vector_store %arg7[%c0_6, %c0_7, %c0_8], %8 {strides = array<i32>} : memref<8x16x1024xbf16, #tpu.memory_space<vmem>>, vector<8x16x1024xbf16>,
    %c0_9 = arith.constant 0 : index
    %c0_10 = arith.constant 0 : index
    %10 = vector.load %arg3[%c0_9, %c0_10] : memref<128x512xbf16, #tpu.memory_space<vmem>>, vector<128x512xbf16>
    %c0_11 = arith.constant 0 : index
    %c0_12 = arith.constant 0 : index
    %11 = vector.load %arg4[%c0_11, %c0_12] : memref<128x512xbf16, #tpu.memory_space<vmem>>, vector<128x512xbf16>
    %cst_13 = arith.constant 0.000000e+00 : bf16
    %12 = vector.broadcast %cst_13 : bf16 to vector<16x128xbf16>
    %cst_14 = arith.constant 0.000000e+00 : f32
    %13 = vector.broadcast %cst_14 : f32 to vector<16x128xf32>
    %c0_i32 = arith.constant 0 : i32
    %c7_i32 = arith.constant 7 : i32
    %14 = arith.subi %c7_i32, %c0_i32 : i32
    %cst_15 = arith.constant dense<0.000000e+00> : vector<16x512xf32>
    %15 = tpu.matmul %12, %10, %cst_15 {dimension_numbers = #tpu.dot_dimension_numbers<[1], [0], [0], [1], [0, 0, 1, 1], [], []>} : vector<16x128xbf16>, vector<128x512xbf16>, vector<16x512xf32> -> vector<16x512xf32>
    %cst_16 = arith.constant dense<0.000000e+00> : vector<16x512xf32>
    %16 = tpu.matmul %12, %11, %cst_16 {dimension_numbers = #tpu.dot_dimension_numbers<[1], [0], [0], [1], [0, 0, 1, 1], [], []>} : vector<16x128xbf16>, vector<128x512xbf16>, vector<16x512xf32> -> vector<16x512xf32>
    %17 = arith.index_cast %c0_i32 : i32 to index
    %c0_17 = arith.constant 0 : index
    %c0_18 = arith.constant 0 : index
    %18 = vector.load %arg7[%17, %c0_17, %c0_18] : memref<8x16x1024xbf16, #tpu.memory_space<vmem>>, vector<1x16x1024xbf16>
    %19 = vector.shape_cast %18 : vector<1x16x1024xbf16> to vector<16x1024xbf16>
    %20 = arith.index_cast %14 : i32 to index
    %c0_19 = arith.constant 0 : index
    %c0_20 = arith.constant 0 : index
    %21 = vector.load %arg7[%20, %c0_19, %c0_20] : memref<8x16x1024xbf16, #tpu.memory_space<vmem>>, vector<1x16x1024xbf16>
    %22 = vector.shape_cast %21 : vector<1x16x1024xbf16> to vector<16x1024xbf16>
    %23 = vector.extract_strided_slice %19 {offsets = [0, 0], sizes = [16, 512], strides = [1, 1]} : vector<16x1024xbf16> to vector<16x512xbf16>
    %24 = arith.extf %23 : vector<16x512xbf16> to vector<16x512xf32>
    %25 = arith.addf %24, %15 : vector<16x512xf32>
    %26 = vector.extract_strided_slice %22 {offsets = [0, 512], sizes = [16, 512], strides = [1, 1]} : vector<16x1024xbf16> to vector<16x512xbf16>
    %27 = arith.extf %26 : vector<16x512xbf16> to vector<16x512xf32>
    %28 = arith.addf %27, %16 : vector<16x512xf32>
    %29 = vector.extract_strided_slice %25 {offsets = [0, 0], sizes = [16, 128], strides = [1, 1]} : vector<16x512xf32> to vector<16x128xf32>
    %30 = arith.negf %29 : vector<16x128xf32>
    %31 = math.exp %30 : vector<16x128xf32>
    %cst_21 = arith.constant 1.000000e+00 : f32
    %32 = vector.broadcast %cst_21 : f32 to vector<16x128xf32>
    %33 = arith.addf %32, %31 : vector<16x128xf32>
    %34 = arith.divf %32, %33 : vector<16x128xf32>
    %35 = vector.extract_strided_slice %25 {offsets = [0, 128], sizes = [16, 128], strides = [1, 1]} : vector<16x512xf32> to vector<16x128xf32>
    %36 = arith.negf %35 : vector<16x128xf32>
    %37 = math.exp %36 : vector<16x128xf32>
    %cst_22 = arith.constant 1.000000e+00 : f32
    %38 = vector.broadcast %cst_22 : f32 to vector<16x128xf32>
    %39 = arith.addf %38, %37 : vector<16x128xf32>
    %40 = arith.divf %38, %39 : vector<16x128xf32>
    %41 = vector.extract_strided_slice %25 {offsets = [0, 256], sizes = [16, 128], strides = [1, 1]} : vector<16x512xf32> to vector<16x128xf32>
    %42 = math.tanh %41 : vector<16x128xf32>
    %43 = vector.extract_strided_slice %25 {offsets = [0, 384], sizes = [16, 128], strides = [1, 1]} : vector<16x512xf32> to vector<16x128xf32>
    %44 = arith.negf %43 : vector<16x128xf32>
    %45 = math.exp %44 : vector<16x128xf32>
    %cst_23 = arith.constant 1.000000e+00 : f32
    %46 = vector.broadcast %cst_23 : f32 to vector<16x128xf32>
    %47 = arith.addf %46, %45 : vector<16x128xf32>
    %48 = arith.divf %46, %47 : vector<16x128xf32>
    %49 = arith.mulf %40, %13 : vector<16x128xf32>
    %50 = arith.mulf %34, %42 : vector<16x128xf32>
    %51 = arith.addf %49, %50 : vector<16x128xf32>
    %52 = math.tanh %51 : vector<16x128xf32>
    %53 = arith.mulf %48, %52 : vector<16x128xf32>
    %54 = vector.extract_strided_slice %28 {offsets = [0, 0], sizes = [16, 128], strides = [1, 1]} : vector<16x512xf32> to vector<16x128xf32>
    %55 = arith.negf %54 : vector<16x128xf32>
    %56 = math.exp %55 : vector<16x128xf32>
    %cst_24 = arith.constant 1.000000e+00 : f32
    %57 = vector.broadcast %cst_24 : f32 to vector<16x128xf32>
    %58 = arith.addf %57, %56 : vector<16x128xf32>
    %59 = arith.divf %57, %58 : vector<16x128xf32>
    %60 = vector.extract_strided_slice %28 {offsets = [0, 128], sizes = [16, 128], strides = [1, 1]} : vector<16x512xf32> to vector<16x128xf32>
    %61 = arith.negf %60 : vector<16x128xf32>
    %62 = math.exp %61 : vector<16x128xf32>
    %cst_25 = arith.constant 1.000000e+00 : f32
    %63 = vector.broadcast %cst_25 : f32 to vector<16x128xf32>
    %64 = arith.addf %63, %62 : vector<16x128xf32>
    %65 = arith.divf %63, %64 : vector<16x128xf32>
    %66 = vector.extract_strided_slice %28 {offsets = [0, 256], sizes = [16, 128], strides = [1, 1]} : vector<16x512xf32> to vector<16x128xf32>
    %67 = math.tanh %66 : vector<16x128xf32>
    %68 = vector.extract_strided_slice %28 {offsets = [0, 384], sizes = [16, 128], strides = [1, 1]} : vector<16x512xf32> to vector<16x128xf32>
    %69 = arith.negf %68 : vector<16x128xf32>
    %70 = math.exp %69 : vector<16x128xf32>
    %cst_26 = arith.constant 1.000000e+00 : f32
    %71 = vector.broadcast %cst_26 : f32 to vector<16x128xf32>
    %72 = arith.addf %71, %70 : vector<16x128xf32>
    %73 = arith.divf %71, %72 : vector<16x128xf32>
    %74 = arith.mulf %65, %13 : vector<16x128xf32>
    %75 = arith.mulf %59, %67 : vector<16x128xf32>
    %76 = arith.addf %74, %75 : vector<16x128xf32>
    %77 = math.tanh %76 : vector<16x128xf32>
    %78 = arith.mulf %73, %77 : vector<16x128xf32>
    %79 = arith.truncf %53 : vector<16x128xf32> to vector<16x128xbf16>
    %80 = arith.truncf %78 : vector<16x128xf32> to vector<16x128xbf16>
    %81 = arith.index_cast %c0_i32 : i32 to index
    %c0_27 = arith.constant 0 : index
    %c0_28 = arith.constant 0 : index
    %82 = vector.load %arg6[%81, %c0_27, %c0_28] : memref<8x16x256xbf16, #tpu.memory_space<vmem>>, vector<1x16x128xbf16>
    %83 = vector.shape_cast %82 : vector<1x16x128xbf16> to vector<16x128xbf16>
    %84 = vector.shape_cast %79 : vector<16x128xbf16> to vector<1x16x128xbf16>
    tpu.vector_store %arg6[%81, %c0_27, %c0_28], %84 {strides = array<i32>} : memref<8x16x256xbf16, #tpu.memory_space<vmem>>, vector<1x16x128xbf16>,
    %85 = arith.index_cast %14 : i32 to index
    %c0_29 = arith.constant 0 : index
    %c128 = arith.constant 128 : index
    %86 = vector.load %arg6[%85, %c0_29, %c128] : memref<8x16x256xbf16, #tpu.memory_space<vmem>>, vector<1x16x128xbf16>
    %87 = vector.shape_cast %86 : vector<1x16x128xbf16> to vector<16x128xbf16>
    %88 = vector.shape_cast %80 : vector<16x128xbf16> to vector<1x16x128xbf16>
    tpu.vector_store %arg6[%85, %c0_29, %c128], %88 {strides = array<i32>} : memref<8x16x256xbf16, #tpu.memory_space<vmem>>, vector<1x16x128xbf16>,
    %c1_i32 = arith.constant 1 : i32
    %c7_i32_30 = arith.constant 7 : i32
    %89 = arith.subi %c7_i32_30, %c1_i32 : i32
    %cst_31 = arith.constant dense<0.000000e+00> : vector<16x512xf32>
    %90 = tpu.matmul %79, %10, %cst_31 {dimension_numbers = #tpu.dot_dimension_numbers<[1], [0], [0], [1], [0, 0, 1, 1], [], []>} : vector<16x128xbf16>, vector<128x512xbf16>, vector<16x512xf32> -> vector<16x512xf32>
    %cst_32 = arith.constant dense<0.000000e+00> : vector<16x512xf32>
    %91 = tpu.matmul %80, %11, %cst_32 {dimension_numbers = #tpu.dot_dimension_numbers<[1], [0], [0], [1], [0, 0, 1, 1], [], []>} : vector<16x128xbf16>, vector<128x512xbf16>, vector<16x512xf32> -> vector<16x512xf32>
    %92 = arith.index_cast %c1_i32 : i32 to index
    %c0_33 = arith.constant 0 : index
    %c0_34 = arith.constant 0 : index
    %93 = vector.load %arg7[%92, %c0_33, %c0_34] : memref<8x16x1024xbf16, #tpu.memory_space<vmem>>, vector<1x16x1024xbf16>
    %94 = vector.shape_cast %93 : vector<1x16x1024xbf16> to vector<16x1024xbf16>
    %95 = arith.index_cast %89 : i32 to index
    %c0_35 = arith.constant 0 : index
    %c0_36 = arith.constant 0 : index
    %96 = vector.load %arg7[%95, %c0_35, %c0_36] : memref<8x16x1024xbf16, #tpu.memory_space<vmem>>, vector<1x16x1024xbf16>
    %97 = vector.shape_cast %96 : vector<1x16x1024xbf16> to vector<16x1024xbf16>
    %98 = vector.extract_strided_slice %94 {offsets = [0, 0], sizes = [16, 512], strides = [1, 1]} : vector<16x1024xbf16> to vector<16x512xbf16>
    %99 = arith.extf %98 : vector<16x512xbf16> to vector<16x512xf32>
    %100 = arith.addf %99, %90 : vector<16x512xf32>
    %101 = vector.extract_strided_slice %97 {offsets = [0, 512], sizes = [16, 512], strides = [1, 1]} : vector<16x1024xbf16> to vector<16x512xbf16>
    %102 = arith.extf %101 : vector<16x512xbf16> to vector<16x512xf32>
    %103 = arith.addf %102, %91 : vector<16x512xf32>
    %104 = vector.extract_strided_slice %100 {offsets = [0, 0], sizes = [16, 128], strides = [1, 1]} : vector<16x512xf32> to vector<16x128xf32>
    %105 = arith.negf %104 : vector<16x128xf32>
    %106 = math.exp %105 : vector<16x128xf32>
    %cst_37 = arith.constant 1.000000e+00 : f32
    %107 = vector.broadcast %cst_37 : f32 to vector<16x128xf32>
    %108 = arith.addf %107, %106 : vector<16x128xf32>
    %109 = arith.divf %107, %108 : vector<16x128xf32>
    %110 = vector.extract_strided_slice %100 {offsets = [0, 128], sizes = [16, 128], strides = [1, 1]} : vector<16x512xf32> to vector<16x128xf32>
    %111 = arith.negf %110 : vector<16x128xf32>
    %112 = math.exp %111 : vector<16x128xf32>
    %cst_38 = arith.constant 1.000000e+00 : f32
    %113 = vector.broadcast %cst_38 : f32 to vector<16x128xf32>
    %114 = arith.addf %113, %112 : vector<16x128xf32>
    %115 = arith.divf %113, %114 : vector<16x128xf32>
    %116 = vector.extract_strided_slice %100 {offsets = [0, 256], sizes = [16, 128], strides = [1, 1]} : vector<16x512xf32> to vector<16x128xf32>
    %117 = math.tanh %116 : vector<16x128xf32>
    %118 = vector.extract_strided_slice %100 {offsets = [0, 384], sizes = [16, 128], strides = [1, 1]} : vector<16x512xf32> to vector<16x128xf32>
    %119 = arith.negf %118 : vector<16x128xf32>
    %120 = math.exp %119 : vector<16x128xf32>
    %cst_39 = arith.constant 1.000000e+00 : f32
    %121 = vector.broadcast %cst_39 : f32 to vector<16x128xf32>
    %122 = arith.addf %121, %120 : vector<16x128xf32>
    %123 = arith.divf %121, %122 : vector<16x128xf32>
    %124 = arith.mulf %115, %51 : vector<16x128xf32>
    %125 = arith.mulf %109, %117 : vector<16x128xf32>
    %126 = arith.addf %124, %125 : vector<16x128xf32>
    %127 = math.tanh %126 : vector<16x128xf32>
    %128 = arith.mulf %123, %127 : vector<16x128xf32>
    %129 = vector.extract_strided_slice %103 {offsets = [0, 0], sizes = [16, 128], strides = [1, 1]} : vector<16x512xf32> to vector<16x128xf32>
    %130 = arith.negf %129 : vector<16x128xf32>
    %131 = math.exp %130 : vector<16x128xf32>
    %cst_40 = arith.constant 1.000000e+00 : f32
    %132 = vector.broadcast %cst_40 : f32 to vector<16x128xf32>
    %133 = arith.addf %132, %131 : vector<16x128xf32>
    %134 = arith.divf %132, %133 : vector<16x128xf32>
    %135 = vector.extract_strided_slice %103 {offsets = [0, 128], sizes = [16, 128], strides = [1, 1]} : vector<16x512xf32> to vector<16x128xf32>
    %136 = arith.negf %135 : vector<16x128xf32>
    %137 = math.exp %136 : vector<16x128xf32>
    %cst_41 = arith.constant 1.000000e+00 : f32
    %138 = vector.broadcast %cst_41 : f32 to vector<16x128xf32>
    %139 = arith.addf %138, %137 : vector<16x128xf32>
    %140 = arith.divf %138, %139 : vector<16x128xf32>
    %141 = vector.extract_strided_slice %103 {offsets = [0, 256], sizes = [16, 128], strides = [1, 1]} : vector<16x512xf32> to vector<16x128xf32>
    %142 = math.tanh %141 : vector<16x128xf32>
    %143 = vector.extract_strided_slice %103 {offsets = [0, 384], sizes = [16, 128], strides = [1, 1]} : vector<16x512xf32> to vector<16x128xf32>
    %144 = arith.negf %143 : vector<16x128xf32>
    %145 = math.exp %144 : vector<16x128xf32>
    %cst_42 = arith.constant 1.000000e+00 : f32
    %146 = vector.broadcast %cst_42 : f32 to vector<16x128xf32>
    %147 = arith.addf %146, %145 : vector<16x128xf32>
    %148 = arith.divf %146, %147 : vector<16x128xf32>
    %149 = arith.mulf %140, %76 : vector<16x128xf32>
    %150 = arith.mulf %134, %142 : vector<16x128xf32>
    %151 = arith.addf %149, %150 : vector<16x128xf32>
    %152 = math.tanh %151 : vector<16x128xf32>
    %153 = arith.mulf %148, %152 : vector<16x128xf32>
    %154 = arith.truncf %128 : vector<16x128xf32> to vector<16x128xbf16>
    %155 = arith.truncf %153 : vector<16x128xf32> to vector<16x128xbf16>
    %156 = arith.index_cast %c1_i32 : i32 to index
    %c0_43 = arith.constant 0 : index
    %c0_44 = arith.constant 0 : index
    %157 = vector.load %arg6[%156, %c0_43, %c0_44] : memref<8x16x256xbf16, #tpu.memory_space<vmem>>, vector<1x16x128xbf16>
    %158 = vector.shape_cast %157 : vector<1x16x128xbf16> to vector<16x128xbf16>
    %159 = vector.shape_cast %154 : vector<16x128xbf16> to vector<1x16x128xbf16>
    tpu.vector_store %arg6[%156, %c0_43, %c0_44], %159 {strides = array<i32>} : memref<8x16x256xbf16, #tpu.memory_space<vmem>>, vector<1x16x128xbf16>,
    %160 = arith.index_cast %89 : i32 to index
    %c0_45 = arith.constant 0 : index
    %c128_46 = arith.constant 128 : index
    %161 = vector.load %arg6[%160, %c0_45, %c128_46] : memref<8x16x256xbf16, #tpu.memory_space<vmem>>, vector<1x16x128xbf16>
    %162 = vector.shape_cast %161 : vector<1x16x128xbf16> to vector<16x128xbf16>
    %163 = vector.shape_cast %155 : vector<16x128xbf16> to vector<1x16x128xbf16>
    tpu.vector_store %arg6[%160, %c0_45, %c128_46], %163 {strides = array<i32>} : memref<8x16x256xbf16, #tpu.memory_space<vmem>>, vector<1x16x128xbf16>,
    %c2_i32 = arith.constant 2 : i32
    %c7_i32_47 = arith.constant 7 : i32
    %164 = arith.subi %c7_i32_47, %c2_i32 : i32
    %cst_48 = arith.constant dense<0.000000e+00> : vector<16x512xf32>
    %165 = tpu.matmul %154, %10, %cst_48 {dimension_numbers = #tpu.dot_dimension_numbers<[1], [0], [0], [1], [0, 0, 1, 1], [], []>} : vector<16x128xbf16>, vector<128x512xbf16>, vector<16x512xf32> -> vector<16x512xf32>
    %cst_49 = arith.constant dense<0.000000e+00> : vector<16x512xf32>
    %166 = tpu.matmul %155, %11, %cst_49 {dimension_numbers = #tpu.dot_dimension_numbers<[1], [0], [0], [1], [0, 0, 1, 1], [], []>} : vector<16x128xbf16>, vector<128x512xbf16>, vector<16x512xf32> -> vector<16x512xf32>
    %167 = arith.index_cast %c2_i32 : i32 to index
    %c0_50 = arith.constant 0 : index
    %c0_51 = arith.constant 0 : index
    %168 = vector.load %arg7[%167, %c0_50, %c0_51] : memref<8x16x1024xbf16, #tpu.memory_space<vmem>>, vector<1x16x1024xbf16>
    %169 = vector.shape_cast %168 : vector<1x16x1024xbf16> to vector<16x1024xbf16>
    %170 = arith.index_cast %164 : i32 to index
    %c0_52 = arith.constant 0 : index
    %c0_53 = arith.constant 0 : index
    %171 = vector.load %arg7[%170, %c0_52, %c0_53] : memref<8x16x1024xbf16, #tpu.memory_space<vmem>>, vector<1x16x1024xbf16>
    %172 = vector.shape_cast %171 : vector<1x16x1024xbf16> to vector<16x1024xbf16>
    %173 = vector.extract_strided_slice %169 {offsets = [0, 0], sizes = [16, 512], strides = [1, 1]} : vector<16x1024xbf16> to vector<16x512xbf16>
    %174 = arith.extf %173 : vector<16x512xbf16> to vector<16x512xf32>
    %175 = arith.addf %174, %165 : vector<16x512xf32>
    %176 = vector.extract_strided_slice %172 {offsets = [0, 512], sizes = [16, 512], strides = [1, 1]} : vector<16x1024xbf16> to vector<16x512xbf16>
    %177 = arith.extf %176 : vector<16x512xbf16> to vector<16x512xf32>
    %178 = arith.addf %177, %166 : vector<16x512xf32>
    %179 = vector.extract_strided_slice %175 {offsets = [0, 0], sizes = [16, 128], strides = [1, 1]} : vector<16x512xf32> to vector<16x128xf32>
    %180 = arith.negf %179 : vector<16x128xf32>
    %181 = math.exp %180 : vector<16x128xf32>
    %cst_54 = arith.constant 1.000000e+00 : f32
    %182 = vector.broadcast %cst_54 : f32 to vector<16x128xf32>
    %183 = arith.addf %182, %181 : vector<16x128xf32>
    %184 = arith.divf %182, %183 : vector<16x128xf32>
    %185 = vector.extract_strided_slice %175 {offsets = [0, 128], sizes = [16, 128], strides = [1, 1]} : vector<16x512xf32> to vector<16x128xf32>
    %186 = arith.negf %185 : vector<16x128xf32>
    %187 = math.exp %186 : vector<16x128xf32>
    %cst_55 = arith.constant 1.000000e+00 : f32
    %188 = vector.broadcast %cst_55 : f32 to vector<16x128xf32>
    %189 = arith.addf %188, %187 : vector<16x128xf32>
    %190 = arith.divf %188, %189 : vector<16x128xf32>
    %191 = vector.extract_strided_slice %175 {offsets = [0, 256], sizes = [16, 128], strides = [1, 1]} : vector<16x512xf32> to vector<16x128xf32>
    %192 = math.tanh %191 : vector<16x128xf32>
    %193 = vector.extract_strided_slice %175 {offsets = [0, 384], sizes = [16, 128], strides = [1, 1]} : vector<16x512xf32> to vector<16x128xf32>
    %194 = arith.negf %193 : vector<16x128xf32>
    %195 = math.exp %194 : vector<16x128xf32>
    %cst_56 = arith.constant 1.000000e+00 : f32
    %196 = vector.broadcast %cst_56 : f32 to vector<16x128xf32>
    %197 = arith.addf %196, %195 : vector<16x128xf32>
    %198 = arith.divf %196, %197 : vector<16x128xf32>
    %199 = arith.mulf %190, %126 : vector<16x128xf32>
    %200 = arith.mulf %184, %192 : vector<16x128xf32>
    %201 = arith.addf %199, %200 : vector<16x128xf32>
    %202 = math.tanh %201 : vector<16x128xf32>
    %203 = arith.mulf %198, %202 : vector<16x128xf32>
    %204 = vector.extract_strided_slice %178 {offsets = [0, 0], sizes = [16, 128], strides = [1, 1]} : vector<16x512xf32> to vector<16x128xf32>
    %205 = arith.negf %204 : vector<16x128xf32>
    %206 = math.exp %205 : vector<16x128xf32>
    %cst_57 = arith.constant 1.000000e+00 : f32
    %207 = vector.broadcast %cst_57 : f32 to vector<16x128xf32>
    %208 = arith.addf %207, %206 : vector<16x128xf32>
    %209 = arith.divf %207, %208 : vector<16x128xf32>
    %210 = vector.extract_strided_slice %178 {offsets = [0, 128], sizes = [16, 128], strides = [1, 1]} : vector<16x512xf32> to vector<16x128xf32>
    %211 = arith.negf %210 : vector<16x128xf32>
    %212 = math.exp %211 : vector<16x128xf32>
    %cst_58 = arith.constant 1.000000e+00 : f32
    %213 = vector.broadcast %cst_58 : f32 to vector<16x128xf32>
    %214 = arith.addf %213, %212 : vector<16x128xf32>
    %215 = arith.divf %213, %214 : vector<16x128xf32>
    %216 = vector.extract_strided_slice %178 {offsets = [0, 256], sizes = [16, 128], strides = [1, 1]} : vector<16x512xf32> to vector<16x128xf32>
    %217 = math.tanh %216 : vector<16x128xf32>
    %218 = vector.extract_strided_slice %178 {offsets = [0, 384], sizes = [16, 128], strides = [1, 1]} : vector<16x512xf32> to vector<16x128xf32>
    %219 = arith.negf %218 : vector<16x128xf32>
    %220 = math.exp %219 : vector<16x128xf32>
    %cst_59 = arith.constant 1.000000e+00 : f32
    %221 = vector.broadcast %cst_59 : f32 to vector<16x128xf32>
    %222 = arith.addf %221, %220 : vector<16x128xf32>
    %223 = arith.divf %221, %222 : vector<16x128xf32>
    %224 = arith.mulf %215, %151 : vector<16x128xf32>
    %225 = arith.mulf %209, %217 : vector<16x128xf32>
    %226 = arith.addf %224, %225 : vector<16x128xf32>
    %227 = math.tanh %226 : vector<16x128xf32>
    %228 = arith.mulf %223, %227 : vector<16x128xf32>
    %229 = arith.truncf %203 : vector<16x128xf32> to vector<16x128xbf16>
    %230 = arith.truncf %228 : vector<16x128xf32> to vector<16x128xbf16>
    %231 = arith.index_cast %c2_i32 : i32 to index
    %c0_60 = arith.constant 0 : index
    %c0_61 = arith.constant 0 : index
    %232 = vector.load %arg6[%231, %c0_60, %c0_61] : memref<8x16x256xbf16, #tpu.memory_space<vmem>>, vector<1x16x128xbf16>
    %233 = vector.shape_cast %232 : vector<1x16x128xbf16> to vector<16x128xbf16>
    %234 = vector.shape_cast %229 : vector<16x128xbf16> to vector<1x16x128xbf16>
    tpu.vector_store %arg6[%231, %c0_60, %c0_61], %234 {strides = array<i32>} : memref<8x16x256xbf16, #tpu.memory_space<vmem>>, vector<1x16x128xbf16>,
    %235 = arith.index_cast %164 : i32 to index
    %c0_62 = arith.constant 0 : index
    %c128_63 = arith.constant 128 : index
    %236 = vector.load %arg6[%235, %c0_62, %c128_63] : memref<8x16x256xbf16, #tpu.memory_space<vmem>>, vector<1x16x128xbf16>
    %237 = vector.shape_cast %236 : vector<1x16x128xbf16> to vector<16x128xbf16>
    %238 = vector.shape_cast %230 : vector<16x128xbf16> to vector<1x16x128xbf16>
    tpu.vector_store %arg6[%235, %c0_62, %c128_63], %238 {strides = array<i32>} : memref<8x16x256xbf16, #tpu.memory_space<vmem>>, vector<1x16x128xbf16>,
    %c3_i32 = arith.constant 3 : i32
    %c7_i32_64 = arith.constant 7 : i32
    %239 = arith.subi %c7_i32_64, %c3_i32 : i32
    %cst_65 = arith.constant dense<0.000000e+00> : vector<16x512xf32>
    %240 = tpu.matmul %229, %10, %cst_65 {dimension_numbers = #tpu.dot_dimension_numbers<[1], [0], [0], [1], [0, 0, 1, 1], [], []>} : vector<16x128xbf16>, vector<128x512xbf16>, vector<16x512xf32> -> vector<16x512xf32>
    %cst_66 = arith.constant dense<0.000000e+00> : vector<16x512xf32>
    %241 = tpu.matmul %230, %11, %cst_66 {dimension_numbers = #tpu.dot_dimension_numbers<[1], [0], [0], [1], [0, 0, 1, 1], [], []>} : vector<16x128xbf16>, vector<128x512xbf16>, vector<16x512xf32> -> vector<16x512xf32>
    %242 = arith.index_cast %c3_i32 : i32 to index
    %c0_67 = arith.constant 0 : index
    %c0_68 = arith.constant 0 : index
    %243 = vector.load %arg7[%242, %c0_67, %c0_68] : memref<8x16x1024xbf16, #tpu.memory_space<vmem>>, vector<1x16x1024xbf16>
    %244 = vector.shape_cast %243 : vector<1x16x1024xbf16> to vector<16x1024xbf16>
    %245 = arith.index_cast %239 : i32 to index
    %c0_69 = arith.constant 0 : index
    %c0_70 = arith.constant 0 : index
    %246 = vector.load %arg7[%245, %c0_69, %c0_70] : memref<8x16x1024xbf16, #tpu.memory_space<vmem>>, vector<1x16x1024xbf16>
    %247 = vector.shape_cast %246 : vector<1x16x1024xbf16> to vector<16x1024xbf16>
    %248 = vector.extract_strided_slice %244 {offsets = [0, 0], sizes = [16, 512], strides = [1, 1]} : vector<16x1024xbf16> to vector<16x512xbf16>
    %249 = arith.extf %248 : vector<16x512xbf16> to vector<16x512xf32>
    %250 = arith.addf %249, %240 : vector<16x512xf32>
    %251 = vector.extract_strided_slice %247 {offsets = [0, 512], sizes = [16, 512], strides = [1, 1]} : vector<16x1024xbf16> to vector<16x512xbf16>
    %252 = arith.extf %251 : vector<16x512xbf16> to vector<16x512xf32>
    %253 = arith.addf %252, %241 : vector<16x512xf32>
    %254 = vector.extract_strided_slice %250 {offsets = [0, 0], sizes = [16, 128], strides = [1, 1]} : vector<16x512xf32> to vector<16x128xf32>
    %255 = arith.negf %254 : vector<16x128xf32>
    %256 = math.exp %255 : vector<16x128xf32>
    %cst_71 = arith.constant 1.000000e+00 : f32
    %257 = vector.broadcast %cst_71 : f32 to vector<16x128xf32>
    %258 = arith.addf %257, %256 : vector<16x128xf32>
    %259 = arith.divf %257, %258 : vector<16x128xf32>
    %260 = vector.extract_strided_slice %250 {offsets = [0, 128], sizes = [16, 128], strides = [1, 1]} : vector<16x512xf32> to vector<16x128xf32>
    %261 = arith.negf %260 : vector<16x128xf32>
    %262 = math.exp %261 : vector<16x128xf32>
    %cst_72 = arith.constant 1.000000e+00 : f32
    %263 = vector.broadcast %cst_72 : f32 to vector<16x128xf32>
    %264 = arith.addf %263, %262 : vector<16x128xf32>
    %265 = arith.divf %263, %264 : vector<16x128xf32>
    %266 = vector.extract_strided_slice %250 {offsets = [0, 256], sizes = [16, 128], strides = [1, 1]} : vector<16x512xf32> to vector<16x128xf32>
    %267 = math.tanh %266 : vector<16x128xf32>
    %268 = vector.extract_strided_slice %250 {offsets = [0, 384], sizes = [16, 128], strides = [1, 1]} : vector<16x512xf32> to vector<16x128xf32>
    %269 = arith.negf %268 : vector<16x128xf32>
    %270 = math.exp %269 : vector<16x128xf32>
    %cst_73 = arith.constant 1.000000e+00 : f32
    %271 = vector.broadcast %cst_73 : f32 to vector<16x128xf32>
    %272 = arith.addf %271, %270 : vector<16x128xf32>
    %273 = arith.divf %271, %272 : vector<16x128xf32>
    %274 = arith.mulf %265, %201 : vector<16x128xf32>
    %275 = arith.mulf %259, %267 : vector<16x128xf32>
    %276 = arith.addf %274, %275 : vector<16x128xf32>
    %277 = math.tanh %276 : vector<16x128xf32>
    %278 = arith.mulf %273, %277 : vector<16x128xf32>
    %279 = vector.extract_strided_slice %253 {offsets = [0, 0], sizes = [16, 128], strides = [1, 1]} : vector<16x512xf32> to vector<16x128xf32>
    %280 = arith.negf %279 : vector<16x128xf32>
    %281 = math.exp %280 : vector<16x128xf32>
    %cst_74 = arith.constant 1.000000e+00 : f32
    %282 = vector.broadcast %cst_74 : f32 to vector<16x128xf32>
    %283 = arith.addf %282, %281 : vector<16x128xf32>
    %284 = arith.divf %282, %283 : vector<16x128xf32>
    %285 = vector.extract_strided_slice %253 {offsets = [0, 128], sizes = [16, 128], strides = [1, 1]} : vector<16x512xf32> to vector<16x128xf32>
    %286 = arith.negf %285 : vector<16x128xf32>
    %287 = math.exp %286 : vector<16x128xf32>
    %cst_75 = arith.constant 1.000000e+00 : f32
    %288 = vector.broadcast %cst_75 : f32 to vector<16x128xf32>
    %289 = arith.addf %288, %287 : vector<16x128xf32>
    %290 = arith.divf %288, %289 : vector<16x128xf32>
    %291 = vector.extract_strided_slice %253 {offsets = [0, 256], sizes = [16, 128], strides = [1, 1]} : vector<16x512xf32> to vector<16x128xf32>
    %292 = math.tanh %291 : vector<16x128xf32>
    %293 = vector.extract_strided_slice %253 {offsets = [0, 384], sizes = [16, 128], strides = [1, 1]} : vector<16x512xf32> to vector<16x128xf32>
    %294 = arith.negf %293 : vector<16x128xf32>
    %295 = math.exp %294 : vector<16x128xf32>
    %cst_76 = arith.constant 1.000000e+00 : f32
    %296 = vector.broadcast %cst_76 : f32 to vector<16x128xf32>
    %297 = arith.addf %296, %295 : vector<16x128xf32>
    %298 = arith.divf %296, %297 : vector<16x128xf32>
    %299 = arith.mulf %290, %226 : vector<16x128xf32>
    %300 = arith.mulf %284, %292 : vector<16x128xf32>
    %301 = arith.addf %299, %300 : vector<16x128xf32>
    %302 = math.tanh %301 : vector<16x128xf32>
    %303 = arith.mulf %298, %302 : vector<16x128xf32>
    %304 = arith.truncf %278 : vector<16x128xf32> to vector<16x128xbf16>
    %305 = arith.truncf %303 : vector<16x128xf32> to vector<16x128xbf16>
    %306 = arith.index_cast %c3_i32 : i32 to index
    %c0_77 = arith.constant 0 : index
    %c0_78 = arith.constant 0 : index
    %307 = vector.load %arg6[%306, %c0_77, %c0_78] : memref<8x16x256xbf16, #tpu.memory_space<vmem>>, vector<1x16x128xbf16>
    %308 = vector.shape_cast %307 : vector<1x16x128xbf16> to vector<16x128xbf16>
    %309 = vector.shape_cast %304 : vector<16x128xbf16> to vector<1x16x128xbf16>
    tpu.vector_store %arg6[%306, %c0_77, %c0_78], %309 {strides = array<i32>} : memref<8x16x256xbf16, #tpu.memory_space<vmem>>, vector<1x16x128xbf16>,
    %310 = arith.index_cast %239 : i32 to index
    %c0_79 = arith.constant 0 : index
    %c128_80 = arith.constant 128 : index
    %311 = vector.load %arg6[%310, %c0_79, %c128_80] : memref<8x16x256xbf16, #tpu.memory_space<vmem>>, vector<1x16x128xbf16>
    %312 = vector.shape_cast %311 : vector<1x16x128xbf16> to vector<16x128xbf16>
    %313 = vector.shape_cast %305 : vector<16x128xbf16> to vector<1x16x128xbf16>
    tpu.vector_store %arg6[%310, %c0_79, %c128_80], %313 {strides = array<i32>} : memref<8x16x256xbf16, #tpu.memory_space<vmem>>, vector<1x16x128xbf16>,
    %c4_i32 = arith.constant 4 : i32
    %c7_i32_81 = arith.constant 7 : i32
    %314 = arith.subi %c7_i32_81, %c4_i32 : i32
    %cst_82 = arith.constant dense<0.000000e+00> : vector<16x512xf32>
    %315 = tpu.matmul %304, %10, %cst_82 {dimension_numbers = #tpu.dot_dimension_numbers<[1], [0], [0], [1], [0, 0, 1, 1], [], []>} : vector<16x128xbf16>, vector<128x512xbf16>, vector<16x512xf32> -> vector<16x512xf32>
    %cst_83 = arith.constant dense<0.000000e+00> : vector<16x512xf32>
    %316 = tpu.matmul %305, %11, %cst_83 {dimension_numbers = #tpu.dot_dimension_numbers<[1], [0], [0], [1], [0, 0, 1, 1], [], []>} : vector<16x128xbf16>, vector<128x512xbf16>, vector<16x512xf32> -> vector<16x512xf32>
    %317 = arith.index_cast %c4_i32 : i32 to index
    %c0_84 = arith.constant 0 : index
    %c0_85 = arith.constant 0 : index
    %318 = vector.load %arg7[%317, %c0_84, %c0_85] : memref<8x16x1024xbf16, #tpu.memory_space<vmem>>, vector<1x16x1024xbf16>
    %319 = vector.shape_cast %318 : vector<1x16x1024xbf16> to vector<16x1024xbf16>
    %320 = arith.index_cast %314 : i32 to index
    %c0_86 = arith.constant 0 : index
    %c0_87 = arith.constant 0 : index
    %321 = vector.load %arg7[%320, %c0_86, %c0_87] : memref<8x16x1024xbf16, #tpu.memory_space<vmem>>, vector<1x16x1024xbf16>
    %322 = vector.shape_cast %321 : vector<1x16x1024xbf16> to vector<16x1024xbf16>
    %323 = vector.extract_strided_slice %319 {offsets = [0, 0], sizes = [16, 512], strides = [1, 1]} : vector<16x1024xbf16> to vector<16x512xbf16>
    %324 = arith.extf %323 : vector<16x512xbf16> to vector<16x512xf32>
    %325 = arith.addf %324, %315 : vector<16x512xf32>
    %326 = vector.extract_strided_slice %322 {offsets = [0, 512], sizes = [16, 512], strides = [1, 1]} : vector<16x1024xbf16> to vector<16x512xbf16>
    %327 = arith.extf %326 : vector<16x512xbf16> to vector<16x512xf32>
    %328 = arith.addf %327, %316 : vector<16x512xf32>
    %329 = vector.extract_strided_slice %325 {offsets = [0, 0], sizes = [16, 128], strides = [1, 1]} : vector<16x512xf32> to vector<16x128xf32>
    %330 = arith.negf %329 : vector<16x128xf32>
    %331 = math.exp %330 : vector<16x128xf32>
    %cst_88 = arith.constant 1.000000e+00 : f32
    %332 = vector.broadcast %cst_88 : f32 to vector<16x128xf32>
    %333 = arith.addf %332, %331 : vector<16x128xf32>
    %334 = arith.divf %332, %333 : vector<16x128xf32>
    %335 = vector.extract_strided_slice %325 {offsets = [0, 128], sizes = [16, 128], strides = [1, 1]} : vector<16x512xf32> to vector<16x128xf32>
    %336 = arith.negf %335 : vector<16x128xf32>
    %337 = math.exp %336 : vector<16x128xf32>
    %cst_89 = arith.constant 1.000000e+00 : f32
    %338 = vector.broadcast %cst_89 : f32 to vector<16x128xf32>
    %339 = arith.addf %338, %337 : vector<16x128xf32>
    %340 = arith.divf %338, %339 : vector<16x128xf32>
    %341 = vector.extract_strided_slice %325 {offsets = [0, 256], sizes = [16, 128], strides = [1, 1]} : vector<16x512xf32> to vector<16x128xf32>
    %342 = math.tanh %341 : vector<16x128xf32>
    %343 = vector.extract_strided_slice %325 {offsets = [0, 384], sizes = [16, 128], strides = [1, 1]} : vector<16x512xf32> to vector<16x128xf32>
    %344 = arith.negf %343 : vector<16x128xf32>
    %345 = math.exp %344 : vector<16x128xf32>
    %cst_90 = arith.constant 1.000000e+00 : f32
    %346 = vector.broadcast %cst_90 : f32 to vector<16x128xf32>
    %347 = arith.addf %346, %345 : vector<16x128xf32>
    %348 = arith.divf %346, %347 : vector<16x128xf32>
    %349 = arith.mulf %340, %276 : vector<16x128xf32>
    %350 = arith.mulf %334, %342 : vector<16x128xf32>
    %351 = arith.addf %349, %350 : vector<16x128xf32>
    %352 = math.tanh %351 : vector<16x128xf32>
    %353 = arith.mulf %348, %352 : vector<16x128xf32>
    %354 = vector.extract_strided_slice %328 {offsets = [0, 0], sizes = [16, 128], strides = [1, 1]} : vector<16x512xf32> to vector<16x128xf32>
    %355 = arith.negf %354 : vector<16x128xf32>
    %356 = math.exp %355 : vector<16x128xf32>
    %cst_91 = arith.constant 1.000000e+00 : f32
    %357 = vector.broadcast %cst_91 : f32 to vector<16x128xf32>
    %358 = arith.addf %357, %356 : vector<16x128xf32>
    %359 = arith.divf %357, %358 : vector<16x128xf32>
    %360 = vector.extract_strided_slice %328 {offsets = [0, 128], sizes = [16, 128], strides = [1, 1]} : vector<16x512xf32> to vector<16x128xf32>
    %361 = arith.negf %360 : vector<16x128xf32>
    %362 = math.exp %361 : vector<16x128xf32>
    %cst_92 = arith.constant 1.000000e+00 : f32
    %363 = vector.broadcast %cst_92 : f32 to vector<16x128xf32>
    %364 = arith.addf %363, %362 : vector<16x128xf32>
    %365 = arith.divf %363, %364 : vector<16x128xf32>
    %366 = vector.extract_strided_slice %328 {offsets = [0, 256], sizes = [16, 128], strides = [1, 1]} : vector<16x512xf32> to vector<16x128xf32>
    %367 = math.tanh %366 : vector<16x128xf32>
    %368 = vector.extract_strided_slice %328 {offsets = [0, 384], sizes = [16, 128], strides = [1, 1]} : vector<16x512xf32> to vector<16x128xf32>
    %369 = arith.negf %368 : vector<16x128xf32>
    %370 = math.exp %369 : vector<16x128xf32>
    %cst_93 = arith.constant 1.000000e+00 : f32
    %371 = vector.broadcast %cst_93 : f32 to vector<16x128xf32>
    %372 = arith.addf %371, %370 : vector<16x128xf32>
    %373 = arith.divf %371, %372 : vector<16x128xf32>
    %374 = arith.mulf %365, %301 : vector<16x128xf32>
    %375 = arith.mulf %359, %367 : vector<16x128xf32>
    %376 = arith.addf %374, %375 : vector<16x128xf32>
    %377 = math.tanh %376 : vector<16x128xf32>
    %378 = arith.mulf %373, %377 : vector<16x128xf32>
    %379 = arith.truncf %353 : vector<16x128xf32> to vector<16x128xbf16>
    %380 = arith.truncf %378 : vector<16x128xf32> to vector<16x128xbf16>
    %381 = arith.index_cast %c4_i32 : i32 to index
    %c0_94 = arith.constant 0 : index
    %c0_95 = arith.constant 0 : index
    %382 = vector.load %arg6[%381, %c0_94, %c0_95] : memref<8x16x256xbf16, #tpu.memory_space<vmem>>, vector<1x16x128xbf16>
    %383 = vector.shape_cast %382 : vector<1x16x128xbf16> to vector<16x128xbf16>
    %384 = vector.shape_cast %379 : vector<16x128xbf16> to vector<1x16x128xbf16>
    tpu.vector_store %arg6[%381, %c0_94, %c0_95], %384 {strides = array<i32>} : memref<8x16x256xbf16, #tpu.memory_space<vmem>>, vector<1x16x128xbf16>,
    %385 = arith.index_cast %314 : i32 to index
    %c0_96 = arith.constant 0 : index
    %c128_97 = arith.constant 128 : index
    %386 = vector.load %arg6[%385, %c0_96, %c128_97] : memref<8x16x256xbf16, #tpu.memory_space<vmem>>, vector<1x16x128xbf16>
    %387 = vector.shape_cast %386 : vector<1x16x128xbf16> to vector<16x128xbf16>
    %388 = vector.shape_cast %380 : vector<16x128xbf16> to vector<1x16x128xbf16>
    tpu.vector_store %arg6[%385, %c0_96, %c128_97], %388 {strides = array<i32>} : memref<8x16x256xbf16, #tpu.memory_space<vmem>>, vector<1x16x128xbf16>,
    %c5_i32 = arith.constant 5 : i32
    %c7_i32_98 = arith.constant 7 : i32
    %389 = arith.subi %c7_i32_98, %c5_i32 : i32
    %cst_99 = arith.constant dense<0.000000e+00> : vector<16x512xf32>
    %390 = tpu.matmul %379, %10, %cst_99 {dimension_numbers = #tpu.dot_dimension_numbers<[1], [0], [0], [1], [0, 0, 1, 1], [], []>} : vector<16x128xbf16>, vector<128x512xbf16>, vector<16x512xf32> -> vector<16x512xf32>
    %cst_100 = arith.constant dense<0.000000e+00> : vector<16x512xf32>
    %391 = tpu.matmul %380, %11, %cst_100 {dimension_numbers = #tpu.dot_dimension_numbers<[1], [0], [0], [1], [0, 0, 1, 1], [], []>} : vector<16x128xbf16>, vector<128x512xbf16>, vector<16x512xf32> -> vector<16x512xf32>
    %392 = arith.index_cast %c5_i32 : i32 to index
    %c0_101 = arith.constant 0 : index
    %c0_102 = arith.constant 0 : index
    %393 = vector.load %arg7[%392, %c0_101, %c0_102] : memref<8x16x1024xbf16, #tpu.memory_space<vmem>>, vector<1x16x1024xbf16>
    %394 = vector.shape_cast %393 : vector<1x16x1024xbf16> to vector<16x1024xbf16>
    %395 = arith.index_cast %389 : i32 to index
    %c0_103 = arith.constant 0 : index
    %c0_104 = arith.constant 0 : index
    %396 = vector.load %arg7[%395, %c0_103, %c0_104] : memref<8x16x1024xbf16, #tpu.memory_space<vmem>>, vector<1x16x1024xbf16>
    %397 = vector.shape_cast %396 : vector<1x16x1024xbf16> to vector<16x1024xbf16>
    %398 = vector.extract_strided_slice %394 {offsets = [0, 0], sizes = [16, 512], strides = [1, 1]} : vector<16x1024xbf16> to vector<16x512xbf16>
    %399 = arith.extf %398 : vector<16x512xbf16> to vector<16x512xf32>
    %400 = arith.addf %399, %390 : vector<16x512xf32>
    %401 = vector.extract_strided_slice %397 {offsets = [0, 512], sizes = [16, 512], strides = [1, 1]} : vector<16x1024xbf16> to vector<16x512xbf16>
    %402 = arith.extf %401 : vector<16x512xbf16> to vector<16x512xf32>
    %403 = arith.addf %402, %391 : vector<16x512xf32>
    %404 = vector.extract_strided_slice %400 {offsets = [0, 0], sizes = [16, 128], strides = [1, 1]} : vector<16x512xf32> to vector<16x128xf32>
    %405 = arith.negf %404 : vector<16x128xf32>
    %406 = math.exp %405 : vector<16x128xf32>
    %cst_105 = arith.constant 1.000000e+00 : f32
    %407 = vector.broadcast %cst_105 : f32 to vector<16x128xf32>
    %408 = arith.addf %407, %406 : vector<16x128xf32>
    %409 = arith.divf %407, %408 : vector<16x128xf32>
    %410 = vector.extract_strided_slice %400 {offsets = [0, 128], sizes = [16, 128], strides = [1, 1]} : vector<16x512xf32> to vector<16x128xf32>
    %411 = arith.negf %410 : vector<16x128xf32>
    %412 = math.exp %411 : vector<16x128xf32>
    %cst_106 = arith.constant 1.000000e+00 : f32
    %413 = vector.broadcast %cst_106 : f32 to vector<16x128xf32>
    %414 = arith.addf %413, %412 : vector<16x128xf32>
    %415 = arith.divf %413, %414 : vector<16x128xf32>
    %416 = vector.extract_strided_slice %400 {offsets = [0, 256], sizes = [16, 128], strides = [1, 1]} : vector<16x512xf32> to vector<16x128xf32>
    %417 = math.tanh %416 : vector<16x128xf32>
    %418 = vector.extract_strided_slice %400 {offsets = [0, 384], sizes = [16, 128], strides = [1, 1]} : vector<16x512xf32> to vector<16x128xf32>
    %419 = arith.negf %418 : vector<16x128xf32>
    %420 = math.exp %419 : vector<16x128xf32>
    %cst_107 = arith.constant 1.000000e+00 : f32
    %421 = vector.broadcast %cst_107 : f32 to vector<16x128xf32>
    %422 = arith.addf %421, %420 : vector<16x128xf32>
    %423 = arith.divf %421, %422 : vector<16x128xf32>
    %424 = arith.mulf %415, %351 : vector<16x128xf32>
    %425 = arith.mulf %409, %417 : vector<16x128xf32>
    %426 = arith.addf %424, %425 : vector<16x128xf32>
    %427 = math.tanh %426 : vector<16x128xf32>
    %428 = arith.mulf %423, %427 : vector<16x128xf32>
    %429 = vector.extract_strided_slice %403 {offsets = [0, 0], sizes = [16, 128], strides = [1, 1]} : vector<16x512xf32> to vector<16x128xf32>
    %430 = arith.negf %429 : vector<16x128xf32>
    %431 = math.exp %430 : vector<16x128xf32>
    %cst_108 = arith.constant 1.000000e+00 : f32
    %432 = vector.broadcast %cst_108 : f32 to vector<16x128xf32>
    %433 = arith.addf %432, %431 : vector<16x128xf32>
    %434 = arith.divf %432, %433 : vector<16x128xf32>
    %435 = vector.extract_strided_slice %403 {offsets = [0, 128], sizes = [16, 128], strides = [1, 1]} : vector<16x512xf32> to vector<16x128xf32>
    %436 = arith.negf %435 : vector<16x128xf32>
    %437 = math.exp %436 : vector<16x128xf32>
    %cst_109 = arith.constant 1.000000e+00 : f32
    %438 = vector.broadcast %cst_109 : f32 to vector<16x128xf32>
    %439 = arith.addf %438, %437 : vector<16x128xf32>
    %440 = arith.divf %438, %439 : vector<16x128xf32>
    %441 = vector.extract_strided_slice %403 {offsets = [0, 256], sizes = [16, 128], strides = [1, 1]} : vector<16x512xf32> to vector<16x128xf32>
    %442 = math.tanh %441 : vector<16x128xf32>
    %443 = vector.extract_strided_slice %403 {offsets = [0, 384], sizes = [16, 128], strides = [1, 1]} : vector<16x512xf32> to vector<16x128xf32>
    %444 = arith.negf %443 : vector<16x128xf32>
    %445 = math.exp %444 : vector<16x128xf32>
    %cst_110 = arith.constant 1.000000e+00 : f32
    %446 = vector.broadcast %cst_110 : f32 to vector<16x128xf32>
    %447 = arith.addf %446, %445 : vector<16x128xf32>
    %448 = arith.divf %446, %447 : vector<16x128xf32>
    %449 = arith.mulf %440, %376 : vector<16x128xf32>
    %450 = arith.mulf %434, %442 : vector<16x128xf32>
    %451 = arith.addf %449, %450 : vector<16x128xf32>
    %452 = math.tanh %451 : vector<16x128xf32>
    %453 = arith.mulf %448, %452 : vector<16x128xf32>
    %454 = arith.truncf %428 : vector<16x128xf32> to vector<16x128xbf16>
    %455 = arith.truncf %453 : vector<16x128xf32> to vector<16x128xbf16>
    %456 = arith.index_cast %c5_i32 : i32 to index
    %c0_111 = arith.constant 0 : index
    %c0_112 = arith.constant 0 : index
    %457 = vector.load %arg6[%456, %c0_111, %c0_112] : memref<8x16x256xbf16, #tpu.memory_space<vmem>>, vector<1x16x128xbf16>
    %458 = vector.shape_cast %457 : vector<1x16x128xbf16> to vector<16x128xbf16>
    %459 = vector.shape_cast %454 : vector<16x128xbf16> to vector<1x16x128xbf16>
    tpu.vector_store %arg6[%456, %c0_111, %c0_112], %459 {strides = array<i32>} : memref<8x16x256xbf16, #tpu.memory_space<vmem>>, vector<1x16x128xbf16>,
    %460 = arith.index_cast %389 : i32 to index
    %c0_113 = arith.constant 0 : index
    %c128_114 = arith.constant 128 : index
    %461 = vector.load %arg6[%460, %c0_113, %c128_114] : memref<8x16x256xbf16, #tpu.memory_space<vmem>>, vector<1x16x128xbf16>
    %462 = vector.shape_cast %461 : vector<1x16x128xbf16> to vector<16x128xbf16>
    %463 = vector.shape_cast %455 : vector<16x128xbf16> to vector<1x16x128xbf16>
    tpu.vector_store %arg6[%460, %c0_113, %c128_114], %463 {strides = array<i32>} : memref<8x16x256xbf16, #tpu.memory_space<vmem>>, vector<1x16x128xbf16>,
    %c6_i32 = arith.constant 6 : i32
    %c7_i32_115 = arith.constant 7 : i32
    %464 = arith.subi %c7_i32_115, %c6_i32 : i32
    %cst_116 = arith.constant dense<0.000000e+00> : vector<16x512xf32>
    %465 = tpu.matmul %454, %10, %cst_116 {dimension_numbers = #tpu.dot_dimension_numbers<[1], [0], [0], [1], [0, 0, 1, 1], [], []>} : vector<16x128xbf16>, vector<128x512xbf16>, vector<16x512xf32> -> vector<16x512xf32>
    %cst_117 = arith.constant dense<0.000000e+00> : vector<16x512xf32>
    %466 = tpu.matmul %455, %11, %cst_117 {dimension_numbers = #tpu.dot_dimension_numbers<[1], [0], [0], [1], [0, 0, 1, 1], [], []>} : vector<16x128xbf16>, vector<128x512xbf16>, vector<16x512xf32> -> vector<16x512xf32>
    %467 = arith.index_cast %c6_i32 : i32 to index
    %c0_118 = arith.constant 0 : index
    %c0_119 = arith.constant 0 : index
    %468 = vector.load %arg7[%467, %c0_118, %c0_119] : memref<8x16x1024xbf16, #tpu.memory_space<vmem>>, vector<1x16x1024xbf16>
    %469 = vector.shape_cast %468 : vector<1x16x1024xbf16> to vector<16x1024xbf16>
    %470 = arith.index_cast %464 : i32 to index
    %c0_120 = arith.constant 0 : index
    %c0_121 = arith.constant 0 : index
    %471 = vector.load %arg7[%470, %c0_120, %c0_121] : memref<8x16x1024xbf16, #tpu.memory_space<vmem>>, vector<1x16x1024xbf16>
    %472 = vector.shape_cast %471 : vector<1x16x1024xbf16> to vector<16x1024xbf16>
    %473 = vector.extract_strided_slice %469 {offsets = [0, 0], sizes = [16, 512], strides = [1, 1]} : vector<16x1024xbf16> to vector<16x512xbf16>
    %474 = arith.extf %473 : vector<16x512xbf16> to vector<16x512xf32>
    %475 = arith.addf %474, %465 : vector<16x512xf32>
    %476 = vector.extract_strided_slice %472 {offsets = [0, 512], sizes = [16, 512], strides = [1, 1]} : vector<16x1024xbf16> to vector<16x512xbf16>
    %477 = arith.extf %476 : vector<16x512xbf16> to vector<16x512xf32>
    %478 = arith.addf %477, %466 : vector<16x512xf32>
    %479 = vector.extract_strided_slice %475 {offsets = [0, 0], sizes = [16, 128], strides = [1, 1]} : vector<16x512xf32> to vector<16x128xf32>
    %480 = arith.negf %479 : vector<16x128xf32>
    %481 = math.exp %480 : vector<16x128xf32>
    %cst_122 = arith.constant 1.000000e+00 : f32
    %482 = vector.broadcast %cst_122 : f32 to vector<16x128xf32>
    %483 = arith.addf %482, %481 : vector<16x128xf32>
    %484 = arith.divf %482, %483 : vector<16x128xf32>
    %485 = vector.extract_strided_slice %475 {offsets = [0, 128], sizes = [16, 128], strides = [1, 1]} : vector<16x512xf32> to vector<16x128xf32>
    %486 = arith.negf %485 : vector<16x128xf32>
    %487 = math.exp %486 : vector<16x128xf32>
    %cst_123 = arith.constant 1.000000e+00 : f32
    %488 = vector.broadcast %cst_123 : f32 to vector<16x128xf32>
    %489 = arith.addf %488, %487 : vector<16x128xf32>
    %490 = arith.divf %488, %489 : vector<16x128xf32>
    %491 = vector.extract_strided_slice %475 {offsets = [0, 256], sizes = [16, 128], strides = [1, 1]} : vector<16x512xf32> to vector<16x128xf32>
    %492 = math.tanh %491 : vector<16x128xf32>
    %493 = vector.extract_strided_slice %475 {offsets = [0, 384], sizes = [16, 128], strides = [1, 1]} : vector<16x512xf32> to vector<16x128xf32>
    %494 = arith.negf %493 : vector<16x128xf32>
    %495 = math.exp %494 : vector<16x128xf32>
    %cst_124 = arith.constant 1.000000e+00 : f32
    %496 = vector.broadcast %cst_124 : f32 to vector<16x128xf32>
    %497 = arith.addf %496, %495 : vector<16x128xf32>
    %498 = arith.divf %496, %497 : vector<16x128xf32>
    %499 = arith.mulf %490, %426 : vector<16x128xf32>
    %500 = arith.mulf %484, %492 : vector<16x128xf32>
    %501 = arith.addf %499, %500 : vector<16x128xf32>
    %502 = math.tanh %501 : vector<16x128xf32>
    %503 = arith.mulf %498, %502 : vector<16x128xf32>
    %504 = vector.extract_strided_slice %478 {offsets = [0, 0], sizes = [16, 128], strides = [1, 1]} : vector<16x512xf32> to vector<16x128xf32>
    %505 = arith.negf %504 : vector<16x128xf32>
    %506 = math.exp %505 : vector<16x128xf32>
    %cst_125 = arith.constant 1.000000e+00 : f32
    %507 = vector.broadcast %cst_125 : f32 to vector<16x128xf32>
    %508 = arith.addf %507, %506 : vector<16x128xf32>
    %509 = arith.divf %507, %508 : vector<16x128xf32>
    %510 = vector.extract_strided_slice %478 {offsets = [0, 128], sizes = [16, 128], strides = [1, 1]} : vector<16x512xf32> to vector<16x128xf32>
    %511 = arith.negf %510 : vector<16x128xf32>
    %512 = math.exp %511 : vector<16x128xf32>
    %cst_126 = arith.constant 1.000000e+00 : f32
    %513 = vector.broadcast %cst_126 : f32 to vector<16x128xf32>
    %514 = arith.addf %513, %512 : vector<16x128xf32>
    %515 = arith.divf %513, %514 : vector<16x128xf32>
    %516 = vector.extract_strided_slice %478 {offsets = [0, 256], sizes = [16, 128], strides = [1, 1]} : vector<16x512xf32> to vector<16x128xf32>
    %517 = math.tanh %516 : vector<16x128xf32>
    %518 = vector.extract_strided_slice %478 {offsets = [0, 384], sizes = [16, 128], strides = [1, 1]} : vector<16x512xf32> to vector<16x128xf32>
    %519 = arith.negf %518 : vector<16x128xf32>
    %520 = math.exp %519 : vector<16x128xf32>
    %cst_127 = arith.constant 1.000000e+00 : f32
    %521 = vector.broadcast %cst_127 : f32 to vector<16x128xf32>
    %522 = arith.addf %521, %520 : vector<16x128xf32>
    %523 = arith.divf %521, %522 : vector<16x128xf32>
    %524 = arith.mulf %515, %451 : vector<16x128xf32>
    %525 = arith.mulf %509, %517 : vector<16x128xf32>
    %526 = arith.addf %524, %525 : vector<16x128xf32>
    %527 = math.tanh %526 : vector<16x128xf32>
    %528 = arith.mulf %523, %527 : vector<16x128xf32>
    %529 = arith.truncf %503 : vector<16x128xf32> to vector<16x128xbf16>
    %530 = arith.truncf %528 : vector<16x128xf32> to vector<16x128xbf16>
    %531 = arith.index_cast %c6_i32 : i32 to index
    %c0_128 = arith.constant 0 : index
    %c0_129 = arith.constant 0 : index
    %532 = vector.load %arg6[%531, %c0_128, %c0_129] : memref<8x16x256xbf16, #tpu.memory_space<vmem>>, vector<1x16x128xbf16>
    %533 = vector.shape_cast %532 : vector<1x16x128xbf16> to vector<16x128xbf16>
    %534 = vector.shape_cast %529 : vector<16x128xbf16> to vector<1x16x128xbf16>
    tpu.vector_store %arg6[%531, %c0_128, %c0_129], %534 {strides = array<i32>} : memref<8x16x256xbf16, #tpu.memory_space<vmem>>, vector<1x16x128xbf16>,
    %535 = arith.index_cast %464 : i32 to index
    %c0_130 = arith.constant 0 : index
    %c128_131 = arith.constant 128 : index
    %536 = vector.load %arg6[%535, %c0_130, %c128_131] : memref<8x16x256xbf16, #tpu.memory_space<vmem>>, vector<1x16x128xbf16>
    %537 = vector.shape_cast %536 : vector<1x16x128xbf16> to vector<16x128xbf16>
    %538 = vector.shape_cast %530 : vector<16x128xbf16> to vector<1x16x128xbf16>
    tpu.vector_store %arg6[%535, %c0_130, %c128_131], %538 {strides = array<i32>} : memref<8x16x256xbf16, #tpu.memory_space<vmem>>, vector<1x16x128xbf16>,
    %c7_i32_132 = arith.constant 7 : i32
    %c7_i32_133 = arith.constant 7 : i32
    %539 = arith.subi %c7_i32_133, %c7_i32_132 : i32
    %cst_134 = arith.constant dense<0.000000e+00> : vector<16x512xf32>
    %540 = tpu.matmul %529, %10, %cst_134 {dimension_numbers = #tpu.dot_dimension_numbers<[1], [0], [0], [1], [0, 0, 1, 1], [], []>} : vector<16x128xbf16>, vector<128x512xbf16>, vector<16x512xf32> -> vector<16x512xf32>
    %cst_135 = arith.constant dense<0.000000e+00> : vector<16x512xf32>
    %541 = tpu.matmul %530, %11, %cst_135 {dimension_numbers = #tpu.dot_dimension_numbers<[1], [0], [0], [1], [0, 0, 1, 1], [], []>} : vector<16x128xbf16>, vector<128x512xbf16>, vector<16x512xf32> -> vector<16x512xf32>
    %542 = arith.index_cast %c7_i32_132 : i32 to index
    %c0_136 = arith.constant 0 : index
    %c0_137 = arith.constant 0 : index
    %543 = vector.load %arg7[%542, %c0_136, %c0_137] : memref<8x16x1024xbf16, #tpu.memory_space<vmem>>, vector<1x16x1024xbf16>
    %544 = vector.shape_cast %543 : vector<1x16x1024xbf16> to vector<16x1024xbf16>
    %545 = arith.index_cast %539 : i32 to index
    %c0_138 = arith.constant 0 : index
    %c0_139 = arith.constant 0 : index
    %546 = vector.load %arg7[%545, %c0_138, %c0_139] : memref<8x16x1024xbf16, #tpu.memory_space<vmem>>, vector<1x16x1024xbf16>
    %547 = vector.shape_cast %546 : vector<1x16x1024xbf16> to vector<16x1024xbf16>
    %548 = vector.extract_strided_slice %544 {offsets = [0, 0], sizes = [16, 512], strides = [1, 1]} : vector<16x1024xbf16> to vector<16x512xbf16>
    %549 = arith.extf %548 : vector<16x512xbf16> to vector<16x512xf32>
    %550 = arith.addf %549, %540 : vector<16x512xf32>
    %551 = vector.extract_strided_slice %547 {offsets = [0, 512], sizes = [16, 512], strides = [1, 1]} : vector<16x1024xbf16> to vector<16x512xbf16>
    %552 = arith.extf %551 : vector<16x512xbf16> to vector<16x512xf32>
    %553 = arith.addf %552, %541 : vector<16x512xf32>
    %554 = vector.extract_strided_slice %550 {offsets = [0, 0], sizes = [16, 128], strides = [1, 1]} : vector<16x512xf32> to vector<16x128xf32>
    %555 = arith.negf %554 : vector<16x128xf32>
    %556 = math.exp %555 : vector<16x128xf32>
    %cst_140 = arith.constant 1.000000e+00 : f32
    %557 = vector.broadcast %cst_140 : f32 to vector<16x128xf32>
    %558 = arith.addf %557, %556 : vector<16x128xf32>
    %559 = arith.divf %557, %558 : vector<16x128xf32>
    %560 = vector.extract_strided_slice %550 {offsets = [0, 128], sizes = [16, 128], strides = [1, 1]} : vector<16x512xf32> to vector<16x128xf32>
    %561 = arith.negf %560 : vector<16x128xf32>
    %562 = math.exp %561 : vector<16x128xf32>
    %cst_141 = arith.constant 1.000000e+00 : f32
    %563 = vector.broadcast %cst_141 : f32 to vector<16x128xf32>
    %564 = arith.addf %563, %562 : vector<16x128xf32>
    %565 = arith.divf %563, %564 : vector<16x128xf32>
    %566 = vector.extract_strided_slice %550 {offsets = [0, 256], sizes = [16, 128], strides = [1, 1]} : vector<16x512xf32> to vector<16x128xf32>
    %567 = math.tanh %566 : vector<16x128xf32>
    %568 = vector.extract_strided_slice %550 {offsets = [0, 384], sizes = [16, 128], strides = [1, 1]} : vector<16x512xf32> to vector<16x128xf32>
    %569 = arith.negf %568 : vector<16x128xf32>
    %570 = math.exp %569 : vector<16x128xf32>
    %cst_142 = arith.constant 1.000000e+00 : f32
    %571 = vector.broadcast %cst_142 : f32 to vector<16x128xf32>
    %572 = arith.addf %571, %570 : vector<16x128xf32>
    %573 = arith.divf %571, %572 : vector<16x128xf32>
    %574 = arith.mulf %565, %501 : vector<16x128xf32>
    %575 = arith.mulf %559, %567 : vector<16x128xf32>
    %576 = arith.addf %574, %575 : vector<16x128xf32>
    %577 = math.tanh %576 : vector<16x128xf32>
    %578 = arith.mulf %573, %577 : vector<16x128xf32>
    %579 = vector.extract_strided_slice %553 {offsets = [0, 0], sizes = [16, 128], strides = [1, 1]} : vector<16x512xf32> to vector<16x128xf32>
    %580 = arith.negf %579 : vector<16x128xf32>
    %581 = math.exp %580 : vector<16x128xf32>
    %cst_143 = arith.constant 1.000000e+00 : f32
    %582 = vector.broadcast %cst_143 : f32 to vector<16x128xf32>
    %583 = arith.addf %582, %581 : vector<16x128xf32>
    %584 = arith.divf %582, %583 : vector<16x128xf32>
    %585 = vector.extract_strided_slice %553 {offsets = [0, 128], sizes = [16, 128], strides = [1, 1]} : vector<16x512xf32> to vector<16x128xf32>
    %586 = arith.negf %585 : vector<16x128xf32>
    %587 = math.exp %586 : vector<16x128xf32>
    %cst_144 = arith.constant 1.000000e+00 : f32
    %588 = vector.broadcast %cst_144 : f32 to vector<16x128xf32>
    %589 = arith.addf %588, %587 : vector<16x128xf32>
    %590 = arith.divf %588, %589 : vector<16x128xf32>
    %591 = vector.extract_strided_slice %553 {offsets = [0, 256], sizes = [16, 128], strides = [1, 1]} : vector<16x512xf32> to vector<16x128xf32>
    %592 = math.tanh %591 : vector<16x128xf32>
    %593 = vector.extract_strided_slice %553 {offsets = [0, 384], sizes = [16, 128], strides = [1, 1]} : vector<16x512xf32> to vector<16x128xf32>
    %594 = arith.negf %593 : vector<16x128xf32>
    %595 = math.exp %594 : vector<16x128xf32>
    %cst_145 = arith.constant 1.000000e+00 : f32
    %596 = vector.broadcast %cst_145 : f32 to vector<16x128xf32>
    %597 = arith.addf %596, %595 : vector<16x128xf32>
    %598 = arith.divf %596, %597 : vector<16x128xf32>
    %599 = arith.mulf %590, %526 : vector<16x128xf32>
    %600 = arith.mulf %584, %592 : vector<16x128xf32>
    %601 = arith.addf %599, %600 : vector<16x128xf32>
    %602 = math.tanh %601 : vector<16x128xf32>
    %603 = arith.mulf %598, %602 : vector<16x128xf32>
    %604 = arith.truncf %578 : vector<16x128xf32> to vector<16x128xbf16>
    %605 = arith.truncf %603 : vector<16x128xf32> to vector<16x128xbf16>
    %606 = arith.index_cast %c7_i32_132 : i32 to index
    %c0_146 = arith.constant 0 : index
    %c0_147 = arith.constant 0 : index
    %607 = vector.load %arg6[%606, %c0_146, %c0_147] : memref<8x16x256xbf16, #tpu.memory_space<vmem>>, vector<1x16x128xbf16>
    %608 = vector.shape_cast %607 : vector<1x16x128xbf16> to vector<16x128xbf16>
    %609 = vector.shape_cast %604 : vector<16x128xbf16> to vector<1x16x128xbf16>
    tpu.vector_store %arg6[%606, %c0_146, %c0_147], %609 {strides = array<i32>} : memref<8x16x256xbf16, #tpu.memory_space<vmem>>, vector<1x16x128xbf16>,
    %610 = arith.index_cast %539 : i32 to index
    %c0_148 = arith.constant 0 : index
    %c128_149 = arith.constant 128 : index
    %611 = vector.load %arg6[%610, %c0_148, %c128_149] : memref<8x16x256xbf16, #tpu.memory_space<vmem>>, vector<1x16x128xbf16>
    %612 = vector.shape_cast %611 : vector<1x16x128xbf16> to vector<16x128xbf16>
    %613 = vector.shape_cast %605 : vector<16x128xbf16> to vector<1x16x128xbf16>
    tpu.vector_store %arg6[%610, %c0_148, %c128_149], %613 {strides = array<i32>} : memref<8x16x256xbf16, #tpu.memory_space<vmem>>, vector<1x16x128xbf16>,
    %c8_i32 = arith.constant 8 : i32
    return
  }
  func.func @transform_0(%arg0: i32) -> (i32, i32, i32) {
    %c0_i32 = arith.constant 0 : i32
    %c0_i32_0 = arith.constant 0 : i32
    %c0_i32_1 = arith.constant 0 : i32
    return %c0_i32, %arg0, %c0_i32_0 : i32, i32, i32
  }
  func.func @transform_1(%arg0: i32) -> (i32, i32) {
    %c0_i32 = arith.constant 0 : i32
    %c0_i32_0 = arith.constant 0 : i32
    %c0_i32_1 = arith.constant 0 : i32
    return %c0_i32, %c0_i32_0 : i32, i32
  }
  func.func @transform_2(%arg0: i32) -> (i32, i32) {
    %c0_i32 = arith.constant 0 : i32
    %c0_i32_0 = arith.constant 0 : i32
    %c0_i32_1 = arith.constant 0 : i32
    return %c0_i32, %c0_i32_0 : i32, i32
  }
  func.func @transform_3(%arg0: i32) -> (i32, i32) {
    %c0_i32 = arith.constant 0 : i32
    %c0_i32_0 = arith.constant 0 : i32
    %c0_i32_1 = arith.constant 0 : i32
    return %c0_i32, %c0_i32_0 : i32, i32
  }
  func.func @transform_4(%arg0: i32) -> (i32, i32) {
    %c0_i32 = arith.constant 0 : i32
    %c0_i32_0 = arith.constant 0 : i32
    %c0_i32_1 = arith.constant 0 : i32
    return %c0_i32, %c0_i32_0 : i32, i32
  }
  func.func @transform_5(%arg0: i32) -> (i32, i32, i32) {
    %c0_i32 = arith.constant 0 : i32
    %c0_i32_0 = arith.constant 0 : i32
    %c0_i32_1 = arith.constant 0 : i32
    return %c0_i32, %arg0, %c0_i32_0 : i32, i32, i32
  }
}

</mosaic_0001>

<bundles_post_ra>
// kernel: tpu_custom_call.1
= control target key start
LH: loop header
LB: loop body
LE: loop exit
PB: predicated region body
PF: predicated region fallthrough
CT: control target
= control target key end

     0   :  { %10 = vsyncpa [#allocation4], 0  ;;  %s6716_s0 = inlined_call_operand.hbm [shape: bf16[8,16,32], index: 0, kind: input, shape index: {}]   ;;  %s6717_s1 = inlined_call_operand.hbm [shape: bf16[32,1024], index: 1, kind: input, shape index: {}]   ;;  %s6718_s2 = inlined_call_operand.hbm [shape: bf16[128,512], index: 2, kind: input, shape index: {}]   ;;  %s6719_s3 = inlined_call_operand.hbm [shape: bf16[128,512], index: 3, kind: input, shape index: {}]   ;;  %s6720_s4 = inlined_call_operand.hbm [shape: f32[1,1024], index: 4, kind: input, shape index: {}]   ;;  %s6721_s5 = inlined_call_operand.hbm [shape: bf16[8,16,256], index: 5, kind: output, shape index: {}]  }
   0x1   :  { %11 = vsyncpa [#allocation7], 0 }
   0x2   :  { %12 = vsyncpa [#allocation10], 0 }
   0x3   :  { %13 = vsyncpa [#allocation5], 0  ;;  %s5137_s18 = smov [#allocation6]   ;;  %s4997_s22 = scalar_lea.hbm %s6717_s1, 2048 }
   0x4   :  { %s31_s19 = sshll.u32 %s5137_s18, 4  ;;  %p4998_p0 = scmp.ne.s32.totalorder %s6717_s1, %s4997_s22  ;;  %s32_s19 = int_to_ptr.vmem [resolvable:$true] %s31_s19 }
   0x5   :  { %p5001_p1 = scmp.lt.u32.totalorder %s4997_s22, %s6717_s1 }
   0x7   :  { %p5003_p2 = pnand %p5001_p1, %p4998_p0 }
   0x9   :  { %5006 = shalt.err (!%p5003_p2)
}
   0xa   :  { %s5007_s27 = scalar_lea.vmem %s32_s19, 2048  ;;  %p5012_p4 = scmp.lt.s32.totalorder %s32_s19, %s32_s19 }
   0xb   :  { %p5008_p3 = scmp.ne.s32.totalorder %s32_s19, %s5007_s27  ;;  %p5013_p5 = scmp.lt.s32.totalorder %s5007_s27, %s5007_s27 }
   0xd   :  { %p5014_p6 = por %p5013_p5, %p5012_p4 }
   0xf   :  { %p5015_p7 = pnand %p5014_p6, %p5008_p3 }
  0x11   :  { %5018 = shalt.err (!%p5015_p7)
}
  0x12   :  { %s5138_s28 = smov 512   ;;  %s5139_s29 = smov 32  }
  0x13   :  { %37 = dma.hbm_to_vmem [thread:$0]  %s6717_s1, 2048, %s32_s19, [#allocation7], %s5138_s28, %s5138_s28, %s5139_s29  }
  0x14   :  { %s5140_s7 = smov [#allocation9]   ;;  %s5141_s9 = smov [#allocation3]  }
  0x15   :  { %s55_s8 = sshll.u32 %s5140_s7, 4  ;;  %s19_s10 = sshll.u32 %s5141_s9, 4  ;;  %s56_s8 = int_to_ptr.vmem [resolvable:$true] %s55_s8  ;;  %s20_s10 = int_to_ptr.vmem [resolvable:$true] %s19_s10 }
  0x16   :  { %s5019_s13 = scalar_lea.hbm %s6719_s3, 4096 }
  0x17   :  { %p5020_p8 = scmp.ne.s32.totalorder %s6719_s3, %s5019_s13  ;;  %p5023_p9 = scmp.lt.u32.totalorder %s5019_s13, %s6719_s3 }
  0x19   :  { %p5025_p10 = pnand %p5023_p9, %p5020_p8 }
  0x1b   :  { %5028 = shalt.err (!%p5025_p10)
}
  0x1c   :  { %s5029_s1 = scalar_lea.vmem %s56_s8, 4096  ;;  %p5034_p12 = scmp.lt.s32.totalorder %s56_s8, %s56_s8 }
  0x1d   :  { %p5030_p11 = scmp.ne.s32.totalorder %s56_s8, %s5029_s1  ;;  %p5035_p13 = scmp.lt.s32.totalorder %s5029_s1, %s5029_s1 }
  0x1f   :  { %p5036_p0 = por %p5035_p13, %p5034_p12 }
  0x21   :  { %p5037_p1 = pnand %p5036_p0, %p5030_p11 }
  0x23   :  { %5040 = shalt.err (!%p5037_p1)
}
  0x24   :  { %s5142_s18 = smov 256   ;;  %s5143_s19 = smov 16  }
  0x25   :  { %61 = dma.hbm_to_vmem [thread:$0]  %s6719_s3, 4096, %s56_s8, [#allocation10], %s5142_s18, %s5142_s18, %s5143_s19  }
  0x26   :  { %s5041_s24 = scalar_lea.hbm %s6716_s0, 1024 }
  0x27   :  { %p5042_p2 = scmp.ne.s32.totalorder %s6716_s0, %s5041_s24  ;;  %p5045_p3 = scmp.lt.u32.totalorder %s5041_s24, %s6716_s0 }
  0x29   :  { %p5047_p4 = pnand %p5045_p3, %p5042_p2 }
  0x2b   :  { %5050 = shalt.err (!%p5047_p4)
}
  0x2c   :  { %s5051_s29 = scalar_lea.vmem %s20_s10, 1024  ;;  %p5056_p6 = scmp.lt.s32.totalorder %s20_s10, %s20_s10 }
  0x2d   :  { %p5052_p5 = scmp.ne.s32.totalorder %s20_s10, %s5051_s29  ;;  %p5057_p7 = scmp.lt.s32.totalorder %s5051_s29, %s5051_s29 }
  0x2f   :  { %p5058_p8 = por %p5057_p7, %p5056_p6 }
  0x31   :  { %p5059_p9 = pnand %p5058_p8, %p5052_p5 }
  0x33   :  { %5062 = shalt.err (!%p5059_p9)
}
  0x34   :  { %s5144_s3 = smov 64   ;;  %s5145_s30 = smov 4  }
  0x35   :  { %25 = dma.hbm_to_vmem [thread:$0]  %s6716_s0, 1024, %s20_s10, [#allocation4], %s5144_s3, %s5144_s3, %s5145_s30  }
  0x36   :  { %s5146_s8 = smov [#allocation8]   ;;  %s5147_s11 = smov [#allocation11]  }
  0x37   :  { %s43_s9 = sshll.u32 %s5146_s8, 4  ;;  %s68_s12 = sshll.u32 %s5147_s11, 4  ;;  %s44_s9 = int_to_ptr.vmem [resolvable:$true] %s43_s9  ;;  %s69_s12 = int_to_ptr.vmem [resolvable:$true] %s68_s12 }
  0x38   :  { %s5063_s15 = scalar_lea.hbm %s6718_s2, 4096 }
  0x39   :  { %p5064_p10 = scmp.ne.s32.totalorder %s6718_s2, %s5063_s15  ;;  %p5067_p11 = scmp.lt.u32.totalorder %s5063_s15, %s6718_s2 }
  0x3b   :  { %p5069_p12 = pnand %p5067_p11, %p5064_p10 }
  0x3d   :  { %5072 = shalt.err (!%p5069_p12)
}
  0x3e   :  { %s5073_s0 = scalar_lea.vmem %s44_s9, 4096  ;;  %p5078_p0 = scmp.lt.s32.totalorder %s44_s9, %s44_s9 }
  0x3f   :  { %p5074_p13 = scmp.ne.s32.totalorder %s44_s9, %s5073_s0  ;;  %p5079_p1 = scmp.lt.s32.totalorder %s5073_s0, %s5073_s0 }
  0x41   :  { %p5080_p2 = por %p5079_p1, %p5078_p0 }
  0x43   :  { %p5081_p3 = pnand %p5080_p2, %p5074_p13 }
  0x45   :  { %5084 = shalt.err (!%p5081_p3)
}
  0x46   :  { %49 = dma.hbm_to_vmem [thread:$0]  %s6718_s2, 4096, %s44_s9, [#allocation7], %s5142_s18, %s5142_s18, %s5143_s19  }
  0x47   :  { %s5085_s24 = scalar_lea.hbm %s6720_s4, 128 }
  0x48   :  { %p5086_p4 = scmp.ne.s32.totalorder %s6720_s4, %s5085_s24  ;;  %p5089_p5 = scmp.lt.u32.totalorder %s5085_s24, %s6720_s4 }
  0x4a   :  { %p5091_p6 = pnand %p5089_p5, %p5086_p4 }
  0x4c   :  { %5094 = shalt.err (!%p5091_p6)
}
  0x4d   :  { %s5095_s29 = scalar_lea.vmem %s69_s12, 128  ;;  %p5100_p8 = scmp.lt.s32.totalorder %s69_s12, %s69_s12 }
  0x4e   :  { %p5096_p7 = scmp.ne.s32.totalorder %s69_s12, %s5095_s29  ;;  %p5101_p9 = scmp.lt.s32.totalorder %s5095_s29, %s5095_s29 }
  0x50   :  { %p5102_p10 = por %p5101_p9, %p5100_p8 }
  0x52   :  { %p5103_p11 = pnand %p5102_p10, %p5096_p7 }
  0x54   :  { %5106 = shalt.err (!%p5103_p11)
}
  0x55   :  { %71 = dma.hbm_to_vmem [thread:$0]  %s6720_s4, 128, %s69_s12, [#allocation10]  }
  0x56   :  { %5129 = dma.done.wait [#allocation4], 1024  }
  0x57   :  { %5130 = vsyncadd [#allocation4], 4294966272 }
  0x58   :  { %5131 = dma.done.wait [#allocation7], 6144  }
  0x59   :  { %5132 = vsyncadd [#allocation7], 4294961152 }
  0x5a   :  { %5133 = dma.done.wait [#allocation10], 4224  }
  0x5b   :  { %5134 = vsyncadd [#allocation10], 4294963072  ;;  %v6722_v0 = vmov 0   ;;  %v104_v1 = vld [vmem:[#allocation6] sm:$0xff]  ;;  %v105_v3 = vld [vmem:[#allocation6 + $0x8] sm:$0xff]  ;;  %vm282_vm0 = vcmask 261120  }
  0x5c   :  { %339 = vmatprep.mubr.bf16.mxu0 %v6722_v0  ;;  %452 = vmatprep.mubr.bf16.mxu1 %v6722_v0  ;;  %v108_v2 = vld [vmem:[#allocation6 + $0x20] sm:$0xff]  ;;  %v109_v5 = vld [vmem:[#allocation6 + $0x28] sm:$0xff]  ;;  %v106_v15 = vld [vmem:[#allocation6 + $0x10] sm:$0xff]  ;;  %s5149_s4 = smov [#allocation12]  }
  0x5d   :  { %v3937_v4 = vcombine.high %v104_v1, %v108_v2  ;;  %v3936_v6 = vcombine.low %v104_v1, %v108_v2  ;;  %v112_v7 = vld [vmem:[#allocation6 + $0x40] sm:$0xff]  ;;  %v3939_v9 = vcombine.high %v105_v3, %v109_v5  ;;  %v3938_v10 = vcombine.low %v105_v3, %v109_v5  ;;  %v113_v12 = vld [vmem:[#allocation6 + $0x48] sm:$0xff]  ;;  %v110_v17 = vld [vmem:[#allocation6 + $0x30] sm:$0xff]  ;;  %s3914_s19 = sshll.u32 %s5149_s4, 4  ;;  %s3915_s19 = int_to_ptr.vmem [resolvable:$true] %s3914_s19 }
  0x5e   :  { %v116_v8 = vld [vmem:[#allocation6 + $0x60] sm:$0xff]  ;;  %v117_v13 = vld [vmem:[#allocation6 + $0x68] sm:$0xff]  ;;  %v3941_v19 = vcombine.high %v106_v15, %v110_v17  ;;  %v107_v20 = vld [vmem:[#allocation6 + $0x18] sm:$0xff]  ;;  %v3940_v24 = vcombine.low %v106_v15, %v110_v17  ;;  %s5107_s3 = scalar_lea.vmem %s3915_s19, 2048  ;;  %p5112_p13 = scmp.lt.s32.totalorder %s3915_s19, %s3915_s19 }
  0x5f   :  { %v3945_v11 = vcombine.high %v112_v7, %v116_v8  ;;  %307 = vmatprep.subr.bf16.mxu0 %v3937_v4  ;;  %v3947_v14 = vcombine.high %v113_v12, %v117_v13  ;;  %420 = vmatprep.subr.bf16.mxu1 %v3939_v9  ;;  %v3944_v16 = vcombine.low %v112_v7, %v116_v8  ;;  %v111_v21 = vld [vmem:[#allocation6 + $0x38] sm:$0xff]  ;;  %v5250_v23 = vld [vmem:[#allocation3] sm:$0xff]   ;;  %v114_v25 = vld [vmem:[#allocation6 + $0x50] sm:$0xff]  ;;  %p5108_p12 = scmp.ne.s32.totalorder %s3915_s19, %s5107_s3  ;;  %p5113_p0 = scmp.lt.s32.totalorder %s5107_s3, %s5107_s3 }
  0x60   :  { %308 = vmatpush1.bf16.msra.mxu0 %v3936_v6  ;;  %421 = vmatpush1.bf16.msra.mxu1 %v3938_v10  ;;  %v3946_v18 = vcombine.low %v113_v12, %v117_v13  ;;  %v3943_v22 = vcombine.high %v107_v20, %v111_v21  ;;  %v118_v26 = vld [vmem:[#allocation6 + $0x70] sm:$0xff]  ;;  %v3942_v27 = vcombine.low %v107_v20, %v111_v21  ;;  %v115_v29 = vld [vmem:[#allocation6 + $0x58] sm:$0xff]  ;;  %v5260_v35 = vld [vmem:[#allocation3 + $0x8] sm:$0xff]  }
  0x61   :  { %309 = vmatprep.subr.bf16.mxu0 %v3945_v11  ;;  %422 = vmatprep.subr.bf16.mxu1 %v3947_v14  ;;  %v3949_v28 = vcombine.high %v114_v25, %v118_v26  ;;  %v119_v30 = vld [vmem:[#allocation6 + $0x78] sm:$0xff]  ;;  %v3948_v31 = vcombine.low %v114_v25, %v118_v26  ;;  %v5258_v34 = vld [vmem:[#allocation8 + $0x4] ss:$16 sps:$4 sm:$0xff]   ;;  %v5296_v40 = vld [vmem:[#allocation3 + $0x28] sm:$0xff]   ;;  %p5114_p1 = por %p5113_p0, %p5112_p13 }
  0x62   :  { %v3951_v32 = vcombine.high %v115_v29, %v119_v30  ;;  %v3950_v33 = vcombine.low %v115_v29, %v119_v30  ;;  %v5262_v36 = vld [vmem:[#allocation8 + $0xc] ss:$16 sps:$4 sm:$0xff]   ;;  %v5272_v37 = vld [vmem:[#allocation3 + $0x10] sm:$0xff]   ;;  %v5288_v39 = vld [vmem:[#allocation3 + $0x20] sm:$0xff]  }
  0x63   :  { %v5280_v38 = vld [vmem:[#allocation3 + $0x18] sm:$0xff]   ;;  %v5304_v41 = vld [vmem:[#allocation3 + $0x30] sm:$0xff]   ;;  %p5115_p2 = pnand %p5114_p1, %p5108_p12 }
  0x64   :  { %310 = vmatpush1.bf16.msra.mxu0 %v3944_v16  ;;  %423 = vmatpush1.bf16.msra.mxu1 %v3946_v18  ;;  %v5312_v42 = vld [vmem:[#allocation3 + $0x38] sm:$0xff]   ;;  %v5320_v43 = vld [vmem:[#allocation8] ss:$16 sps:$4 sm:$0xff]   ;;  %v5322_v44 = vld [vmem:[#allocation8 + $0x24] ss:$16 sps:$4 sm:$0xff]  }
  0x65   :  { %533 = vmatprep.subr.bf16.mxu0 %v3941_v19  ;;  %646 = vmatprep.subr.bf16.mxu1 %v3943_v22  ;;  %v5324_v45 = vld [vmem:[#allocation8 + $0x8] ss:$16 sps:$4 sm:$0xff]   ;;  %v5328_v46 = vld [vmem:[#allocation8 + $0x2c] ss:$16 sps:$4 sm:$0xff]   ;;  %v5333_v47 = vld [vmem:[#allocation8 + $0x20] ss:$16 sps:$4 sm:$0xff]  }
  0x66   :  { %v5337_v48 = vld [vmem:[#allocation8 + $0x44] ss:$16 sps:$4 sm:$0xff]   ;;  %v5341_v49 = vld [vmem:[#allocation8 + $0x28] ss:$16 sps:$4 sm:$0xff]   ;;  %v5344_v50 = vld [vmem:[#allocation8 + $0x4c] ss:$16 sps:$4 sm:$0xff]  }
  0x67   :  { %3952 = vmatmul.mubr.msk.bf16.vlgmr.msra.gmra.mrb[0].mxu0 %vm282_vm0, %v5250_v23  ;;  %3960 = vmatmul.mubr.msk.bf16.vlgmr.msra.gmra.mrb[0].mxu1 %vm282_vm0, %v5250_v23  ;;  %v5348_v51 = vld [vmem:[#allocation8 + $0x40] ss:$16 sps:$4 sm:$0xff]   ;;  %v5350_v52 = vld [vmem:[#allocation8 + $0x64] ss:$16 sps:$4 sm:$0xff]   ;;  %v5353_v53 = vld [vmem:[#allocation8 + $0x48] ss:$16 sps:$4 sm:$0xff]  }
  0x68   :  { %534 = vmatpush1.bf16.msra.mxu0 %v3940_v24  ;;  %349 = vmatprep.mubr.bf16.mxu0 %v6722_v0  ;;  %v5358_v54 = vld [vmem:[#allocation8 + $0x6c] ss:$16 sps:$4 sm:$0xff]   ;;  %v5365_v55 = vld [vmem:[#allocation8 + $0x60] ss:$16 sps:$4 sm:$0xff]   ;;  %v5368_v56 = vld [vmem:[#allocation8 + $0x84] ss:$16 sps:$4 sm:$0xff]  }
  0x69   :  { %462 = vmatprep.mubr.bf16.mxu1 %v6722_v0  ;;  %647 = vmatpush1.bf16.msra.mxu1 %v3942_v27  ;;  %v5371_v57 = vld [vmem:[#allocation8 + $0x68] ss:$16 sps:$4 sm:$0xff]   ;;  %v5374_v58 = vld [vmem:[#allocation8 + $0x8c] ss:$16 sps:$4 sm:$0xff]   ;;  %v5377_v59 = vld [vmem:[#allocation8 + $0x80] ss:$16 sps:$4 sm:$0xff]  }
  0x6a   :  { %535 = vmatprep.subr.bf16.mxu0 %v3949_v28  ;;  %648 = vmatprep.subr.bf16.mxu1 %v3951_v32  ;;  %v5380_v60 = vld [vmem:[#allocation8 + $0xa4] ss:$16 sps:$4 sm:$0xff]   ;;  %v5383_v61 = vld [vmem:[#allocation8 + $0x88] ss:$16 sps:$4 sm:$0xff]   ;;  %v5388_v62 = vld [vmem:[#allocation8 + $0xac] ss:$16 sps:$4 sm:$0xff]  }
  0x6b   :  { %v5395_v63 = vld [vmem:[#allocation8 + $0xa0] ss:$16 sps:$4 sm:$0xff]   ;;  %v5398_v1 = vld [vmem:[#allocation8 + $0xc4] ss:$16 sps:$4 sm:$0xff]   ;;  %v5401_v2 = vld [vmem:[#allocation8 + $0xa8] ss:$16 sps:$4 sm:$0xff]  }
  0x6c   :  { %536 = vmatpush1.bf16.msra.mxu0 %v3948_v31  ;;  %v5404_v3 = vld [vmem:[#allocation8 + $0xcc] ss:$16 sps:$4 sm:$0xff]   ;;  %v5407_v4 = vld [vmem:[#allocation8 + $0xc0] ss:$16 sps:$4 sm:$0xff]   ;;  %v5411_v5 = vld [vmem:[#allocation8 + $0xe4] ss:$16 sps:$4 sm:$0xff]  }
  0x6d   :  { %1111 = vmatprep.subr.bf16.mxu0 %v5258_v34  ;;  %649 = vmatpush1.bf16.msra.mxu1 %v3950_v33  ;;  %v5413_v6 = vld [vmem:[#allocation8 + $0xc8] ss:$16 sps:$4 sm:$0xff]   ;;  %v5418_v7 = vld [vmem:[#allocation8 + $0xec] ss:$16 sps:$4 sm:$0xff]   ;;  %v5425_v8 = vld [vmem:[#allocation8 + $0xe0] ss:$16 sps:$4 sm:$0xff]  }
  0x6e   :  { %1154 = vmatprep.subr.bf16.mxu1 %v5262_v36  ;;  %v5429_v9 = vld [vmem:[#allocation8 + $0xe8] ss:$16 sps:$4 sm:$0xff]   ;;  %v5431_v10 = vld [vmem:[#allocation9 + $0x4] ss:$16 sps:$4 sm:$0xff]   ;;  %v5434_v11 = vld [vmem:[#allocation9 + $0xc] ss:$16 sps:$4 sm:$0xff]  }
  0x6f   :  { %3953 = vmatmul.mubr.msk.bf16.gmra.mrb[4].mxu0 %vm282_vm0, %v5260_v35  ;;  %3961 = vmatmul.mubr.msk.bf16.gmra.mrb[4].mxu1 %vm282_vm0, %v5260_v35  ;;  %v4283_v12 = vld [vmem:[#allocation9] ss:$16 sps:$4 sm:$0xff]   ;;  %v4284_v13 = vld [vmem:[#allocation9 + $0x8] ss:$16 sps:$4 sm:$0xff]   ;;  %v4285_v14 = vld [vmem:[#allocation9 + $0x24] ss:$16 sps:$4 sm:$0xff]  }
  0x70   :  { %359 = vmatprep.mubr.bf16.mxu0 %v6722_v0  ;;  %472 = vmatprep.mubr.bf16.mxu1 %v6722_v0  ;;  %v4287_v15 = vld [vmem:[#allocation9 + $0x2c] ss:$16 sps:$4 sm:$0xff]   ;;  %v4289_v16 = vld [vmem:[#allocation9 + $0x20] ss:$16 sps:$4 sm:$0xff]   ;;  %v4290_v17 = vld [vmem:[#allocation9 + $0x28] ss:$16 sps:$4 sm:$0xff]  }
  0x71   :  { %v4291_v18 = vld [vmem:[#allocation9 + $0x44] ss:$16 sps:$4 sm:$0xff]   ;;  %v4293_v19 = vld [vmem:[#allocation9 + $0x4c] ss:$16 sps:$4 sm:$0xff]   ;;  %v4295_v20 = vld [vmem:[#allocation9 + $0x40] ss:$16 sps:$4 sm:$0xff]  }
  0x72   :  { %v4296_v21 = vld [vmem:[#allocation9 + $0x48] ss:$16 sps:$4 sm:$0xff]   ;;  %v4297_v22 = vld [vmem:[#allocation9 + $0x64] ss:$16 sps:$4 sm:$0xff]   ;;  %v4301_v24 = vld [vmem:[#allocation9 + $0x60] ss:$16 sps:$4 sm:$0xff]  }
  0x73   :  { %v4302_v25 = vld [vmem:[#allocation9 + $0x68] ss:$16 sps:$4 sm:$0xff]   ;;  %v4303_v26 = vld [vmem:[#allocation9 + $0x84] ss:$16 sps:$4 sm:$0xff]   ;;  %v4305_v27 = vld [vmem:[#allocation9 + $0x8c] ss:$16 sps:$4 sm:$0xff]  }
  0x74   :  { %v4307_v28 = vld [vmem:[#allocation9 + $0x80] ss:$16 sps:$4 sm:$0xff]   ;;  %v4308_v29 = vld [vmem:[#allocation9 + $0x88] ss:$16 sps:$4 sm:$0xff]   ;;  %v4309_v30 = vld [vmem:[#allocation9 + $0xa4] ss:$16 sps:$4 sm:$0xff]  }
  0x75   :  { %v4311_v31 = vld [vmem:[#allocation9 + $0xac] ss:$16 sps:$4 sm:$0xff]   ;;  %v4313_v32 = vld [vmem:[#allocation9 + $0xa0] ss:$16 sps:$4 sm:$0xff]   ;;  %v4314_v33 = vld [vmem:[#allocation9 + $0xa8] ss:$16 sps:$4 sm:$0xff]  }
  0x77   :  { %3954 = vmatmul.mubr.msk.bf16.gmra.mrb[8].mxu0 %vm282_vm0, %v5272_v37  ;;  %3962 = vmatmul.mubr.msk.bf16.gmra.mrb[8].mxu1 %vm282_vm0, %v5272_v37 }
  0x78   :  { %369 = vmatprep.mubr.bf16.mxu0 %v6722_v0  ;;  %482 = vmatprep.mubr.bf16.mxu1 %v6722_v0 }
  0x7f   :  { %3955 = vmatmul.mubr.msk.bf16.gmra.mrb[12].mxu0 %vm282_vm0, %v5280_v38  ;;  %3963 = vmatmul.mubr.msk.bf16.gmra.mrb[12].mxu1 %vm282_vm0, %v5280_v38 }
  0x80   :  { %379 = vmatprep.mubr.bf16.mxu0 %v6722_v0  ;;  %492 = vmatprep.mubr.bf16.mxu1 %v6722_v0 }
  0x87   :  { %3956 = vmatmul.mubr.msk.bf16.gmra.mrb[16].mxu0 %vm282_vm0, %v5288_v39  ;;  %3964 = vmatmul.mubr.msk.bf16.gmra.mrb[16].mxu1 %vm282_vm0, %v5288_v39 }
  0x88   :  { %389 = vmatprep.mubr.bf16.mxu0 %v6722_v0  ;;  %502 = vmatprep.mubr.bf16.mxu1 %v6722_v0 }
  0x8f   :  { %3957 = vmatmul.mubr.msk.bf16.gmra.mrb[20].mxu0 %vm282_vm0, %v5296_v40  ;;  %3965 = vmatmul.mubr.msk.bf16.gmra.mrb[20].mxu1 %vm282_vm0, %v5296_v40 }
  0x90   :  { %399 = vmatprep.mubr.bf16.mxu0 %v6722_v0  ;;  %512 = vmatprep.mubr.bf16.mxu1 %v6722_v0 }
  0x97   :  { %3958 = vmatmul.mubr.msk.bf16.gmra.mrb[24].mxu0 %vm282_vm0, %v5304_v41  ;;  %3966 = vmatmul.mubr.msk.bf16.gmra.mrb[24].mxu1 %vm282_vm0, %v5304_v41 }
  0x98   :  { %409 = vmatprep.mubr.bf16.mxu0 %v6722_v0  ;;  %522 = vmatprep.mubr.bf16.mxu1 %v6722_v0 }
  0x9f   :  { %3959 = vmatmul.mubr.msk.bf16.gmra.mrb[28].mxu0 %vm282_vm0, %v5312_v42  ;;  %3967 = vmatmul.mubr.msk.bf16.gmra.mrb[28].mxu1 %vm282_vm0, %v5312_v42 }
  0xa0   :  { %565 = vmatprep.mubr.bf16.mxu0 %v6722_v0  ;;  %678 = vmatprep.mubr.bf16.mxu1 %v6722_v0 }
  0xa7   :  { %3968 = vmatmul.mubr.msk.bf16.vlgmr.msra.gmra.mrb[32].mxu0 %vm282_vm0, %v5250_v23  ;;  %3976 = vmatmul.mubr.msk.bf16.vlgmr.msra.gmra.mrb[32].mxu1 %vm282_vm0, %v5250_v23  ;;  %v4299_v23 = vld [vmem:[#allocation9 + $0x6c] ss:$16 sps:$4 sm:$0xff]  }
  0xa8   :  { %1112 = vmatpush1.bf16.msra.mxu0 %v5320_v43  ;;  %575 = vmatprep.mubr.bf16.mxu0 %v6722_v0 }
  0xa9   :  { %688 = vmatprep.mubr.bf16.mxu1 %v6722_v0  ;;  %1113 = vmatprep.subr.bf16.mxu0 %v5322_v44 }
  0xaa   :  { %1155 = vmatpush1.bf16.msra.mxu1 %v5324_v45 }
  0xab   :  { %1156 = vmatprep.subr.bf16.mxu1 %v5328_v46 }
  0xac   :  { %1114 = vmatpush1.bf16.msra.mxu0 %v5333_v47 }
  0xad   :  { %1115 = vmatprep.subr.bf16.mxu0 %v5337_v48 }
  0xae   :  { %1157 = vmatpush1.bf16.msra.mxu1 %v5341_v49 }
  0xaf   :  { %3969 = vmatmul.mubr.msk.bf16.gmra.mrb[36].mxu0 %vm282_vm0, %v5260_v35  ;;  %1158 = vmatprep.subr.bf16.mxu1 %v5344_v50 }
  0xb0   :  { %3977 = vmatmul.mubr.msk.bf16.gmra.mrb[36].mxu1 %vm282_vm0, %v5260_v35  ;;  %585 = vmatprep.mubr.bf16.mxu0 %v6722_v0  ;;  %v4315_v35 = vld [vmem:[#allocation9 + $0xc4] ss:$16 sps:$4 sm:$0xff]  }
  0xb1   :  { %698 = vmatprep.mubr.bf16.mxu1 %v6722_v0  ;;  %1116 = vmatpush1.bf16.msra.mxu0 %v5348_v51 }
  0xb2   :  { %1117 = vmatprep.subr.bf16.mxu0 %v5350_v52  ;;  %1159 = vmatpush1.bf16.msra.mxu1 %v5353_v53 }
  0xb3   :  { %1160 = vmatprep.subr.bf16.mxu1 %v5358_v54 }
  0xb5   :  { %1118 = vmatpush1.bf16.msra.mxu0 %v5365_v55 }
  0xb6   :  { %1119 = vmatprep.subr.bf16.mxu0 %v5368_v56  ;;  %1161 = vmatpush1.bf16.msra.mxu1 %v5371_v57 }
  0xb7   :  { %3970 = vmatmul.mubr.msk.bf16.gmra.mrb[40].mxu0 %vm282_vm0, %v5272_v37  ;;  %1162 = vmatprep.subr.bf16.mxu1 %v5374_v58 }
  0xb8   :  { %3978 = vmatmul.mubr.msk.bf16.gmra.mrb[40].mxu1 %vm282_vm0, %v5272_v37  ;;  %595 = vmatprep.mubr.bf16.mxu0 %v6722_v0  ;;  %v4317_v37 = vld [vmem:[#allocation9 + $0xcc] ss:$16 sps:$4 sm:$0xff]  }
  0xb9   :  { %708 = vmatprep.mubr.bf16.mxu1 %v6722_v0  ;;  %1120 = vmatpush1.bf16.msra.mxu0 %v5377_v59 }
  0xba   :  { %1121 = vmatprep.subr.bf16.mxu0 %v5380_v60  ;;  %1163 = vmatpush1.bf16.msra.mxu1 %v5383_v61 }
  0xbb   :  { %1164 = vmatprep.subr.bf16.mxu1 %v5388_v62 }
  0xbd   :  { %1122 = vmatpush1.bf16.msra.mxu0 %v5395_v63 }
  0xbe   :  { %1123 = vmatprep.subr.bf16.mxu0 %v5398_v1  ;;  %1165 = vmatpush1.bf16.msra.mxu1 %v5401_v2 }
  0xbf   :  { %3971 = vmatmul.mubr.msk.bf16.gmra.mrb[44].mxu0 %vm282_vm0, %v5280_v38  ;;  %1166 = vmatprep.subr.bf16.mxu1 %v5404_v3 }
  0xc0   :  { %3979 = vmatmul.mubr.msk.bf16.gmra.mrb[44].mxu1 %vm282_vm0, %v5280_v38  ;;  %605 = vmatprep.mubr.bf16.mxu0 %v6722_v0  ;;  %v4319_v38 = vld [vmem:[#allocation9 + $0xc0] ss:$16 sps:$4 sm:$0xff]  }
  0xc1   :  { %718 = vmatprep.mubr.bf16.mxu1 %v6722_v0  ;;  %1124 = vmatpush1.bf16.msra.mxu0 %v5407_v4 }
  0xc2   :  { %1125 = vmatprep.subr.bf16.mxu0 %v5411_v5  ;;  %1167 = vmatpush1.bf16.msra.mxu1 %v5413_v6 }
  0xc3   :  { %1168 = vmatprep.subr.bf16.mxu1 %v5418_v7 }
  0xc5   :  { %1126 = vmatpush1.bf16.msra.mxu0 %v5425_v8 }
  0xc6   :  { %1169 = vmatpush1.bf16.msra.mxu1 %v5429_v9  ;;  %1357 = vmatprep.subr.bf16.mxu0 %v5431_v10 }
  0xc7   :  { %3972 = vmatmul.mubr.msk.bf16.gmra.mrb[48].mxu0 %vm282_vm0, %v5288_v39  ;;  %1400 = vmatprep.subr.bf16.mxu1 %v5434_v11 }
  0xc8   :  { %3980 = vmatmul.mubr.msk.bf16.gmra.mrb[48].mxu1 %vm282_vm0, %v5288_v39  ;;  %615 = vmatprep.mubr.bf16.mxu0 %v6722_v0  ;;  %v4320_v39 = vld [vmem:[#allocation9 + $0xc8] ss:$16 sps:$4 sm:$0xff]  }
  0xc9   :  { %728 = vmatprep.mubr.bf16.mxu1 %v6722_v0 }
  0xcf   :  { %3973 = vmatmul.mubr.msk.bf16.gmra.mrb[52].mxu0 %vm282_vm0, %v5296_v40 }
  0xd0   :  { %3981 = vmatmul.mubr.msk.bf16.gmra.mrb[52].mxu1 %vm282_vm0, %v5296_v40  ;;  %625 = vmatprep.mubr.bf16.mxu0 %v6722_v0  ;;  %v4321_v40 = vld [vmem:[#allocation9 + $0xe4] ss:$16 sps:$4 sm:$0xff]  }
  0xd1   :  { %738 = vmatprep.mubr.bf16.mxu1 %v6722_v0 }
  0xd7   :  { %3974 = vmatmul.mubr.msk.bf16.gmra.mrb[56].mxu0 %vm282_vm0, %v5304_v41 }
  0xd8   :  { %3982 = vmatmul.mubr.msk.bf16.gmra.mrb[56].mxu1 %vm282_vm0, %v5304_v41  ;;  %635 = vmatprep.mubr.bf16.mxu0 %v6722_v0  ;;  %v4323_v41 = vld [vmem:[#allocation9 + $0xec] ss:$16 sps:$4 sm:$0xff]  }
  0xd9   :  { %748 = vmatprep.mubr.bf16.mxu1 %v6722_v0 }
  0xdf   :  { %3975 = vmatmul.mubr.msk.bf16.gmra.mrb[60].mxu0 %vm282_vm0, %v5312_v42 }
  0xe0   :  { %3983 = vmatmul.mubr.msk.bf16.gmra.mrb[60].mxu1 %vm282_vm0, %v5312_v42  ;;  %1143 = vmatprep.mubr.bf16.mxu0 %v6722_v0  ;;  %v4325_v42 = vld [vmem:[#allocation9 + $0xe0] ss:$16 sps:$4 sm:$0xff]  }
  0xe1   :  { %1186 = vmatprep.mubr.bf16.mxu1 %v6722_v0 }
  0xe7   :  { %1144 = vmatmul.mubr.bf16.vlgmr.msra.gmra.mrb[64].mxu0 %v6722_v0 }
  0xe8   :  { %1187 = vmatmul.mubr.bf16.vlgmr.msra.gmra.mrb[64].mxu1 %v6722_v0  ;;  %1358 = vmatpush1.bf16.msra.mxu0 %v4283_v12  ;;  %v4326_v12 = vld [vmem:[#allocation9 + $0xe8] ss:$16 sps:$4 sm:$0xff]  }
  0xe9   :  { %1401 = vmatpush1.bf16.msra.mxu1 %v4284_v13  ;;  %1359 = vmatprep.subr.bf16.mxu0 %v4285_v14 }
  0xea   :  { %1402 = vmatprep.subr.bf16.mxu1 %v4287_v15  ;;  %1389 = vmatprep.mubr.bf16.mxu0 %v6722_v0 }
  0xeb   :  { %1432 = vmatprep.mubr.bf16.mxu1 %v6722_v0 }
  0xec   :  { %1360 = vmatpush1.bf16.msra.mxu0 %v4289_v16 }
  0xed   :  { %1403 = vmatpush1.bf16.msra.mxu1 %v4290_v17  ;;  %1361 = vmatprep.subr.bf16.mxu0 %v4291_v18 }
  0xee   :  { %1404 = vmatprep.subr.bf16.mxu1 %v4293_v19 }
  0xf0   :  { %1362 = vmatpush1.bf16.msra.mxu0 %v4295_v20 }
  0xf1   :  { %1405 = vmatpush1.bf16.msra.mxu1 %v4296_v21  ;;  %1363 = vmatprep.subr.bf16.mxu0 %v4297_v22 }
  0xf2   :  { %1406 = vmatprep.subr.bf16.mxu1 %v4299_v23 }
  0xf4   :  { %1364 = vmatpush1.bf16.msra.mxu0 %v4301_v24 }
  0xf5   :  { %1407 = vmatpush1.bf16.msra.mxu1 %v4302_v25  ;;  %1365 = vmatprep.subr.bf16.mxu0 %v4303_v26 }
  0xf6   :  { %1408 = vmatprep.subr.bf16.mxu1 %v4305_v27 }
  0xf8   :  { %1366 = vmatpush1.bf16.msra.mxu0 %v4307_v28 }
  0xf9   :  { %1409 = vmatpush1.bf16.msra.mxu1 %v4308_v29  ;;  %1367 = vmatprep.subr.bf16.mxu0 %v4309_v30 }
  0xfa   :  { %1410 = vmatprep.subr.bf16.mxu1 %v4311_v31 }
  0xfc   :  { %1368 = vmatpush1.bf16.msra.mxu0 %v4313_v32 }
  0xfd   :  { %1411 = vmatpush1.bf16.msra.mxu1 %v4314_v33  ;;  %1369 = vmatprep.subr.bf16.mxu0 %v4315_v35 }
  0xfe   :  { %1412 = vmatprep.subr.bf16.mxu1 %v4317_v37 }
 0x100   :  { %1370 = vmatpush1.bf16.msra.mxu0 %v4319_v38 }
 0x101   :  { %1413 = vmatpush1.bf16.msra.mxu1 %v4320_v39  ;;  %1371 = vmatprep.subr.bf16.mxu0 %v4321_v40 }
 0x102   :  { %1414 = vmatprep.subr.bf16.mxu1 %v4323_v41 }
 0x104   :  { %1372 = vmatpush1.bf16.msra.mxu0 %v4325_v42 }
 0x105   :  { %1415 = vmatpush1.bf16.msra.mxu1 %v4326_v12  ;;  %1601 = vmatprep.subr.bf16.mxu0 %v5258_v34  ;;  %v122_v34 = vlaneseq }
 0x106   :  { %1644 = vmatprep.subr.bf16.mxu1 %v5262_v36 }
 0x107   :  { %1390 = vmatmul.mubr.bf16.vlgmr.msra.gmra.mrb[68].mxu0 %v6722_v0  ;;  %v5506_v36 = vshrl.u32 %v122_v34, 7 }
 0x108   :  { %1433 = vmatmul.mubr.bf16.vlgmr.msra.gmra.mrb[68].mxu1 %v6722_v0  ;;  %1602 = vmatpush1.bf16.msra.mxu0 %v5320_v43 }
 0x109   :  { %1645 = vmatpush1.bf16.msra.mxu1 %v5324_v45  ;;  %1603 = vmatprep.subr.bf16.mxu0 %v5322_v44  ;;  %v132_v43 = vsub.s32 2, %v5506_v36  ;;  %v124_v44 = vsub.s32 0, %v5506_v36  ;;  %v136_v45 = vsub.s32 3, %v5506_v36 }
 0x10a   :  { %1646 = vmatprep.subr.bf16.mxu1 %v5328_v46  ;;  %1633 = vmatprep.mubr.bf16.mxu0 %v6722_v0  ;;  %v5511_v46 = vld [vmem:[#allocation11] sm:$0xff] }
 0x10b   :  { %1676 = vmatprep.mubr.bf16.mxu1 %v6722_v0 }
 0x10c   :  { %1604 = vmatpush1.bf16.msra.mxu0 %v5333_v47  ;;  %v128_v47 = vsub.s32 1, %v5506_v36 }
 0x10d   :  { %1647 = vmatpush1.bf16.msra.mxu1 %v5341_v49  ;;  %1605 = vmatprep.subr.bf16.mxu0 %v5337_v48  ;;  %v5515_v48 = vrot.slane %v5511_v46, %v132_v43  ;;  %v5518_v49 = vrot.slane %v5511_v46, %v124_v44 }
 0x10e   :  { %1648 = vmatprep.subr.bf16.mxu1 %v5344_v50  ;;  %v5521_v50 = vrot.slane %v5511_v46, %v136_v45 }
 0x110   :  { %1606 = vmatpush1.bf16.msra.mxu0 %v5348_v51 }
 0x111   :  { %1649 = vmatpush1.bf16.msra.mxu1 %v5353_v53  ;;  %1607 = vmatprep.subr.bf16.mxu0 %v5350_v52  ;;  %v5524_v52 = vrot.slane %v5511_v46, %v128_v47 }
 0x112   :  { %1650 = vmatprep.subr.bf16.mxu1 %v5358_v54 }
 0x114   :  { %1608 = vmatpush1.bf16.msra.mxu0 %v5365_v55 }
 0x115   :  { %1651 = vmatpush1.bf16.msra.mxu1 %v5371_v57  ;;  %1609 = vmatprep.subr.bf16.mxu0 %v5368_v56 }
 0x116   :  { %1652 = vmatprep.subr.bf16.mxu1 %v5374_v58 }
 0x118   :  { %1610 = vmatpush1.bf16.msra.mxu0 %v5377_v59 }
 0x119   :  { %1653 = vmatpush1.bf16.msra.mxu1 %v5383_v61  ;;  %1611 = vmatprep.subr.bf16.mxu0 %v5380_v60 }
 0x11a   :  { %1654 = vmatprep.subr.bf16.mxu1 %v5388_v62 }
 0x11c   :  { %1612 = vmatpush1.bf16.msra.mxu0 %v5395_v63 }
 0x11d   :  { %1655 = vmatpush1.bf16.msra.mxu1 %v5401_v2  ;;  %1613 = vmatprep.subr.bf16.mxu0 %v5398_v1 }
 0x11e   :  { %1656 = vmatprep.subr.bf16.mxu1 %v5404_v3 }
 0x120   :  { %1614 = vmatpush1.bf16.msra.mxu0 %v5407_v4 }
 0x121   :  { %1657 = vmatpush1.bf16.msra.mxu1 %v5413_v6  ;;  %1615 = vmatprep.subr.bf16.mxu0 %v5411_v5 }
 0x122   :  { %1658 = vmatprep.subr.bf16.mxu1 %v5418_v7 }
 0x124   :  { %1616 = vmatpush1.bf16.msra.mxu0 %v5425_v8 }
 0x125   :  { %1659 = vmatpush1.bf16.msra.mxu1 %v5429_v9  ;;  %1687 = vmatprep.subr.bf16.mxu0 %v5431_v10 }
 0x126   :  { %1730 = vmatprep.subr.bf16.mxu1 %v5434_v11 }
 0x13a   :  { %v341_v51 = vpop.f32.mrb[0].mxu0  ;;  %v454_v54 = vpop.f32.mrb[0].mxu1 }
 0x13b   :  { %v343_v53 = vpop.f32.mrb[1].mxu0  ;;  %v455_v56 = vadd.f32 %v454_v54, %v5515_v48  ;;  %v456_v57 = vpop.f32.mrb[1].mxu1  ;;  %v342_v58 = vadd.f32 %v341_v51, %v5518_v49 }
 0x13c   :  { %v345_v55 = vpop.f32.mrb[2].mxu0  ;;  %v457_v61 = vadd.f32 %v456_v57, %v5521_v50  ;;  %v458_v62 = vpop.f32.mrb[2].mxu1  ;;  %v344_v63 = vadd.f32 %v343_v53, %v5524_v52 }
 0x13d   :  { %v346_v59 = vadd.f32 %v345_v55, %v5518_v49  ;;  %v347_v60 = vpop.f32.mrb[3].mxu0  ;;  %v459_v2 = vadd.f32 %v458_v62, %v5515_v48  ;;  %v460_v3 = vpop.f32.mrb[3].mxu1 }
 0x13e   :  { %v348_v1 = vadd.f32 %v347_v60, %v5524_v52  ;;  %v461_v5 = vadd.f32 %v460_v3, %v5521_v50 }
 0x13f   :  { %v5533_v4 = vpack.c.bf16 %v346_v59, %v342_v58  ;;  %v5538_v7 = vpack.c.bf16 %v459_v2, %v455_v56 }
 0x140   :  { %v5536_v6 = vpack.c.bf16 %v348_v1, %v344_v63  ;;  %v5540_v8 = vpack.c.bf16 %v461_v5, %v457_v61 }
 0x142   :  { %v351_v9 = vpop.f32.mrb[4].mxu0  ;;  %v464_v13 = vpop.f32.mrb[4].mxu1 }
 0x143   :  { %v352_v10 = vadd.f32 %v351_v9, %v5518_v49  ;;  %v353_v11 = vpop.f32.mrb[5].mxu0  ;;  %v465_v16 = vadd.f32 %v464_v13, %v5515_v48  ;;  %v466_v17 = vpop.f32.mrb[5].mxu1 }
 0x144   :  { %v354_v14 = vadd.f32 %v353_v11, %v5524_v52  ;;  %v355_v15 = vpop.f32.mrb[6].mxu0  ;;  %v467_v20 = vadd.f32 %v466_v17, %v5521_v50  ;;  %v468_v21 = vpop.f32.mrb[6].mxu1 }
 0x145   :  { %v356_v18 = vadd.f32 %v355_v15, %v5518_v49  ;;  %v357_v19 = vpop.f32.mrb[7].mxu0  ;;  %v469_v23 = vadd.f32 %v468_v21, %v5515_v48  ;;  %v470_v24 = vpop.f32.mrb[7].mxu1 }
 0x146   :  { %v358_v22 = vadd.f32 %v357_v19, %v5524_v52  ;;  %v471_v26 = vadd.f32 %v470_v24, %v5521_v50 }
 0x147   :  { %v5549_v25 = vpack.c.bf16 %v356_v18, %v352_v10  ;;  %v5554_v28 = vpack.c.bf16 %v469_v23, %v465_v16 }
 0x148   :  { %v5552_v27 = vpack.c.bf16 %v358_v22, %v354_v14  ;;  %v5556_v29 = vpack.c.bf16 %v471_v26, %v467_v20 }
 0x14a   :  { %v361_v30 = vpop.f32.mrb[8].mxu0  ;;  %v474_v33 = vpop.f32.mrb[8].mxu1 }
 0x14b   :  { %v362_v31 = vadd.f32 %v361_v30, %v5518_v49  ;;  %v363_v32 = vpop.f32.mrb[9].mxu0  ;;  %v475_v38 = vadd.f32 %v474_v33, %v5515_v48  ;;  %v476_v39 = vpop.f32.mrb[9].mxu1 }
 0x14c   :  { %v364_v35 = vadd.f32 %v363_v32, %v5524_v52  ;;  %v365_v37 = vpop.f32.mrb[10].mxu0  ;;  %v477_v42 = vadd.f32 %v476_v39, %v5521_v50  ;;  %v478_v12 = vpop.f32.mrb[10].mxu1 }
 0x14d   :  { %v366_v40 = vadd.f32 %v365_v37, %v5518_v49  ;;  %v367_v41 = vpop.f32.mrb[11].mxu0  ;;  %v479_v43 = vadd.f32 %v478_v12, %v5515_v48  ;;  %v480_v44 = vpop.f32.mrb[11].mxu1 }
 0x14e   :  { %v368_v34 = vadd.f32 %v367_v41, %v5524_v52  ;;  %v481_v47 = vadd.f32 %v480_v44, %v5521_v50 }
 0x14f   :  { %v5565_v45 = vpack.c.bf16 %v366_v40, %v362_v31  ;;  %v5570_v53 = vpack.c.bf16 %v479_v43, %v475_v38 }
 0x150   :  { %v5568_v51 = vpack.c.bf16 %v368_v34, %v364_v35  ;;  %v5572_v54 = vpack.c.bf16 %v481_v47, %v477_v42 }
 0x151   :  { %6907 = vst [vmem:[#allocation17_spill] sm:$0xff] %v5565_v45  ;;  %6909 = vst [vmem:[#allocation19_spill] sm:$0xff] %v5570_v53  ;;  %v5977_v53 = vld [vmem:[#allocation8 + $0x88] ss:$16 sps:$4 sm:$0xff]   ;;  %v5980_v45 = vld [vmem:[#allocation8 + $0xa4] ss:$16 sps:$4 sm:$0xff]  }
 0x152   :  { %6908 = vst [vmem:[#allocation18_spill] sm:$0xff] %v5568_v51  ;;  %6910 = vst [vmem:[#allocation20_spill] sm:$0xff] %v5572_v54  ;;  %v371_v55 = vpop.f32.mrb[12].mxu0  ;;  %v484_v58 = vpop.f32.mrb[12].mxu1  ;;  %v5971_v54 = vld [vmem:[#allocation8 + $0x8c] ss:$16 sps:$4 sm:$0xff]  }
 0x153   :  { %v372_v56 = vadd.f32 %v371_v55, %v5518_v49  ;;  %v373_v57 = vpop.f32.mrb[13].mxu0  ;;  %v485_v61 = vadd.f32 %v484_v58, %v5515_v48  ;;  %v486_v62 = vpop.f32.mrb[13].mxu1  ;;  %6974 = vst [vmem:[#allocation83_spill] sm:$0xff] %v5971_v54  ;;  %v5974_v51 = vld [vmem:[#allocation8 + $0x80] ss:$16 sps:$4 sm:$0xff]   ;;  %6976 = vst [vmem:[#allocation85_spill] sm:$0xff] %v5977_v53 }
 0x154   :  { %v374_v59 = vadd.f32 %v373_v57, %v5524_v52  ;;  %v375_v60 = vpop.f32.mrb[14].mxu0  ;;  %v487_v2 = vadd.f32 %v486_v62, %v5521_v50  ;;  %v488_v3 = vpop.f32.mrb[14].mxu1  ;;  %6975 = vst [vmem:[#allocation84_spill] sm:$0xff] %v5974_v51  ;;  %6977 = vst [vmem:[#allocation86_spill] sm:$0xff] %v5980_v45 }
 0x155   :  { %v376_v63 = vadd.f32 %v375_v60, %v5518_v49  ;;  %v377_v1 = vpop.f32.mrb[15].mxu0  ;;  %v489_v9 = vadd.f32 %v488_v3, %v5515_v48  ;;  %v490_v10 = vpop.f32.mrb[15].mxu1 }
 0x156   :  { %v378_v5 = vadd.f32 %v377_v1, %v5524_v52  ;;  %v491_v13 = vadd.f32 %v490_v10, %v5521_v50 }
 0x157   :  { %v5581_v11 = vpack.c.bf16 %v376_v63, %v372_v56  ;;  %v5586_v15 = vpack.c.bf16 %v489_v9, %v485_v61 }
 0x158   :  { %v5584_v14 = vpack.c.bf16 %v378_v5, %v374_v59  ;;  %v5588_v16 = vpack.c.bf16 %v491_v13, %v487_v2 }
 0x159   :  { %6911 = vst [vmem:[#allocation21_spill] sm:$0xff] %v5581_v11  ;;  %6913 = vst [vmem:[#allocation23_spill] sm:$0xff] %v5586_v15  ;;  %v5953_v15 = vld [vmem:[#allocation8 + $0x48] ss:$16 sps:$4 sm:$0xff]   ;;  %v5956_v11 = vld [vmem:[#allocation8 + $0x64] ss:$16 sps:$4 sm:$0xff]  }
 0x15a   :  { %6912 = vst [vmem:[#allocation22_spill] sm:$0xff] %v5584_v14  ;;  %6914 = vst [vmem:[#allocation24_spill] sm:$0xff] %v5588_v16  ;;  %v381_v17 = vpop.f32.mrb[16].mxu0  ;;  %v494_v20 = vpop.f32.mrb[16].mxu1  ;;  %v5924_v16 = vld [vmem:[#allocation8] ss:$16 sps:$4 sm:$0xff]  }
 0x15b   :  { %v382_v18 = vadd.f32 %v381_v17, %v5518_v49  ;;  %v383_v19 = vpop.f32.mrb[17].mxu0  ;;  %v495_v23 = vadd.f32 %v494_v20, %v5515_v48  ;;  %v496_v24 = vpop.f32.mrb[17].mxu1  ;;  %6959 = vst [vmem:[#allocation68_spill] sm:$0xff] %v5924_v16  ;;  %v5927_v14 = vld [vmem:[#allocation8 + $0x8] ss:$16 sps:$4 sm:$0xff]   ;;  %6968 = vst [vmem:[#allocation77_spill] sm:$0xff] %v5953_v15 }
 0x15c   :  { %v384_v21 = vadd.f32 %v383_v19, %v5524_v52  ;;  %v385_v22 = vpop.f32.mrb[18].mxu0  ;;  %v497_v31 = vadd.f32 %v496_v24, %v5521_v50  ;;  %v498_v32 = vpop.f32.mrb[18].mxu1  ;;  %6960 = vst [vmem:[#allocation69_spill] sm:$0xff] %v5927_v14  ;;  %6969 = vst [vmem:[#allocation78_spill] sm:$0xff] %v5956_v11 }
 0x15d   :  { %v386_v26 = vadd.f32 %v385_v22, %v5518_v49  ;;  %v387_v30 = vpop.f32.mrb[19].mxu0  ;;  %v499_v35 = vadd.f32 %v498_v32, %v5515_v48  ;;  %v500_v37 = vpop.f32.mrb[19].mxu1 }
 0x15e   :  { %v388_v33 = vadd.f32 %v387_v30, %v5524_v52  ;;  %v501_v39 = vadd.f32 %v500_v37, %v5521_v50 }
 0x15f   :  { %v5597_v38 = vpack.c.bf16 %v386_v26, %v382_v18  ;;  %v5602_v41 = vpack.c.bf16 %v499_v35, %v495_v23 }
 0x160   :  { %v5600_v40 = vpack.c.bf16 %v388_v33, %v384_v21  ;;  %v5604_v42 = vpack.c.bf16 %v501_v39, %v497_v31 }
 0x161   :  { %6915 = vst [vmem:[#allocation25_spill] sm:$0xff] %v5597_v38  ;;  %6917 = vst [vmem:[#allocation27_spill] sm:$0xff] %v5602_v41  ;;  %v5912_v38 = vld [vmem:[#allocation9 + $0xe0] ss:$16 sps:$4 sm:$0xff]  }
 0x162   :  { %6916 = vst [vmem:[#allocation26_spill] sm:$0xff] %v5600_v40  ;;  %6918 = vst [vmem:[#allocation28_spill] sm:$0xff] %v5604_v42  ;;  %v391_v12 = vpop.f32.mrb[20].mxu0  ;;  %v504_v44 = vpop.f32.mrb[20].mxu1 }
 0x163   :  { %v392_v34 = vadd.f32 %v391_v12, %v5518_v49  ;;  %v393_v43 = vpop.f32.mrb[21].mxu0  ;;  %v505_v56 = vadd.f32 %v504_v44, %v5515_v48  ;;  %v506_v57 = vpop.f32.mrb[21].mxu1 }
 0x164   :  { %v394_v47 = vadd.f32 %v393_v43, %v5524_v52  ;;  %v395_v55 = vpop.f32.mrb[22].mxu0  ;;  %v507_v60 = vadd.f32 %v506_v57, %v5521_v50  ;;  %v508_v61 = vpop.f32.mrb[22].mxu1 }
 0x165   :  { %v396_v58 = vadd.f32 %v395_v55, %v5518_v49  ;;  %v397_v59 = vpop.f32.mrb[23].mxu0  ;;  %v509_v63 = vadd.f32 %v508_v61, %v5515_v48  ;;  %v510_v1 = vpop.f32.mrb[23].mxu1 }
 0x166   :  { %v398_v62 = vadd.f32 %v397_v59, %v5524_v52  ;;  %v511_v3 = vadd.f32 %v510_v1, %v5521_v50 }
 0x167   :  { %v5613_v2 = vpack.c.bf16 %v396_v58, %v392_v34  ;;  %v5618_v9 = vpack.c.bf16 %v509_v63, %v505_v56  ;;  %v140_v56 = vsub.s32 4, %v5506_v36  ;;  %v148_v63 = vsub.s32 6, %v5506_v36 }
 0x168   :  { %v5616_v5 = vpack.c.bf16 %v398_v62, %v394_v47  ;;  %v5620_v10 = vpack.c.bf16 %v511_v3, %v507_v60  ;;  %v144_v60 = vsub.s32 5, %v5506_v36 }
 0x169   :  { %6919 = vst [vmem:[#allocation29_spill] sm:$0xff] %v5613_v2  ;;  %6921 = vst [vmem:[#allocation31_spill] sm:$0xff] %v5618_v9  ;;  %v5900_v2 = vld [vmem:[#allocation9 + $0xc0] ss:$16 sps:$4 sm:$0xff]  }
 0x16a   :  { %6920 = vst [vmem:[#allocation30_spill] sm:$0xff] %v5616_v5  ;;  %6922 = vst [vmem:[#allocation32_spill] sm:$0xff] %v5620_v10  ;;  %v401_v13 = vpop.f32.mrb[24].mxu0  ;;  %v514_v19 = vpop.f32.mrb[24].mxu1 }
 0x16b   :  { %v402_v17 = vadd.f32 %v401_v13, %v5518_v49  ;;  %v403_v18 = vpop.f32.mrb[25].mxu0  ;;  %v515_v22 = vadd.f32 %v514_v19, %v5515_v48  ;;  %v516_v23 = vpop.f32.mrb[25].mxu1 }
 0x16c   :  { %v404_v20 = vadd.f32 %v403_v18, %v5524_v52  ;;  %v405_v21 = vpop.f32.mrb[26].mxu0  ;;  %v517_v30 = vadd.f32 %v516_v23, %v5521_v50  ;;  %v518_v31 = vpop.f32.mrb[26].mxu1  ;;  %v152_v18 = vsub.s32 7, %v5506_v36  ;;  %v5652_v23 = vrot.slane %v5511_v46, %v140_v56 }
 0x16d   :  { %v406_v24 = vadd.f32 %v405_v21, %v5518_v49  ;;  %v407_v26 = vpop.f32.mrb[27].mxu0  ;;  %v519_v33 = vadd.f32 %v518_v31, %v5515_v48  ;;  %v520_v35 = vpop.f32.mrb[27].mxu1  ;;  %v5663_v36 = vrot.slane %v5511_v46, %v148_v63 }
 0x16e   :  { %v408_v32 = vadd.f32 %v407_v26, %v5524_v52  ;;  %v521_v39 = vadd.f32 %v520_v35, %v5521_v50 }
 0x16f   :  { %v5629_v37 = vpack.c.bf16 %v406_v24, %v402_v17  ;;  %v5634_v34 = vpack.c.bf16 %v519_v33, %v515_v22 }
 0x170   :  { %v5632_v12 = vpack.c.bf16 %v408_v32, %v404_v20  ;;  %v5636_v43 = vpack.c.bf16 %v521_v39, %v517_v30 }
 0x171   :  { %6923 = vst [vmem:[#allocation33_spill] sm:$0xff] %v5629_v37  ;;  %6925 = vst [vmem:[#allocation35_spill] sm:$0xff] %v5634_v34 }
 0x172   :  { %6924 = vst [vmem:[#allocation34_spill] sm:$0xff] %v5632_v12  ;;  %6926 = vst [vmem:[#allocation36_spill] sm:$0xff] %v5636_v43  ;;  %v411_v44 = vpop.f32.mrb[28].mxu0  ;;  %v524_v57 = vpop.f32.mrb[28].mxu1 }
 0x173   :  { %v412_v47 = vadd.f32 %v411_v44, %v5518_v49  ;;  %v413_v55 = vpop.f32.mrb[29].mxu0  ;;  %v525_v61 = vadd.f32 %v524_v57, %v5515_v48  ;;  %v526_v62 = vpop.f32.mrb[29].mxu1 }
 0x174   :  { %v414_v58 = vadd.f32 %v413_v55, %v5524_v52  ;;  %v415_v59 = vpop.f32.mrb[30].mxu0  ;;  %v527_v13 = vadd.f32 %v526_v62, %v5521_v50  ;;  %v528_v17 = vpop.f32.mrb[30].mxu1 }
 0x175   :  { %v416_v1 = vadd.f32 %v415_v59, %v5518_v49  ;;  %v417_v3 = vpop.f32.mrb[31].mxu0  ;;  %v529_v20 = vadd.f32 %v528_v17, %v5515_v48  ;;  %v530_v21 = vpop.f32.mrb[31].mxu1  ;;  %v5658_v49 = vrot.slane %v5511_v46, %v144_v60  ;;  %v5668_v48 = vrot.slane %v5511_v46, %v152_v18 }
 0x176   :  { %v418_v19 = vadd.f32 %v417_v3, %v5524_v52  ;;  %v531_v24 = vadd.f32 %v530_v21, %v5521_v50 }
 0x177   :  { %v5649_v22 = vpack.c.bf16 %v416_v1, %v412_v47  ;;  %v5660_v30 = vpack.c.bf16 %v529_v20, %v525_v61 }
 0x178   :  { %v5655_v26 = vpack.c.bf16 %v418_v19, %v414_v58  ;;  %v5665_v52 = vpack.c.bf16 %v531_v24, %v527_v13 }
 0x179   :  { %6927 = vst [vmem:[#allocation37_spill] sm:$0xff] %v5649_v22  ;;  %6929 = vst [vmem:[#allocation39_spill] sm:$0xff] %v5660_v30 }
 0x17a   :  { %6928 = vst [vmem:[#allocation38_spill] sm:$0xff] %v5655_v26  ;;  %6930 = vst [vmem:[#allocation40_spill] sm:$0xff] %v5665_v52  ;;  %v567_v31 = vpop.f32.mrb[32].mxu0  ;;  %v680_v50 = vpop.f32.mrb[32].mxu1 }
 0x17b   :  { %v568_v32 = vadd.f32 %v567_v31, %v5652_v23  ;;  %v569_v33 = vpop.f32.mrb[33].mxu0  ;;  %v681_v44 = vadd.f32 %v680_v50, %v5663_v36  ;;  %v682_v47 = vpop.f32.mrb[33].mxu1 }
 0x17c   :  { %v570_v35 = vadd.f32 %v569_v33, %v5658_v49  ;;  %v571_v39 = vpop.f32.mrb[34].mxu0  ;;  %v683_v57 = vadd.f32 %v682_v47, %v5668_v48  ;;  %v684_v58 = vpop.f32.mrb[34].mxu1 }
 0x17d   :  { %v572_v55 = vadd.f32 %v571_v39, %v5652_v23  ;;  %v573_v56 = vpop.f32.mrb[35].mxu0  ;;  %v685_v59 = vadd.f32 %v684_v58, %v5663_v36  ;;  %v686_v60 = vpop.f32.mrb[35].mxu1 }
 0x17e   :  { %v574_v46 = vadd.f32 %v573_v56, %v5658_v49  ;;  %v687_v62 = vadd.f32 %v686_v60, %v5668_v48 }
 0x17f   :  { %v5677_v61 = vpack.c.bf16 %v572_v55, %v568_v32  ;;  %v5682_v1 = vpack.c.bf16 %v685_v59, %v681_v44 }
 0x180   :  { %v5680_v63 = vpack.c.bf16 %v574_v46, %v570_v35  ;;  %v5684_v3 = vpack.c.bf16 %v687_v62, %v683_v57 }
 0x181   :  { %6931 = vst [vmem:[#allocation41_spill] sm:$0xff] %v5677_v61  ;;  %6933 = vst [vmem:[#allocation43_spill] sm:$0xff] %v5682_v1 }
 0x182   :  { %6932 = vst [vmem:[#allocation42_spill] sm:$0xff] %v5680_v63  ;;  %6934 = vst [vmem:[#allocation44_spill] sm:$0xff] %v5684_v3  ;;  %v577_v13 = vpop.f32.mrb[36].mxu0 }
 0x183   :  { %v578_v17 = vadd.f32 %v577_v13, %v5652_v23  ;;  %v579_v18 = vpop.f32.mrb[37].mxu0  ;;  %v690_v19 = vpop.f32.mrb[36].mxu1 }
 0x184   :  { %v580_v20 = vadd.f32 %v579_v18, %v5658_v49  ;;  %v581_v21 = vpop.f32.mrb[38].mxu0  ;;  %v691_v24 = vadd.f32 %v690_v19, %v5663_v36  ;;  %v692_v31 = vpop.f32.mrb[37].mxu1 }
 0x185   :  { %v582_v32 = vadd.f32 %v581_v21, %v5652_v23  ;;  %v583_v33 = vpop.f32.mrb[39].mxu0  ;;  %v693_v50 = vadd.f32 %v692_v31, %v5668_v48  ;;  %v694_v35 = vpop.f32.mrb[38].mxu1 }
 0x186   :  { %v584_v39 = vadd.f32 %v583_v33, %v5658_v49  ;;  %v695_v44 = vadd.f32 %v694_v35, %v5663_v36  ;;  %v696_v47 = vpop.f32.mrb[39].mxu1 }
 0x187   :  { %v5693_v55 = vpack.c.bf16 %v582_v32, %v578_v17  ;;  %v697_v56 = vadd.f32 %v696_v47, %v5668_v48 }
 0x188   :  { %v5696_v57 = vpack.c.bf16 %v584_v39, %v580_v20  ;;  %v5698_v58 = vpack.c.bf16 %v695_v44, %v691_v24 }
 0x189   :  { %6935 = vst [vmem:[#allocation45_spill] sm:$0xff] %v5693_v55  ;;  %v5700_v46 = vpack.c.bf16 %v697_v56, %v693_v50 }
 0x18a   :  { %6936 = vst [vmem:[#allocation46_spill] sm:$0xff] %v5696_v57  ;;  %6937 = vst [vmem:[#allocation47_spill] sm:$0xff] %v5698_v58  ;;  %v587_v59 = vpop.f32.mrb[40].mxu0 }
 0x18b   :  { %6938 = vst [vmem:[#allocation48_spill] sm:$0xff] %v5700_v46  ;;  %v588_v60 = vadd.f32 %v587_v59, %v5652_v23  ;;  %v589_v62 = vpop.f32.mrb[41].mxu0  ;;  %v700_v13 = vpop.f32.mrb[40].mxu1 }
 0x18c   :  { %v590_v18 = vadd.f32 %v589_v62, %v5658_v49  ;;  %v591_v19 = vpop.f32.mrb[42].mxu0  ;;  %v701_v21 = vadd.f32 %v700_v13, %v5663_v36  ;;  %v702_v17 = vpop.f32.mrb[41].mxu1 }
 0x18d   :  { %v592_v31 = vadd.f32 %v591_v19, %v5652_v23  ;;  %v593_v32 = vpop.f32.mrb[43].mxu0  ;;  %v703_v20 = vadd.f32 %v702_v17, %v5668_v48  ;;  %v704_v24 = vpop.f32.mrb[42].mxu1 }
 0x18e   :  { %v594_v33 = vadd.f32 %v593_v32, %v5658_v49  ;;  %v705_v50 = vadd.f32 %v704_v24, %v5663_v36  ;;  %v706_v35 = vpop.f32.mrb[43].mxu1 }
 0x18f   :  { %v5709_v39 = vpack.c.bf16 %v592_v31, %v588_v60  ;;  %v707_v44 = vadd.f32 %v706_v35, %v5668_v48 }
 0x190   :  { %v5712_v47 = vpack.c.bf16 %v594_v33, %v590_v18  ;;  %v5714_v56 = vpack.c.bf16 %v705_v50, %v701_v21 }
 0x191   :  { %6939 = vst [vmem:[#allocation49_spill] sm:$0xff] %v5709_v39  ;;  %v5716_v59 = vpack.c.bf16 %v707_v44, %v703_v20 }
 0x192   :  { %6940 = vst [vmem:[#allocation50_spill] sm:$0xff] %v5712_v47  ;;  %6941 = vst [vmem:[#allocation51_spill] sm:$0xff] %v5714_v56  ;;  %v597_v62 = vpop.f32.mrb[44].mxu0 }
 0x193   :  { %6942 = vst [vmem:[#allocation52_spill] sm:$0xff] %v5716_v59  ;;  %v598_v13 = vadd.f32 %v597_v62, %v5652_v23  ;;  %v599_v19 = vpop.f32.mrb[45].mxu0  ;;  %v710_v17 = vpop.f32.mrb[44].mxu1 }
 0x194   :  { %v600_v32 = vadd.f32 %v599_v19, %v5658_v49  ;;  %v601_v0 = vpop.f32.mrb[46].mxu0  ;;  %v711_v24 = vadd.f32 %v710_v17, %v5663_v36  ;;  %v712_v60 = vpop.f32.mrb[45].mxu1 }
 0x195   :  { %v602_v31 = vadd.f32 %v601_v0, %v5652_v23  ;;  %v603_v35 = vpop.f32.mrb[47].mxu0  ;;  %v713_v18 = vadd.f32 %v712_v60, %v5668_v48  ;;  %v714_v21 = vpop.f32.mrb[46].mxu1 }
 0x196   :  { %v604_v20 = vadd.f32 %v603_v35, %v5658_v49  ;;  %v715_v33 = vadd.f32 %v714_v21, %v5663_v36  ;;  %v716_v50 = vpop.f32.mrb[47].mxu1 }
 0x197   :  { %v5725_v44 = vpack.c.bf16 %v602_v31, %v598_v13  ;;  %v717_v62 = vadd.f32 %v716_v50, %v5668_v48 }
 0x198   :  { %v5728_v19 = vpack.c.bf16 %v604_v20, %v600_v32  ;;  %v5730_v3 = vpack.c.bf16 %v715_v33, %v711_v24 }
 0x199   :  { %6943 = vst [vmem:[#allocation53_spill] sm:$0xff] %v5725_v44  ;;  %v5732_v17 = vpack.c.bf16 %v717_v62, %v713_v18  ;;  %v5909_v44 = vld [vmem:[#allocation9 + $0xec] ss:$16 sps:$4 sm:$0xff]  }
 0x19a   :  { %6944 = vst [vmem:[#allocation54_spill] sm:$0xff] %v5728_v19  ;;  %6945 = vst [vmem:[#allocation55_spill] sm:$0xff] %v5730_v3  ;;  %v607_v0 = vpop.f32.mrb[48].mxu0  ;;  %v5906_v3 = vld [vmem:[#allocation9 + $0xe4] ss:$16 sps:$4 sm:$0xff]  }
 0x19b   :  { %6946 = vst [vmem:[#allocation56_spill] sm:$0xff] %v5732_v17  ;;  %v608_v63 = vadd.f32 %v607_v0, %v5652_v23  ;;  %v609_v60 = vpop.f32.mrb[49].mxu0  ;;  %v720_v1 = vpop.f32.mrb[48].mxu1  ;;  %v5903_v17 = vld [vmem:[#allocation9 + $0xc8] ss:$16 sps:$4 sm:$0xff]  }
 0x19c   :  { %v610_v35 = vadd.f32 %v609_v60, %v5658_v49  ;;  %v611_v61 = vpop.f32.mrb[50].mxu0  ;;  %v721_v21 = vadd.f32 %v720_v1, %v5663_v36  ;;  %v722_v13 = vpop.f32.mrb[49].mxu1 }
 0x19d   :  { %v612_v31 = vadd.f32 %v611_v61, %v5652_v23  ;;  %v613_v50 = vpop.f32.mrb[51].mxu0  ;;  %v723_v32 = vadd.f32 %v722_v13, %v5668_v48  ;;  %v724_v24 = vpop.f32.mrb[50].mxu1 }
 0x19e   :  { %v614_v18 = vadd.f32 %v613_v50, %v5658_v49  ;;  %v725_v20 = vadd.f32 %v724_v24, %v5663_v36  ;;  %v726_v33 = vpop.f32.mrb[51].mxu1 }
 0x19f   :  { %v5741_v62 = vpack.c.bf16 %v612_v31, %v608_v63  ;;  %v727_v0 = vadd.f32 %v726_v33, %v5668_v48 }
 0x1a0   :  { %v5744_v60 = vpack.c.bf16 %v614_v18, %v610_v35  ;;  %v5746_v52 = vpack.c.bf16 %v725_v20, %v721_v21 }
 0x1a1   :  { %6947 = vst [vmem:[#allocation57_spill] sm:$0xff] %v5741_v62  ;;  %v5748_v1 = vpack.c.bf16 %v727_v0, %v723_v32 }
 0x1a2   :  { %6948 = vst [vmem:[#allocation58_spill] sm:$0xff] %v5744_v60  ;;  %6949 = vst [vmem:[#allocation59_spill] sm:$0xff] %v5746_v52  ;;  %v617_v61 = vpop.f32.mrb[52].mxu0  ;;  %v5921_v60 = vld [vmem:[#allocation8 + $0xc] ss:$16 sps:$4 sm:$0xff]  }
 0x1a3   :  { %6950 = vst [vmem:[#allocation60_spill] sm:$0xff] %v5748_v1  ;;  %v618_v26 = vadd.f32 %v617_v61, %v5652_v23  ;;  %v619_v13 = vpop.f32.mrb[53].mxu0  ;;  %v730_v30 = vpop.f32.mrb[52].mxu1  ;;  %v5915_v1 = vld [vmem:[#allocation9 + $0xe8] ss:$16 sps:$4 sm:$0xff]   ;;  %6958 = vst [vmem:[#allocation67_spill] sm:$0xff] %v5921_v60 }
 0x1a4   :  { %v620_v50 = vadd.f32 %v619_v13, %v5658_v49  ;;  %v621_v22 = vpop.f32.mrb[54].mxu0  ;;  %v731_v24 = vadd.f32 %v730_v30, %v5663_v36  ;;  %v732_v63 = vpop.f32.mrb[53].mxu1  ;;  %6956 = vst [vmem:[#allocation65_spill] sm:$0xff] %v5915_v1 }
 0x1a5   :  { %v622_v31 = vadd.f32 %v621_v22, %v5652_v23  ;;  %v623_v33 = vpop.f32.mrb[55].mxu0  ;;  %v733_v35 = vadd.f32 %v732_v63, %v5668_v48  ;;  %v734_v21 = vpop.f32.mrb[54].mxu1 }
 0x1a6   :  { %v624_v32 = vadd.f32 %v623_v33, %v5658_v49  ;;  %v735_v18 = vadd.f32 %v734_v21, %v5663_v36  ;;  %v736_v20 = vpop.f32.mrb[55].mxu1 }
 0x1a7   :  { %v5757_v0 = vpack.c.bf16 %v622_v31, %v618_v26  ;;  %v737_v61 = vadd.f32 %v736_v20, %v5668_v48 }
 0x1a8   :  { %v5760_v13 = vpack.c.bf16 %v624_v32, %v620_v50  ;;  %v5762_v46 = vpack.c.bf16 %v735_v18, %v731_v24 }
 0x1a9   :  { %6951 = vst [vmem:[#allocation61_spill] sm:$0xff] %v5757_v0  ;;  %v5764_v30 = vpack.c.bf16 %v737_v61, %v733_v35  ;;  %v5968_v0 = vld [vmem:[#allocation8 + $0x84] ss:$16 sps:$4 sm:$0xff]  }
 0x1aa   :  { %6952 = vst [vmem:[#allocation62_spill] sm:$0xff] %v5760_v13  ;;  %6953 = vst [vmem:[#allocation63_spill] sm:$0xff] %v5762_v46  ;;  %v627_v22 = vpop.f32.mrb[56].mxu0  ;;  %v5962_v13 = vld [vmem:[#allocation8 + $0x60] ss:$16 sps:$4 sm:$0xff]  }
 0x1ab   :  { %6954 = vst [vmem:[#allocation64_spill] sm:$0xff] %v5764_v30  ;;  %v628_v57 = vadd.f32 %v627_v22, %v5652_v23  ;;  %v629_v63 = vpop.f32.mrb[57].mxu0  ;;  %v740_v58 = vpop.f32.mrb[56].mxu1  ;;  %v5959_v30 = vld [vmem:[#allocation8 + $0x6c] ss:$16 sps:$4 sm:$0xff]   ;;  %6971 = vst [vmem:[#allocation80_spill] sm:$0xff] %v5962_v13 }
 0x1ac   :  { %v630_v33 = vadd.f32 %v629_v63, %v5658_v49  ;;  %v631_v55 = vpop.f32.mrb[58].mxu0  ;;  %v741_v21 = vadd.f32 %v740_v58, %v5663_v36  ;;  %v742_v26 = vpop.f32.mrb[57].mxu1  ;;  %6970 = vst [vmem:[#allocation79_spill] sm:$0xff] %v5959_v30  ;;  %v5965_v46 = vld [vmem:[#allocation8 + $0x68] ss:$16 sps:$4 sm:$0xff]   ;;  %6973 = vst [vmem:[#allocation82_spill] sm:$0xff] %v5968_v0 }
 0x1ad   :  { %v632_v31 = vadd.f32 %v631_v55, %v5652_v23  ;;  %v633_v20 = vpop.f32.mrb[59].mxu0  ;;  %v743_v50 = vadd.f32 %v742_v26, %v5668_v48  ;;  %v744_v24 = vpop.f32.mrb[58].mxu1  ;;  %6972 = vst [vmem:[#allocation81_spill] sm:$0xff] %v5965_v46 }
 0x1ae   :  { %v634_v35 = vadd.f32 %v633_v20, %v5658_v49  ;;  %v745_v32 = vadd.f32 %v744_v24, %v5663_v36  ;;  %v746_v18 = vpop.f32.mrb[59].mxu1 }
 0x1af   :  { %v5773_v61 = vpack.c.bf16 %v632_v31, %v628_v57  ;;  %v747_v22 = vadd.f32 %v746_v18, %v5668_v48 }
 0x1b0   :  { %v5776_v63 = vpack.c.bf16 %v634_v35, %v630_v33  ;;  %v5778_v43 = vpack.c.bf16 %v745_v32, %v741_v21 }
 0x1b1   :  { %v5780_v58 = vpack.c.bf16 %v747_v22, %v743_v50 }
 0x1b2   :  { %v637_v55 = vpop.f32.mrb[60].mxu0 }
 0x1b3   :  { %v639_v12 = vpop.f32.mrb[61].mxu0  ;;  %v750_v34 = vpop.f32.mrb[60].mxu1  ;;  %v638_v24 = vadd.f32 %v637_v55, %v5652_v23 }
 0x1b4   :  { %v641_v26 = vpop.f32.mrb[62].mxu0  ;;  %v751_v37 = vadd.f32 %v750_v34, %v5663_v36  ;;  %v752_v20 = vpop.f32.mrb[61].mxu1  ;;  %v640_v21 = vadd.f32 %v639_v12, %v5658_v49  ;;  %v1454_v12 = vunpack.c.l.bf16 %v5538_v7 }
 0x1b5   :  { %v642_v57 = vadd.f32 %v641_v26, %v5652_v23  ;;  %v643_v31 = vpop.f32.mrb[63].mxu0  ;;  %v753_v18 = vadd.f32 %v752_v20, %v5668_v48  ;;  %v754_v33 = vpop.f32.mrb[62].mxu1  ;;  %v1452_v26 = vunpack.c.l.bf16 %v5533_v4 }
 0x1b6   :  { %v644_v50 = vadd.f32 %v643_v31, %v5658_v49  ;;  %v755_v35 = vadd.f32 %v754_v33, %v5663_v36  ;;  %v756_v32 = vpop.f32.mrb[63].mxu1  ;;  %v1453_v49 = vunpack.c.l.bf16 %v5536_v6 }
 0x1b7   :  { %v5789_v22 = vpack.c.bf16 %v642_v57, %v638_v24  ;;  %v757_v34 = vadd.f32 %v756_v32, %v5668_v48  ;;  %v1455_v24 = vunpack.c.l.bf16 %v5540_v8  ;;  %v1456_v48 = vunpack.c.h.bf16 %v5533_v4 }
 0x1b8   :  { %v5792_v59 = vpack.c.bf16 %v644_v50, %v640_v21  ;;  %v5794_v55 = vpack.c.bf16 %v755_v35, %v751_v37  ;;  %v1457_v35 = vunpack.c.h.bf16 %v5536_v6 }
 0x1b9   :  { %v5796_v23 = vpack.c.bf16 %v757_v34, %v753_v18  ;;  %v1458_v18 = vunpack.c.h.bf16 %v5538_v7 }
 0x1ba   :  { %v1145_v20 = vpop.f32.mrb[64].mxu0 }
 0x1bb   :  { %v1460_v31 = vadd.f32 %v1452_v26, %v1145_v20  ;;  %v1188_v36 = vpop.f32.mrb[64].mxu1  ;;  %v1147_v33 = vpop.f32.mrb[65].mxu0  ;;  %v1459_v26 = vunpack.c.h.bf16 %v5540_v8 }
 0x1bc   :  { %v1462_v57 = vadd.f32 %v1454_v12, %v1188_v36  ;;  %v1461_v21 = vadd.f32 %v1453_v49, %v1147_v33  ;;  %v1190_v37 = vpop.f32.mrb[65].mxu1  ;;  %v1149_v50 = vpop.f32.mrb[66].mxu0 }
 0x1bd   :  { %v4048_v32 = vmul.f32 -1.442695, %v1460_v31  ;;  %v1463_v34 = vadd.f32 %v1455_v24, %v1190_v37  ;;  %v1464_v47 = vadd.f32 %v1456_v48, %v1149_v50  ;;  %v1192_v56 = vpop.f32.mrb[66].mxu1  ;;  %v1151_v39 = vpop.f32.mrb[67].mxu0 }
 0x1be   :  { %v4050_v20 = vmul.f32 -1.442695, %v1461_v21  ;;  %v1466_v10 = vadd.f32 %v1458_v18, %v1192_v56  ;;  %v1465_v5 = vadd.f32 %v1457_v35, %v1151_v39  ;;  %v1194_v9 = vpop.f32.mrb[67].mxu1 }
 0x1bf   :  { %4327 = vpow2.f32 %v4048_v32  ;;  %v4049_v4 = vmul.f32 -1.442695, %v1464_v47  ;;  %v1467_v12 = vadd.f32 %v1459_v26, %v1194_v9  ;;  %v4052_v7 = vmul.f32 -1.442695, %v1463_v34 }
 0x1c0   :  { %4329 = vpow2.f32 %v4050_v20  ;;  %v4051_v49 = vmul.f32 -1.442695, %v1465_v5  ;;  %v1468_v34 = vunpack.c.l.bf16 %v5789_v22  ;;  %v1470_v26 = vunpack.c.l.bf16 %v5794_v55 }
 0x1c1   :  { %4331 = vpow2.f32 %v4049_v4  ;;  %v4053_v6 = vmul.f32 -1.442695, %v1467_v12  ;;  %v1469_v20 = vunpack.c.l.bf16 %v5792_v59 }
 0x1c2   :  { %4333 = vpow2.f32 %v4051_v49 }
 0x1c3   :  { %4335 = vtanh.f32 %v1462_v57 }
 0x1c4   :  { %4337 = vpow2.f32 %v4052_v7 }
 0x1c5   :  { %4339 = vpow2.f32 %v4053_v6  ;;  %v1474_v6 = vunpack.c.h.bf16 %v5794_v55 }
 0x1c9   :  { %v4328_v31 = vpop.eup %4327 }
 0x1ca   :  { %v4330_v36 = vpop.eup %4329  ;;  %v1490_v33 = vadd.f32 1.0, %v4328_v31 }
 0x1cb   :  { %v1502_v24 = vadd.f32 1.0, %v4330_v36  ;;  %v4332_v8 = vpop.eup %4331 }
 0x1cc   :  { %4341 = vrcp.f32 %v1490_v33  ;;  %v1491_v39 = vadd.f32 1.0, %v4332_v8  ;;  %v4334_v56 = vpop.eup %4333  ;;  %v1471_v8 = vunpack.c.l.bf16 %v5796_v23 }
 0x1cd   :  { %4343 = vrcp.f32 %v1502_v24  ;;  %v1503_v9 = vadd.f32 1.0, %v4334_v56  ;;  %v4336_v5 = vpop.eup %4335 }
 0x1ce   :  { %4345 = vtanh.f32 %v1466_v10  ;;  %v4338_v47 = vpop.eup %4337  ;;  %v1472_v10 = vunpack.c.h.bf16 %v5789_v22 }
 0x1cf   :  { %4347 = vrcp.f32 %v1491_v39  ;;  %v4340_v48 = vpop.eup %4339  ;;  %v1516_v50 = vadd.f32 1.0, %v4338_v47  ;;  %v1473_v39 = vunpack.c.h.bf16 %v5792_v59 }
 0x1d0   :  { %4349 = vrcp.f32 %v1503_v9  ;;  %v1517_v49 = vadd.f32 1.0, %v4340_v48 }
 0x1d1   :  { %4351 = vrcp.f32 %v1516_v50  ;;  %v1475_v50 = vunpack.c.h.bf16 %v5796_v23 }
 0x1d6   :  { %v4342_v21 = vpop.eup %4341 }
 0x1d7   :  { %v4344_v37 = vpop.eup %4343  ;;  %v1524_v57 = vmul.f32 %v4342_v21, %v4336_v5 }
 0x1d8   :  { %v4346_v18 = vpop.eup %4345  ;;  %v1522_v35 = vmul.f32 0.0, %v4344_v37 }
 0x1d9   :  { %v4348_v32 = vpop.eup %4347 }
 0x1da   :  { %v5810_v4 = vadd.f32 %v1524_v57, %v1522_v35  ;;  %v1525_v12 = vmul.f32 %v4348_v32, %v4346_v18  ;;  %v1391_v7 = vpop.f32.mrb[68].mxu0  ;;  %v4350_v31 = vpop.eup %4349 }
 0x1db   :  { %v1476_v36 = vadd.f32 %v1468_v34, %v1391_v7  ;;  %v1434_v33 = vpop.f32.mrb[68].mxu1  ;;  %v1393_v24 = vpop.f32.mrb[69].mxu0  ;;  %v1523_v56 = vmul.f32 0.0, %v4350_v31 }
 0x1dc   :  { %4353 = vtanh.f32 %v5810_v4  ;;  %v1478_v22 = vadd.f32 %v1470_v26, %v1434_v33  ;;  %v1477_v9 = vadd.f32 %v1469_v20, %v1393_v24  ;;  %v1436_v5 = vpop.f32.mrb[69].mxu1  ;;  %v1395_v47 = vpop.f32.mrb[70].mxu0 }
 0x1dd   :  { %v4054_v48 = vmul.f32 -1.442695, %v1476_v36  ;;  %v1479_v21 = vadd.f32 %v1471_v8, %v1436_v5  ;;  %v1480_v37 = vadd.f32 %v1472_v10, %v1395_v47  ;;  %v1438_v55 = vpop.f32.mrb[70].mxu1  ;;  %v1397_v57 = vpop.f32.mrb[71].mxu0  ;;  %v5817_v18 = vadd.f32 %v1525_v12, %v1523_v56 }
 0x1de   :  { %4355 = vrcp.f32 %v1517_v49  ;;  %v4056_v35 = vmul.f32 -1.442695, %v1477_v9  ;;  %v1482_v32 = vadd.f32 %v1474_v6, %v1438_v55  ;;  %v1440_v59 = vpop.f32.mrb[71].mxu1  ;;  %v1481_v7 = vadd.f32 %v1473_v39, %v1397_v57  ;;  %v4352_v10 = vpop.eup %4351  ;;  %v5820_v55 = vld [vmem:[#allocation9] ss:$16 sps:$4 sm:$0xff]  }
 0x1df   :  { %4357 = vpow2.f32 %v4054_v48  ;;  %v4055_v34 = vmul.f32 -1.442695, %v1480_v37  ;;  %v1483_v26 = vadd.f32 %v1475_v50, %v1440_v59  ;;  %v4058_v36 = vmul.f32 -1.442695, %v1479_v21  ;;  %v5823_v57 = vld [vmem:[#allocation9 + $0x8] ss:$16 sps:$4 sm:$0xff]  }
 0x1e0   :  { %4359 = vtanh.f32 %v5817_v18  ;;  %v4057_v20 = vmul.f32 -1.442695, %v1481_v7  ;;  %v5826_v50 = vld [vmem:[#allocation9 + $0x24] ss:$16 sps:$4 sm:$0xff]   ;;  %v5837_v7 = vld [vmem:[#allocation9 + $0x28] ss:$16 sps:$4 sm:$0xff]  }
 0x1e1   :  { %4361 = vpow2.f32 %v4056_v35  ;;  %v4059_v39 = vmul.f32 -1.442695, %v1483_v26  ;;  %v5829_v35 = vld [vmem:[#allocation9 + $0x2c] ss:$16 sps:$4 sm:$0xff]  }
 0x1e2   :  { %4363 = vpow2.f32 %v4055_v34  ;;  %v5834_v34 = vld [vmem:[#allocation9 + $0x20] ss:$16 sps:$4 sm:$0xff]  }
 0x1e3   :  { %4365 = vpow2.f32 %v4057_v20  ;;  %v5840_v20 = vld [vmem:[#allocation9 + $0x44] ss:$16 sps:$4 sm:$0xff]  }
 0x1e4   :  { %4367 = vtanh.f32 %v1478_v22 }
 0x1e5   :  { %4369 = vpow2.f32 %v4058_v36 }
 0x1e6   :  { %v4354_v31 = vpop.eup %4353 }
 0x1e7   :  { %v1530_v23 = vmul.f32 %v4354_v31, %v4352_v10  ;;  %v5843_v10 = vld [vmem:[#allocation9 + $0x4c] ss:$16 sps:$4 sm:$0xff]  }
 0x1e8   :  { %v4356_v12 = vpop.eup %4355 }
 0x1e9   :  { %v4358_v33 = vpop.eup %4357  ;;  %v4176_v49 = vpack.c.bf16 %v1530_v23, %v1530_v23 }
 0x1ea   :  { %v4360_v24 = vpop.eup %4359  ;;  %v1538_v6 = vadd.f32 1.0, %v4358_v33 }
 0x1eb   :  { %v4362_v8 = vpop.eup %4361  ;;  %v1531_v56 = vmul.f32 %v4360_v24, %v4356_v12  ;;  %1589 = vst [vmem:[#allocation12] sm:$0xf] %v4176_v49  ;;  %v5846_v49 = vld [vmem:[#allocation9 + $0x40] ss:$16 sps:$4 sm:$0xff]   ;;  %v5849_v24 = vld [vmem:[#allocation9 + $0x48] ss:$16 sps:$4 sm:$0xff]  }
 0x1ec   :  { %4371 = vrcp.f32 %v1538_v6  ;;  %v1550_v9 = vadd.f32 1.0, %v4362_v8  ;;  %v4364_v5 = vpop.eup %4363 }
 0x1ed   :  { %4373 = vtanh.f32 %v1482_v32  ;;  %v1580_v47 = vpack.c.bf16 %v1531_v56, %v1530_v23  ;;  %v4177_v48 = vpack.c.bf16 %v1531_v56, %v1531_v56  ;;  %v1539_v21 = vadd.f32 1.0, %v4364_v5  ;;  %v4366_v37 = vpop.eup %4365  ;;  %v5855_v56 = vld [vmem:[#allocation9 + $0x6c] ss:$16 sps:$4 sm:$0xff]  }
 0x1ee   :  { %4375 = vrcp.f32 %v1550_v9  ;;  %v1551_v22 = vadd.f32 1.0, %v4366_v37  ;;  %v6955_v32 = vmov 0   ;;  %v4368_v59 = vpop.eup %4367  ;;  %v5860_v37 = vld [vmem:[#allocation9 + $0x60] ss:$16 sps:$4 sm:$0xff]  }
 0x1ef   :  { %4377 = vpow2.f32 %v4059_v39  ;;  %1590 = vst [vmem:[#allocation12 + $0x8] sm:$0xf] %v4177_v48  ;;  %1634 = vmatmul.mubr.bf16.vlgmr.msra.gmra.mrb[72].mxu0 %v1580_v47  ;;  %1677 = vmatmul.mubr.bf16.vlgmr.msra.gmra.mrb[72].mxu1 %v1580_v47  ;;  %v4370_v26 = vpop.eup %4369  ;;  %v5852_v39 = vld [vmem:[#allocation9 + $0x64] ss:$16 sps:$4 sm:$0xff]  }
 0x1f0   :  { %4379 = vrcp.f32 %v1539_v21  ;;  %1688 = vmatpush1.bf16.msra.mxu0 %v5820_v55  ;;  %1731 = vmatpush1.bf16.msra.mxu1 %v5823_v57  ;;  %v1564_v33 = vadd.f32 1.0, %v4370_v26  ;;  %v5867_v26 = vld [vmem:[#allocation9 + $0x84] ss:$16 sps:$4 sm:$0xff]  }
 0x1f1   :  { %1689 = vmatprep.subr.bf16.mxu0 %v5826_v50  ;;  %1732 = vmatprep.subr.bf16.mxu1 %v5829_v35  ;;  %4381 = vrcp.f32 %v1551_v22  ;;  %v5863_v22 = vld [vmem:[#allocation9 + $0x68] ss:$16 sps:$4 sm:$0xff]  }
 0x1f2   :  { %1719 = vmatprep.mubr.bf16.mxu0 %v6955_v32  ;;  %1762 = vmatprep.mubr.bf16.mxu1 %v6955_v32  ;;  %4383 = vrcp.f32 %v1564_v33  ;;  %v5882_v33 = vld [vmem:[#allocation9 + $0xa4] ss:$16 sps:$4 sm:$0xff]  }
 0x1f4   :  { %1690 = vmatpush1.bf16.msra.mxu0 %v5834_v34  ;;  %1733 = vmatpush1.bf16.msra.mxu1 %v5837_v7 }
 0x1f5   :  { %1691 = vmatprep.subr.bf16.mxu0 %v5840_v20  ;;  %1734 = vmatprep.subr.bf16.mxu1 %v5843_v10 }
 0x1f6   :  { %v4372_v31 = vpop.eup %4371 }
 0x1f7   :  { %v4374_v36 = vpop.eup %4373  ;;  %v1572_v23 = vmul.f32 %v4372_v31, %v4368_v59  ;;  %v5870_v31 = vld [vmem:[#allocation9 + $0x8c] ss:$16 sps:$4 sm:$0xff]  }
 0x1f8   :  { %v4376_v12 = vpop.eup %4375  ;;  %1692 = vmatpush1.bf16.msra.mxu0 %v5846_v49  ;;  %1735 = vmatpush1.bf16.msra.mxu1 %v5849_v24 }
 0x1f9   :  { %v4378_v6 = vpop.eup %4377  ;;  %v1570_v8 = vmul.f32 0.0, %v4376_v12  ;;  %1693 = vmatprep.subr.bf16.mxu0 %v5852_v39  ;;  %1736 = vmatprep.subr.bf16.mxu1 %v5855_v56  ;;  %v5878_v12 = vld [vmem:[#allocation9 + $0x88] ss:$16 sps:$4 sm:$0xff]  }
 0x1fa   :  { %v4380_v9 = vpop.eup %4379  ;;  %v1565_v21 = vadd.f32 1.0, %v4378_v6  ;;  %v5885_v6 = vld [vmem:[#allocation9 + $0xac] ss:$16 sps:$4 sm:$0xff]  }
 0x1fb   :  { %v5858_v5 = vadd.f32 %v1572_v23, %v1570_v8  ;;  %v1573_v47 = vmul.f32 %v4380_v9, %v4374_v36  ;;  %v4382_v48 = vpop.eup %4381  ;;  %v5875_v23 = vld [vmem:[#allocation9 + $0x80] ss:$16 sps:$4 sm:$0xff]   ;;  %v5891_v9 = vld [vmem:[#allocation9 + $0xa8] ss:$16 sps:$4 sm:$0xff]  }
 0x1fc   :  { %1694 = vmatpush1.bf16.msra.mxu0 %v5860_v37  ;;  %1737 = vmatpush1.bf16.msra.mxu1 %v5863_v22  ;;  %v1571_v59 = vmul.f32 0.0, %v4382_v48  ;;  %v5888_v8 = vld [vmem:[#allocation9 + $0xa0] ss:$16 sps:$4 sm:$0xff]   ;;  %v5897_v48 = vld [vmem:[#allocation9 + $0xcc] ss:$16 sps:$4 sm:$0xff]  }
 0x1fd   :  { %4385 = vtanh.f32 %v5858_v5  ;;  %1695 = vmatprep.subr.bf16.mxu0 %v5867_v26  ;;  %1738 = vmatprep.subr.bf16.mxu1 %v5870_v31 }
 0x1fe   :  { %v5873_v36 = vadd.f32 %v1573_v47, %v1571_v59  ;;  %4387 = vrcp.f32 %v1565_v21  ;;  %v5894_v47 = vld [vmem:[#allocation9 + $0xc4] ss:$16 sps:$4 sm:$0xff]   ;;  %v4384_v21 = vpop.eup %4383 }
 0x200   :  { %1696 = vmatpush1.bf16.msra.mxu0 %v5875_v23  ;;  %1739 = vmatpush1.bf16.msra.mxu1 %v5878_v12  ;;  %4389 = vtanh.f32 %v5873_v36 }
 0x201   :  { %1697 = vmatprep.subr.bf16.mxu0 %v5882_v33  ;;  %1740 = vmatprep.subr.bf16.mxu1 %v5885_v6 }
 0x204   :  { %1698 = vmatpush1.bf16.msra.mxu0 %v5888_v8  ;;  %1741 = vmatpush1.bf16.msra.mxu1 %v5891_v9 }
 0x205   :  { %1699 = vmatprep.subr.bf16.mxu0 %v5894_v47  ;;  %1742 = vmatprep.subr.bf16.mxu1 %v5897_v48 }
 0x207   :  { %v4386_v59 = vpop.eup %4385 }
 0x208   :  { %1700 = vmatpush1.bf16.msra.mxu0 %v5900_v2  ;;  %1743 = vmatpush1.bf16.msra.mxu1 %v5903_v17  ;;  %v1578_v19 = vmul.f32 %v4386_v59, %v4384_v21  ;;  %v4388_v42 = vpop.eup %4387  ;;  %v5918_v59 = vld [vmem:[#allocation8 + $0x4] ss:$16 sps:$4 sm:$0xff]  }
 0x209   :  { %1701 = vmatprep.subr.bf16.mxu0 %v5906_v3  ;;  %1744 = vmatprep.subr.bf16.mxu1 %v5909_v44  ;;  %6957 = vst [vmem:[#allocation66_spill] sm:$0xff] %v5918_v59 }
 0x20a   :  { %v4178_v40 = vpack.c.bf16 %v1578_v19, %v1578_v19  ;;  %v4390_v41 = vpop.eup %4389 }
 0x20b   :  { %v1579_v21 = vmul.f32 %v4390_v41, %v4388_v42  ;;  %v5933_v41 = vld [vmem:[#allocation8 + $0x2c] ss:$16 sps:$4 sm:$0xff]   ;;  %v5938_v42 = vld [vmem:[#allocation8 + $0x20] ss:$16 sps:$4 sm:$0xff]  }
 0x20c   :  { %1702 = vmatpush1.bf16.msra.mxu0 %v5912_v38  ;;  %1745 = vmatpush1.bf16.msra.mxu1 %v5915_v1  ;;  %1599 = vst [vmem:[#allocation12 + $0x74] sm:$0xf] %v4178_v40  ;;  %v5930_v40 = vld [vmem:[#allocation8 + $0x24] ss:$16 sps:$4 sm:$0xff]   ;;  %6962 = vst [vmem:[#allocation71_spill] sm:$0xff] %v5933_v41 }
 0x20d   :  { %1933 = vmatprep.subr.bf16.mxu0 %v5918_v59  ;;  %1976 = vmatprep.subr.bf16.mxu1 %v5921_v60  ;;  %v1581_v52 = vpack.c.bf16 %v1579_v21, %v1578_v19  ;;  %v4179_v62 = vpack.c.bf16 %v1579_v21, %v1579_v21  ;;  %6961 = vst [vmem:[#allocation70_spill] sm:$0xff] %v5930_v40  ;;  %6963 = vst [vmem:[#allocation72_spill] sm:$0xff] %v5938_v42  ;;  %v5944_v19 = vld [vmem:[#allocation8 + $0x44] ss:$16 sps:$4 sm:$0xff]   ;;  %v5950_v21 = vld [vmem:[#allocation8 + $0x40] ss:$16 sps:$4 sm:$0xff]  }
 0x20e   :  { %6965 = vst [vmem:[#allocation74_spill] sm:$0xff] %v5944_v19  ;;  %6967 = vst [vmem:[#allocation76_spill] sm:$0xff] %v5950_v21 }
 0x20f   :  { %1600 = vst [vmem:[#allocation12 + $0x7c] sm:$0xf] %v4179_v62  ;;  %1720 = vmatmul.mubr.bf16.vlgmr.msra.gmra.mrb[76].mxu0 %v1581_v52  ;;  %1763 = vmatmul.mubr.bf16.vlgmr.msra.gmra.mrb[76].mxu1 %v1581_v52  ;;  %v5941_v52 = vld [vmem:[#allocation8 + $0x28] ss:$16 sps:$4 sm:$0xff]   ;;  %v5947_v62 = vld [vmem:[#allocation8 + $0x4c] ss:$16 sps:$4 sm:$0xff]  }
 0x210   :  { %1934 = vmatpush1.bf16.msra.mxu0 %v5924_v16  ;;  %1977 = vmatpush1.bf16.msra.mxu1 %v5927_v14  ;;  %6964 = vst [vmem:[#allocation73_spill] sm:$0xff] %v5941_v52  ;;  %6966 = vst [vmem:[#allocation75_spill] sm:$0xff] %v5947_v62  ;;  %v1790_v14 = vunpack.c.h.bf16 %v5556_v29 }
 0x211   :  { %1935 = vmatprep.subr.bf16.mxu0 %v5930_v40  ;;  %1978 = vmatprep.subr.bf16.mxu1 %v5933_v41  ;;  %v1788_v40 = vunpack.c.h.bf16 %v5552_v27 }
 0x212   :  { %1965 = vmatprep.mubr.bf16.mxu0 %v6955_v32  ;;  %2008 = vmatprep.mubr.bf16.mxu1 %v6955_v32 }
 0x214   :  { %1936 = vmatpush1.bf16.msra.mxu0 %v5938_v42  ;;  %1979 = vmatpush1.bf16.msra.mxu1 %v5941_v52 }
 0x215   :  { %1937 = vmatprep.subr.bf16.mxu0 %v5944_v19  ;;  %1980 = vmatprep.subr.bf16.mxu1 %v5947_v62  ;;  %v1789_v19 = vunpack.c.h.bf16 %v5554_v28 }
 0x218   :  { %1938 = vmatpush1.bf16.msra.mxu0 %v5950_v21  ;;  %1981 = vmatpush1.bf16.msra.mxu1 %v5953_v15 }
 0x219   :  { %1939 = vmatprep.subr.bf16.mxu0 %v5956_v11  ;;  %1982 = vmatprep.subr.bf16.mxu1 %v5959_v30  ;;  %v1786_v11 = vunpack.c.l.bf16 %v5556_v29 }
 0x21c   :  { %1940 = vmatpush1.bf16.msra.mxu0 %v5962_v13  ;;  %1983 = vmatpush1.bf16.msra.mxu1 %v5965_v46  ;;  %v5983_v46 = vld [vmem:[#allocation8 + $0xac] ss:$16 sps:$4 sm:$0xff]  }
 0x21d   :  { %1941 = vmatprep.subr.bf16.mxu0 %v5968_v0  ;;  %1984 = vmatprep.subr.bf16.mxu1 %v5971_v54  ;;  %6978 = vst [vmem:[#allocation87_spill] sm:$0xff] %v5983_v46  ;;  %v5986_v0 = vld [vmem:[#allocation8 + $0xa0] ss:$16 sps:$4 sm:$0xff]   ;;  %v5989_v54 = vld [vmem:[#allocation8 + $0xa8] ss:$16 sps:$4 sm:$0xff]  }
 0x21e   :  { %6979 = vst [vmem:[#allocation88_spill] sm:$0xff] %v5986_v0  ;;  %6980 = vst [vmem:[#allocation89_spill] sm:$0xff] %v5989_v54 }
 0x220   :  { %1942 = vmatpush1.bf16.msra.mxu0 %v5974_v51  ;;  %1985 = vmatpush1.bf16.msra.mxu1 %v5977_v53  ;;  %v5992_v51 = vld [vmem:[#allocation8 + $0xc4] ss:$16 sps:$4 sm:$0xff]   ;;  %v5995_v53 = vld [vmem:[#allocation8 + $0xcc] ss:$16 sps:$4 sm:$0xff]  }
 0x221   :  { %1943 = vmatprep.subr.bf16.mxu0 %v5980_v45  ;;  %1986 = vmatprep.subr.bf16.mxu1 %v5983_v46  ;;  %6981 = vst [vmem:[#allocation90_spill] sm:$0xff] %v5992_v51  ;;  %6982 = vst [vmem:[#allocation91_spill] sm:$0xff] %v5995_v53  ;;  %v5998_v45 = vld [vmem:[#allocation8 + $0xc0] ss:$16 sps:$4 sm:$0xff]   ;;  %v6001_v46 = vld [vmem:[#allocation8 + $0xc8] ss:$16 sps:$4 sm:$0xff]  }
 0x222   :  { %6983 = vst [vmem:[#allocation92_spill] sm:$0xff] %v5998_v45  ;;  %6984 = vst [vmem:[#allocation93_spill] sm:$0xff] %v6001_v46 }
 0x224   :  { %1944 = vmatpush1.bf16.msra.mxu0 %v5986_v0  ;;  %1987 = vmatpush1.bf16.msra.mxu1 %v5989_v54  ;;  %v6004_v0 = vld [vmem:[#allocation8 + $0xe4] ss:$16 sps:$4 sm:$0xff]   ;;  %v6007_v54 = vld [vmem:[#allocation8 + $0xec] ss:$16 sps:$4 sm:$0xff]  }
 0x225   :  { %1945 = vmatprep.subr.bf16.mxu0 %v5992_v51  ;;  %1988 = vmatprep.subr.bf16.mxu1 %v5995_v53  ;;  %6985 = vst [vmem:[#allocation94_spill] sm:$0xff] %v6004_v0  ;;  %6986 = vst [vmem:[#allocation95_spill] sm:$0xff] %v6007_v54  ;;  %v6010_v51 = vld [vmem:[#allocation8 + $0xe0] ss:$16 sps:$4 sm:$0xff]   ;;  %v6013_v53 = vld [vmem:[#allocation8 + $0xe8] ss:$16 sps:$4 sm:$0xff]  }
 0x226   :  { %6987 = vst [vmem:[#allocation96_spill] sm:$0xff] %v6010_v51  ;;  %6988 = vst [vmem:[#allocation97_spill] sm:$0xff] %v6013_v53 }
 0x228   :  { %1946 = vmatpush1.bf16.msra.mxu0 %v5998_v45  ;;  %1989 = vmatpush1.bf16.msra.mxu1 %v6001_v46  ;;  %v6016_v45 = vld [vmem:[#allocation9 + $0x4] ss:$16 sps:$4 sm:$0xff]   ;;  %v6019_v46 = vld [vmem:[#allocation9 + $0xc] ss:$16 sps:$4 sm:$0xff]  }
 0x229   :  { %1947 = vmatprep.subr.bf16.mxu0 %v6004_v0  ;;  %1990 = vmatprep.subr.bf16.mxu1 %v6007_v54  ;;  %6989 = vst [vmem:[#allocation98_spill] sm:$0xff] %v6016_v45  ;;  %6990 = vst [vmem:[#allocation99_spill] sm:$0xff] %v6019_v46  ;;  %v1783_v0 = vunpack.c.l.bf16 %v5549_v25  ;;  %v1785_v54 = vunpack.c.l.bf16 %v5554_v28 }
 0x22c   :  { %1948 = vmatpush1.bf16.msra.mxu0 %v6010_v51  ;;  %1991 = vmatpush1.bf16.msra.mxu1 %v6013_v53  ;;  %v1784_v51 = vunpack.c.l.bf16 %v5552_v27 }
 0x22d   :  { %2019 = vmatprep.subr.bf16.mxu0 %v6016_v45  ;;  %2062 = vmatprep.subr.bf16.mxu1 %v6019_v46  ;;  %v1787_v45 = vunpack.c.h.bf16 %v5549_v25 }
 0x2c2   :  { %v1635_v13 = vpop.f32.mrb[72].mxu0  ;;  %v1678_v30 = vpop.f32.mrb[72].mxu1 }
 0x2c3   :  { %v1791_v15 = vadd.f32 %v1783_v0, %v1635_v13  ;;  %v1793_v53 = vadd.f32 %v1785_v54, %v1678_v30  ;;  %v1637_v21 = vpop.f32.mrb[73].mxu0  ;;  %v1680_v62 = vpop.f32.mrb[73].mxu1 }
 0x2c4   :  { %v1792_v52 = vadd.f32 %v1784_v51, %v1637_v21  ;;  %v1794_v46 = vadd.f32 %v1786_v11, %v1680_v62  ;;  %v1639_v42 = vpop.f32.mrb[74].mxu0  ;;  %v1682_v41 = vpop.f32.mrb[74].mxu1 }
 0x2c5   :  { %v4064_v16 = vmul.f32 -1.442695, %v1791_v15  ;;  %v1795_v60 = vadd.f32 %v1787_v45, %v1639_v42  ;;  %v1797_v59 = vadd.f32 %v1789_v19, %v1682_v41  ;;  %v1641_v1 = vpop.f32.mrb[75].mxu0  ;;  %v1684_v0 = vpop.f32.mrb[75].mxu1 }
 0x2c6   :  { %v4066_v54 = vmul.f32 -1.442695, %v1792_v52  ;;  %v1796_v13 = vadd.f32 %v1788_v40, %v1641_v1  ;;  %v1798_v30 = vadd.f32 %v1790_v14, %v1684_v0  ;;  %v4068_v51 = vmul.f32 -1.442695, %v1794_v46 }
 0x2c7   :  { %4391 = vpow2.f32 %v4064_v16  ;;  %v4065_v25 = vmul.f32 -1.442695, %v1795_v60  ;;  %v1799_v0 = vunpack.c.l.bf16 %v5773_v61 }
 0x2c8   :  { %4393 = vpow2.f32 %v4066_v54  ;;  %v4067_v28 = vmul.f32 -1.442695, %v1796_v13  ;;  %v4069_v29 = vmul.f32 -1.442695, %v1798_v30  ;;  %v1801_v30 = vunpack.c.l.bf16 %v5778_v43 }
 0x2c9   :  { %4395 = vpow2.f32 %v4065_v25  ;;  %v1803_v25 = vunpack.c.h.bf16 %v5773_v61 }
 0x2ca   :  { %4397 = vpow2.f32 %v4067_v28 }
 0x2cb   :  { %4399 = vtanh.f32 %v1793_v53 }
 0x2cc   :  { %4401 = vpow2.f32 %v4068_v51 }
 0x2cd   :  { %4403 = vtanh.f32 %v1797_v59 }
 0x2d1   :  { %v4392_v11 = vpop.eup %4391 }
 0x2d2   :  { %v4394_v27 = vpop.eup %4393  ;;  %v1821_v62 = vadd.f32 1.0, %v4392_v11 }
 0x2d3   :  { %v1833_v45 = vadd.f32 1.0, %v4394_v27  ;;  %v4396_v15 = vpop.eup %4395 }
 0x2d4   :  { %4405 = vrcp.f32 %v1821_v62  ;;  %v1822_v1 = vadd.f32 1.0, %v4396_v15  ;;  %v4398_v14 = vpop.eup %4397  ;;  %v1800_v62 = vunpack.c.l.bf16 %v5776_v63 }
 0x2d5   :  { %4407 = vrcp.f32 %v1833_v45  ;;  %v1834_v16 = vadd.f32 1.0, %v4398_v14  ;;  %v4400_v60 = vpop.eup %4399 }
 0x2d6   :  { %4409 = vpow2.f32 %v4069_v29  ;;  %v4402_v40 = vpop.eup %4401  ;;  %v1802_v29 = vunpack.c.l.bf16 %v5780_v58 }
 0x2d7   :  { %4411 = vrcp.f32 %v1822_v1  ;;  %v4404_v46 = vpop.eup %4403  ;;  %v1847_v52 = vadd.f32 1.0, %v4402_v40 }
 0x2d8   :  { %4413 = vrcp.f32 %v1834_v16 }
 0x2d9   :  { %4415 = vrcp.f32 %v1847_v52 }
 0x2de   :  { %v4406_v41 = vpop.eup %4405 }
 0x2df   :  { %v4408_v53 = vpop.eup %4407  ;;  %v1855_v42 = vmul.f32 %v4406_v41, %v4400_v60  ;;  %v1804_v41 = vunpack.c.h.bf16 %v5776_v63 }
 0x2e0   :  { %v4410_v19 = vpop.eup %4409  ;;  %v1853_v21 = vmul.f32 %v4408_v53, %v5810_v4 }
 0x2e1   :  { %v4412_v59 = vpop.eup %4411  ;;  %v1848_v51 = vadd.f32 1.0, %v4410_v19 }
 0x2e2   :  { %v6032_v54 = vadd.f32 %v1855_v42, %v1853_v21  ;;  %v1856_v13 = vmul.f32 %v4412_v59, %v4404_v46  ;;  %v4414_v28 = vpop.eup %4413  ;;  %v1721_v11 = vpop.f32.mrb[76].mxu0  ;;  %v1805_v46 = vunpack.c.h.bf16 %v5778_v43 }
 0x2e3   :  { %v1764_v27 = vpop.f32.mrb[76].mxu1  ;;  %v1854_v4 = vmul.f32 %v4414_v28, %v5817_v18  ;;  %v1807_v45 = vadd.f32 %v1799_v0, %v1721_v11  ;;  %v1723_v1 = vpop.f32.mrb[77].mxu0  ;;  %v1806_v18 = vunpack.c.h.bf16 %v5780_v58 }
 0x2e4   :  { %4417 = vtanh.f32 %v6032_v54  ;;  %v1809_v15 = vadd.f32 %v1801_v30, %v1764_v27  ;;  %v1766_v14 = vpop.f32.mrb[77].mxu1  ;;  %v1808_v16 = vadd.f32 %v1800_v62, %v1723_v1  ;;  %v1725_v61 = vpop.f32.mrb[78].mxu0 }
 0x2e5   :  { %v1810_v60 = vadd.f32 %v1802_v29, %v1766_v14  ;;  %v1768_v40 = vpop.f32.mrb[78].mxu1  ;;  %v6042_v53 = vadd.f32 %v1856_v13, %v1854_v4  ;;  %v4070_v42 = vmul.f32 -1.442695, %v1807_v45  ;;  %v1811_v52 = vadd.f32 %v1803_v25, %v1725_v61  ;;  %v1727_v19 = vpop.f32.mrb[79].mxu0 }
 0x2e6   :  { %v1770_v21 = vpop.f32.mrb[79].mxu1  ;;  %4419 = vrcp.f32 %v1848_v51  ;;  %v4072_v59 = vmul.f32 -1.442695, %v1808_v16  ;;  %v1813_v0 = vadd.f32 %v1805_v46, %v1768_v40  ;;  %v1812_v30 = vadd.f32 %v1804_v41, %v1727_v19  ;;  %v4416_v63 = vpop.eup %4415 }
 0x2e7   :  { %4421 = vtanh.f32 %v6042_v53  ;;  %v4071_v28 = vmul.f32 -1.442695, %v1811_v52  ;;  %v1814_v11 = vadd.f32 %v1806_v18, %v1770_v21  ;;  %v4074_v27 = vmul.f32 -1.442695, %v1810_v60 }
 0x2e8   :  { %4423 = vpow2.f32 %v4070_v42  ;;  %v4073_v43 = vmul.f32 -1.442695, %v1812_v30 }
 0x2e9   :  { %4425 = vpow2.f32 %v4072_v59  ;;  %v4075_v14 = vmul.f32 -1.442695, %v1814_v11 }
 0x2ea   :  { %4427 = vpow2.f32 %v4071_v28 }
 0x2eb   :  { %4429 = vpow2.f32 %v4073_v43 }
 0x2ec   :  { %4431 = vtanh.f32 %v1809_v15 }
 0x2ed   :  { %4433 = vpow2.f32 %v4074_v27 }
 0x2ee   :  { %v4418_v13 = vpop.eup %4417  ;;  %4435 = vtanh.f32 %v1813_v0 }
 0x2ef   :  { %v1861_v25 = vmul.f32 %v4418_v13, %v4416_v63 }
 0x2f0   :  { %v4420_v62 = vpop.eup %4419 }
 0x2f1   :  { %v4180_v29 = vpack.c.bf16 %v1861_v25, %v1861_v25  ;;  %v4422_v58 = vpop.eup %4421 }
 0x2f2   :  { %v4424_v51 = vpop.eup %4423  ;;  %v1862_v4 = vmul.f32 %v4422_v58, %v4420_v62 }
 0x2f3   :  { %1921 = vst [vmem:[#allocation12 + $0x10] sm:$0xf] %v4180_v29  ;;  %v4426_v45 = vpop.eup %4425  ;;  %v1869_v1 = vadd.f32 1.0, %v4424_v51 }
 0x2f4   :  { %v1881_v16 = vadd.f32 1.0, %v4426_v45  ;;  %v1911_v61 = vpack.c.bf16 %v1862_v4, %v1861_v25  ;;  %v4181_v40 = vpack.c.bf16 %v1862_v4, %v1862_v4  ;;  %v4428_v46 = vpop.eup %4427  ;;  %v6991_v45 = vld [vmem:[#allocation65_spill] sm:$0xff] }
 0x2f5   :  { %4437 = vrcp.f32 %v1869_v1  ;;  %v1870_v41 = vadd.f32 1.0, %v4428_v46  ;;  %v4430_v60 = vpop.eup %4429  ;;  %v6994_v46 = vld [vmem:[#allocation68_spill] sm:$0xff] }
 0x2f6   :  { %4439 = vrcp.f32 %v1881_v16  ;;  %1922 = vst [vmem:[#allocation12 + $0x18] sm:$0xf] %v4181_v40  ;;  %1966 = vmatmul.mubr.bf16.vlgmr.msra.gmra.mrb[80].mxu0 %v1911_v61  ;;  %2009 = vmatmul.mubr.bf16.vlgmr.msra.gmra.mrb[80].mxu1 %v1911_v61  ;;  %v1882_v15 = vadd.f32 1.0, %v4430_v60  ;;  %v4432_v42 = vpop.eup %4431  ;;  %v6993_v16 = vld [vmem:[#allocation67_spill] sm:$0xff]  ;;  %v6996_v60 = vld [vmem:[#allocation70_spill] sm:$0xff] }
 0x2f7   :  { %4441 = vpow2.f32 %v4075_v14  ;;  %2020 = vmatpush1.bf16.msra.mxu0 %v5820_v55  ;;  %2063 = vmatpush1.bf16.msra.mxu1 %v5823_v57  ;;  %v4434_v52 = vpop.eup %4433  ;;  %v6992_v14 = vld [vmem:[#allocation66_spill] sm:$0xff] }
 0x2f8   :  { %4443 = vrcp.f32 %v1870_v41  ;;  %2021 = vmatprep.subr.bf16.mxu0 %v5826_v50  ;;  %2064 = vmatprep.subr.bf16.mxu1 %v5829_v35  ;;  %v4436_v19 = vpop.eup %4435  ;;  %v1895_v0 = vadd.f32 1.0, %v4434_v52  ;;  %v6995_v41 = vld [vmem:[#allocation69_spill] sm:$0xff] }
 0x2f9   :  { %2051 = vmatprep.mubr.bf16.mxu0 %v6955_v32  ;;  %2094 = vmatprep.mubr.bf16.mxu1 %v6955_v32  ;;  %4445 = vrcp.f32 %v1882_v15  ;;  %v6997_v15 = vld [vmem:[#allocation71_spill] sm:$0xff]  ;;  %v6999_v52 = vld [vmem:[#allocation73_spill] sm:$0xff] }
 0x2fa   :  { %4447 = vrcp.f32 %v1895_v0  ;;  %v7004_v0 = vld [vmem:[#allocation78_spill] sm:$0xff] }
 0x2fb   :  { %2022 = vmatpush1.bf16.msra.mxu0 %v5834_v34  ;;  %2065 = vmatpush1.bf16.msra.mxu1 %v5837_v7 }
 0x2fc   :  { %2023 = vmatprep.subr.bf16.mxu0 %v5840_v20  ;;  %2066 = vmatprep.subr.bf16.mxu1 %v5843_v10 }
 0x2ff   :  { %v4438_v21 = vpop.eup %4437  ;;  %2024 = vmatpush1.bf16.msra.mxu0 %v5846_v49  ;;  %2067 = vmatpush1.bf16.msra.mxu1 %v5849_v24 }
 0x300   :  { %v4440_v18 = vpop.eup %4439  ;;  %v1903_v59 = vmul.f32 %v4438_v21, %v4432_v42  ;;  %2025 = vmatprep.subr.bf16.mxu0 %v5852_v39  ;;  %2068 = vmatprep.subr.bf16.mxu1 %v5855_v56  ;;  %v6998_v42 = vld [vmem:[#allocation72_spill] sm:$0xff]  ;;  %v7001_v21 = vld [vmem:[#allocation75_spill] sm:$0xff] }
 0x301   :  { %v4442_v30 = vpop.eup %4441  ;;  %v1901_v28 = vmul.f32 %v4440_v18, %v5858_v5  ;;  %v7002_v18 = vld [vmem:[#allocation76_spill] sm:$0xff] }
 0x302   :  { %v4444_v11 = vpop.eup %4443  ;;  %v1896_v25 = vadd.f32 1.0, %v4442_v30  ;;  %v7005_v30 = vld [vmem:[#allocation79_spill] sm:$0xff] }
 0x303   :  { %v6061_v43 = vadd.f32 %v1903_v59, %v1901_v28  ;;  %v1904_v63 = vmul.f32 %v4444_v11, %v4436_v19  ;;  %2026 = vmatpush1.bf16.msra.mxu0 %v5860_v37  ;;  %2069 = vmatpush1.bf16.msra.mxu1 %v5863_v22  ;;  %v4446_v13 = vpop.eup %4445  ;;  %v7000_v19 = vld [vmem:[#allocation74_spill] sm:$0xff]  ;;  %v7003_v59 = vld [vmem:[#allocation77_spill] sm:$0xff]  ;;  %v7006_v28 = vld [vmem:[#allocation80_spill] sm:$0xff] }
 0x304   :  { %2027 = vmatprep.subr.bf16.mxu0 %v5867_v26  ;;  %2070 = vmatprep.subr.bf16.mxu1 %v5870_v31  ;;  %v1902_v27 = vmul.f32 %v4446_v13, %v5873_v36  ;;  %v4448_v36 = vpop.eup %4447  ;;  %v7007_v11 = vld [vmem:[#allocation81_spill] sm:$0xff]  ;;  %v7009_v13 = vld [vmem:[#allocation83_spill] sm:$0xff] }
 0x305   :  { %4449 = vtanh.f32 %v6061_v43 }
 0x306   :  { %v6069_v5 = vadd.f32 %v1904_v63, %v1902_v27  ;;  %4451 = vrcp.f32 %v1896_v25  ;;  %v7008_v63 = vld [vmem:[#allocation82_spill] sm:$0xff]  ;;  %v7010_v25 = vld [vmem:[#allocation84_spill] sm:$0xff]  ;;  %v7011_v27 = vld [vmem:[#allocation85_spill] sm:$0xff] }
 0x307   :  { %2028 = vmatpush1.bf16.msra.mxu0 %v5875_v23  ;;  %2071 = vmatpush1.bf16.msra.mxu1 %v5878_v12 }
 0x308   :  { %2029 = vmatprep.subr.bf16.mxu0 %v5882_v33  ;;  %2072 = vmatprep.subr.bf16.mxu1 %v5885_v6  ;;  %4453 = vtanh.f32 %v6069_v5 }
 0x30b   :  { %2030 = vmatpush1.bf16.msra.mxu0 %v5888_v8  ;;  %2073 = vmatpush1.bf16.msra.mxu1 %v5891_v9 }
 0x30c   :  { %2031 = vmatprep.subr.bf16.mxu0 %v5894_v47  ;;  %2074 = vmatprep.subr.bf16.mxu1 %v5897_v48 }
 0x30f   :  { %v4450_v62 = vpop.eup %4449  ;;  %2032 = vmatpush1.bf16.msra.mxu0 %v5900_v2  ;;  %2075 = vmatpush1.bf16.msra.mxu1 %v5903_v17 }
 0x310   :  { %2033 = vmatprep.subr.bf16.mxu0 %v5906_v3  ;;  %2076 = vmatprep.subr.bf16.mxu1 %v5909_v44  ;;  %v1909_v29 = vmul.f32 %v4450_v62, %v4448_v36  ;;  %v4452_v58 = vpop.eup %4451  ;;  %v7012_v36 = vld [vmem:[#allocation86_spill] sm:$0xff]  ;;  %v7013_v62 = vld [vmem:[#allocation87_spill] sm:$0xff] }
 0x312   :  { %v4182_v51 = vpack.c.bf16 %v1909_v29, %v1909_v29  ;;  %v4454_v4 = vpop.eup %4453 }
 0x313   :  { %2034 = vmatpush1.bf16.msra.mxu0 %v5912_v38  ;;  %2077 = vmatpush1.bf16.msra.mxu1 %v6991_v45  ;;  %v1910_v1 = vmul.f32 %v4454_v4, %v4452_v58  ;;  %v7015_v58 = vld [vmem:[#allocation89_spill] sm:$0xff]  ;;  %v7017_v4 = vld [vmem:[#allocation91_spill] sm:$0xff] }
 0x314   :  { %1931 = vst [vmem:[#allocation12 + $0x64] sm:$0xf] %v4182_v51  ;;  %2265 = vmatprep.subr.bf16.mxu0 %v6992_v14  ;;  %2308 = vmatprep.subr.bf16.mxu1 %v6993_v16  ;;  %v7016_v51 = vld [vmem:[#allocation90_spill] sm:$0xff] }
 0x315   :  { %v1912_v61 = vpack.c.bf16 %v1910_v1, %v1909_v29  ;;  %v4183_v40 = vpack.c.bf16 %v1910_v1, %v1910_v1  ;;  %v7014_v29 = vld [vmem:[#allocation88_spill] sm:$0xff] }
 0x316   :  { %v7018_v1 = vld [vmem:[#allocation92_spill] sm:$0xff] }
 0x317   :  { %1932 = vst [vmem:[#allocation12 + $0x6c] sm:$0xf] %v4183_v40  ;;  %2052 = vmatmul.mubr.bf16.vlgmr.msra.gmra.mrb[84].mxu0 %v1912_v61  ;;  %2095 = vmatmul.mubr.bf16.vlgmr.msra.gmra.mrb[84].mxu1 %v1912_v61  ;;  %v7019_v61 = vld [vmem:[#allocation93_spill] sm:$0xff]  ;;  %v7020_v40 = vld [vmem:[#allocation94_spill] sm:$0xff] }
 0x318   :  { %2266 = vmatpush1.bf16.msra.mxu0 %v6994_v46  ;;  %2309 = vmatpush1.bf16.msra.mxu1 %v6995_v41 }
 0x319   :  { %2267 = vmatprep.subr.bf16.mxu0 %v6996_v60  ;;  %2310 = vmatprep.subr.bf16.mxu1 %v6997_v15 }
 0x31a   :  { %2297 = vmatprep.mubr.bf16.mxu0 %v6955_v32  ;;  %2340 = vmatprep.mubr.bf16.mxu1 %v6955_v32 }
 0x31c   :  { %2268 = vmatpush1.bf16.msra.mxu0 %v6998_v42  ;;  %2311 = vmatpush1.bf16.msra.mxu1 %v6999_v52 }
 0x31d   :  { %2269 = vmatprep.subr.bf16.mxu0 %v7000_v19  ;;  %2312 = vmatprep.subr.bf16.mxu1 %v7001_v21 }
 0x320   :  { %2270 = vmatpush1.bf16.msra.mxu0 %v7002_v18  ;;  %2313 = vmatpush1.bf16.msra.mxu1 %v7003_v59 }
 0x321   :  { %2271 = vmatprep.subr.bf16.mxu0 %v7004_v0  ;;  %2314 = vmatprep.subr.bf16.mxu1 %v7005_v30 }
 0x324   :  { %2272 = vmatpush1.bf16.msra.mxu0 %v7006_v28  ;;  %2315 = vmatpush1.bf16.msra.mxu1 %v7007_v11  ;;  %v7028_v11 = vld [vmem:[#allocation18_spill] sm:$0xff]  ;;  %v7029_v28 = vld [vmem:[#allocation20_spill] sm:$0xff] }
 0x325   :  { %2273 = vmatprep.subr.bf16.mxu0 %v7008_v63  ;;  %2316 = vmatprep.subr.bf16.mxu1 %v7009_v13  ;;  %v7027_v13 = vld [vmem:[#allocation19_spill] sm:$0xff]  ;;  %v2120_v19 = vunpack.c.h.bf16 %v7028_v11  ;;  %v2122_v52 = vunpack.c.h.bf16 %v7029_v28 }
 0x328   :  { %2274 = vmatpush1.bf16.msra.mxu0 %v7010_v25  ;;  %2317 = vmatpush1.bf16.msra.mxu1 %v7011_v27  ;;  %v7021_v25 = vld [vmem:[#allocation95_spill] sm:$0xff]  ;;  %v7022_v27 = vld [vmem:[#allocation96_spill] sm:$0xff] }
 0x329   :  { %2275 = vmatprep.subr.bf16.mxu0 %v7012_v36  ;;  %2318 = vmatprep.subr.bf16.mxu1 %v7013_v62  ;;  %v7023_v36 = vld [vmem:[#allocation97_spill] sm:$0xff]  ;;  %v7024_v62 = vld [vmem:[#allocation98_spill] sm:$0xff] }
 0x32c   :  { %2276 = vmatpush1.bf16.msra.mxu0 %v7014_v29  ;;  %2319 = vmatpush1.bf16.msra.mxu1 %v7015_v58  ;;  %v7025_v29 = vld [vmem:[#allocation99_spill] sm:$0xff]  ;;  %v7026_v58 = vld [vmem:[#allocation17_spill] sm:$0xff] }
 0x32d   :  { %2277 = vmatprep.subr.bf16.mxu0 %v7016_v51  ;;  %2320 = vmatprep.subr.bf16.mxu1 %v7017_v4  ;;  %v2115_v51 = vunpack.c.l.bf16 %v7026_v58  ;;  %v2117_v4 = vunpack.c.l.bf16 %v7027_v13 }
 0x330   :  { %2278 = vmatpush1.bf16.msra.mxu0 %v7018_v1  ;;  %2321 = vmatpush1.bf16.msra.mxu1 %v7019_v61  ;;  %v2116_v61 = vunpack.c.l.bf16 %v7028_v11 }
 0x331   :  { %2279 = vmatprep.subr.bf16.mxu0 %v7020_v40  ;;  %2322 = vmatprep.subr.bf16.mxu1 %v7021_v25  ;;  %v2118_v40 = vunpack.c.l.bf16 %v7029_v28 }
 0x334   :  { %2280 = vmatpush1.bf16.msra.mxu0 %v7022_v27  ;;  %2323 = vmatpush1.bf16.msra.mxu1 %v7023_v36  ;;  %v2119_v36 = vunpack.c.h.bf16 %v7026_v58 }
 0x335   :  { %2351 = vmatprep.subr.bf16.mxu0 %v7024_v62  ;;  %2394 = vmatprep.subr.bf16.mxu1 %v7025_v29  ;;  %v2121_v62 = vunpack.c.h.bf16 %v7027_v13 }
 0x3c9   :  { %v1967_v63 = vpop.f32.mrb[80].mxu0  ;;  %v2010_v1 = vpop.f32.mrb[80].mxu1 }
 0x3ca   :  { %v2123_v30 = vadd.f32 %v2115_v51, %v1967_v63  ;;  %v2125_v25 = vadd.f32 %v2117_v4, %v2010_v1  ;;  %v1969_v0 = vpop.f32.mrb[81].mxu0  ;;  %v2012_v27 = vpop.f32.mrb[81].mxu1 }
 0x3cb   :  { %v2124_v59 = vadd.f32 %v2116_v61, %v1969_v0  ;;  %v2126_v29 = vadd.f32 %v2118_v40, %v2012_v27  ;;  %v1971_v18 = vpop.f32.mrb[82].mxu0  ;;  %v2014_v21 = vpop.f32.mrb[82].mxu1 }
 0x3cc   :  { %v4080_v42 = vmul.f32 -1.442695, %v2123_v30  ;;  %v2127_v15 = vadd.f32 %v2119_v36, %v1971_v18  ;;  %v2129_v60 = vadd.f32 %v2121_v62, %v2014_v21  ;;  %v1973_v41 = vpop.f32.mrb[83].mxu0  ;;  %v2016_v63 = vpop.f32.mrb[83].mxu1 }
 0x3cd   :  { %v4082_v51 = vmul.f32 -1.442695, %v2124_v59  ;;  %v2128_v4 = vadd.f32 %v2120_v19, %v1973_v41  ;;  %v2130_v1 = vadd.f32 %v2122_v52, %v2016_v63  ;;  %v4084_v0 = vmul.f32 -1.442695, %v2126_v29 }
 0x3ce   :  { %4455 = vpow2.f32 %v4080_v42  ;;  %v4081_v58 = vmul.f32 -1.442695, %v2127_v15 }
 0x3cf   :  { %4457 = vpow2.f32 %v4082_v51  ;;  %v4083_v13 = vmul.f32 -1.442695, %v2128_v4  ;;  %v4085_v30 = vmul.f32 -1.442695, %v2130_v1  ;;  %v7031_v4 = vld [vmem:[#allocation61_spill] sm:$0xff] }
 0x3d0   :  { %4459 = vpow2.f32 %v4081_v58  ;;  %v2131_v1 = vunpack.c.l.bf16 %v7031_v4 }
 0x3d1   :  { %4461 = vpow2.f32 %v4083_v13 }
 0x3d2   :  { %4463 = vtanh.f32 %v2125_v25 }
 0x3d3   :  { %4465 = vpow2.f32 %v4084_v0  ;;  %v7032_v0 = vld [vmem:[#allocation63_spill] sm:$0xff] }
 0x3d4   :  { %4467 = vtanh.f32 %v2129_v60 }
 0x3d8   :  { %v4456_v27 = vpop.eup %4455 }
 0x3d9   :  { %v4458_v11 = vpop.eup %4457  ;;  %v2153_v61 = vadd.f32 1.0, %v4456_v27  ;;  %v2133_v27 = vunpack.c.l.bf16 %v7032_v0 }
 0x3da   :  { %v2165_v18 = vadd.f32 1.0, %v4458_v11  ;;  %v4460_v21 = vpop.eup %4459  ;;  %v2135_v11 = vunpack.c.h.bf16 %v7031_v4 }
 0x3db   :  { %4469 = vrcp.f32 %v2153_v61  ;;  %v2154_v41 = vadd.f32 1.0, %v4460_v21  ;;  %v4462_v52 = vpop.eup %4461 }
 0x3dc   :  { %4471 = vrcp.f32 %v2165_v18  ;;  %v2166_v15 = vadd.f32 1.0, %v4462_v52  ;;  %v4464_v42 = vpop.eup %4463 }
 0x3dd   :  { %4473 = vpow2.f32 %v4085_v30  ;;  %v4466_v19 = vpop.eup %4465 }
 0x3de   :  { %4475 = vrcp.f32 %v2154_v41  ;;  %v4468_v59 = vpop.eup %4467  ;;  %v2179_v62 = vadd.f32 1.0, %v4466_v19  ;;  %v7034_v41 = vld [vmem:[#allocation64_spill] sm:$0xff] }
 0x3df   :  { %4477 = vrcp.f32 %v2166_v15  ;;  %v2134_v52 = vunpack.c.l.bf16 %v7034_v41 }
 0x3e0   :  { %4479 = vrcp.f32 %v2179_v62 }
 0x3e5   :  { %v4470_v28 = vpop.eup %4469 }
 0x3e6   :  { %v4472_v25 = vpop.eup %4471  ;;  %v2187_v36 = vmul.f32 %v4470_v28, %v4464_v42  ;;  %v2137_v28 = vunpack.c.h.bf16 %v7032_v0 }
 0x3e7   :  { %v4474_v29 = vpop.eup %4473  ;;  %v2185_v40 = vmul.f32 %v4472_v25, %v6032_v54  ;;  %v7033_v54 = vld [vmem:[#allocation62_spill] sm:$0xff] }
 0x3e8   :  { %v4476_v60 = vpop.eup %4475  ;;  %v2180_v13 = vadd.f32 1.0, %v4474_v29  ;;  %v2132_v21 = vunpack.c.l.bf16 %v7033_v54  ;;  %v2136_v25 = vunpack.c.h.bf16 %v7033_v54 }
 0x3e9   :  { %v6131_v63 = vadd.f32 %v2187_v36, %v2185_v40  ;;  %v2188_v51 = vmul.f32 %v4476_v60, %v4468_v59  ;;  %v4478_v58 = vpop.eup %4477  ;;  %v2138_v60 = vunpack.c.h.bf16 %v7034_v41 }
 0x3ea   :  { %v2186_v61 = vmul.f32 %v4478_v58, %v6042_v53  ;;  %v2053_v30 = vpop.f32.mrb[84].mxu0  ;;  %v2096_v18 = vpop.f32.mrb[84].mxu1 }
 0x3eb   :  { %7030 = vst [vmem:[#allocation65_spill] sm:$0xff] %v6131_v63  ;;  %4481 = vtanh.f32 %v6131_v63  ;;  %v2139_v15 = vadd.f32 %v2131_v1, %v2053_v30  ;;  %v2141_v42 = vadd.f32 %v2133_v27, %v2096_v18  ;;  %v2055_v19 = vpop.f32.mrb[85].mxu0  ;;  %v2098_v59 = vpop.f32.mrb[85].mxu1 }
 0x3ec   :  { %v6142_v36 = vadd.f32 %v2188_v51, %v2186_v61  ;;  %v2140_v62 = vadd.f32 %v2132_v21, %v2055_v19  ;;  %v2142_v29 = vadd.f32 %v2134_v52, %v2098_v59  ;;  %v2057_v40 = vpop.f32.mrb[86].mxu0  ;;  %v2100_v53 = vpop.f32.mrb[86].mxu1  ;;  %4483 = vrcp.f32 %v2180_v13 }
 0x3ed   :  { %v4086_v4 = vmul.f32 -1.442695, %v2139_v15  ;;  %v2143_v58 = vadd.f32 %v2135_v11, %v2057_v40  ;;  %v2145_v63 = vadd.f32 %v2137_v28, %v2100_v53  ;;  %v2059_v1 = vpop.f32.mrb[87].mxu0  ;;  %v2102_v27 = vpop.f32.mrb[87].mxu1 }
 0x3ee   :  { %4485 = vtanh.f32 %v6142_v36  ;;  %v4088_v30 = vmul.f32 -1.442695, %v2140_v62  ;;  %v2144_v0 = vadd.f32 %v2136_v25, %v2059_v1  ;;  %v2146_v51 = vadd.f32 %v2138_v60, %v2102_v27  ;;  %v4480_v54 = vpop.eup %4479 }
 0x3ef   :  { %4487 = vpow2.f32 %v4086_v4  ;;  %v4087_v18 = vmul.f32 -1.442695, %v2143_v58  ;;  %v4090_v13 = vmul.f32 -1.442695, %v2142_v29 }
 0x3f0   :  { %4489 = vpow2.f32 %v4088_v30  ;;  %v4089_v61 = vmul.f32 -1.442695, %v2144_v0  ;;  %v4091_v62 = vmul.f32 -1.442695, %v2146_v51  ;;  %v7049_v0 = vld [vmem:[#allocation83_spill] sm:$0xff]  ;;  %v7051_v51 = vld [vmem:[#allocation85_spill] sm:$0xff] }
 0x3f1   :  { %4491 = vpow2.f32 %v4087_v18  ;;  %v7050_v18 = vld [vmem:[#allocation84_spill] sm:$0xff] }
 0x3f2   :  { %4493 = vpow2.f32 %v4089_v61  ;;  %v7052_v61 = vld [vmem:[#allocation86_spill] sm:$0xff] }
 0x3f3   :  { %4495 = vtanh.f32 %v2141_v42 }
 0x3f4   :  { %4497 = vpow2.f32 %v4090_v13  ;;  %v7056_v13 = vld [vmem:[#allocation90_spill] sm:$0xff] }
 0x3f5   :  { %v4482_v21 = vpop.eup %4481  ;;  %4499 = vtanh.f32 %v2145_v63 }
 0x3f6   :  { %v2193_v41 = vmul.f32 %v4482_v21, %v4480_v54  ;;  %v4484_v52 = vpop.eup %4483  ;;  %v7053_v54 = vld [vmem:[#allocation87_spill] sm:$0xff]  ;;  %v7054_v21 = vld [vmem:[#allocation88_spill] sm:$0xff] }
 0x3f8   :  { %v4184_v11 = vpack.c.bf16 %v2193_v41, %v2193_v41  ;;  %v4486_v15 = vpop.eup %4485 }
 0x3f9   :  { %v4488_v19 = vpop.eup %4487  ;;  %v2194_v59 = vmul.f32 %v4486_v15, %v4484_v52  ;;  %v7057_v52 = vld [vmem:[#allocation91_spill] sm:$0xff]  ;;  %v7059_v15 = vld [vmem:[#allocation93_spill] sm:$0xff] }
 0x3fa   :  { %2253 = vst [vmem:[#allocation12 + $0x20] sm:$0xf] %v4184_v11  ;;  %v4490_v28 = vpop.eup %4489  ;;  %v2201_v25 = vadd.f32 1.0, %v4488_v19  ;;  %v7058_v11 = vld [vmem:[#allocation92_spill] sm:$0xff]  ;;  %v7060_v19 = vld [vmem:[#allocation94_spill] sm:$0xff] }
 0x3fb   :  { %v2213_v40 = vadd.f32 1.0, %v4490_v28  ;;  %v2243_v53 = vpack.c.bf16 %v2194_v59, %v2193_v41  ;;  %v4185_v60 = vpack.c.bf16 %v2194_v59, %v2194_v59  ;;  %v4492_v4 = vpop.eup %4491  ;;  %v7055_v41 = vld [vmem:[#allocation89_spill] sm:$0xff]  ;;  %v7061_v59 = vld [vmem:[#allocation95_spill] sm:$0xff]  ;;  %v7062_v28 = vld [vmem:[#allocation96_spill] sm:$0xff] }
 0x3fc   :  { %4501 = vrcp.f32 %v2201_v25  ;;  %v2202_v58 = vadd.f32 1.0, %v4492_v4  ;;  %v4494_v29 = vpop.eup %4493  ;;  %v7063_v25 = vld [vmem:[#allocation97_spill] sm:$0xff]  ;;  %v7067_v4 = vld [vmem:[#allocation23_spill] sm:$0xff] }
 0x3fd   :  { %4503 = vrcp.f32 %v2213_v40  ;;  %2254 = vst [vmem:[#allocation12 + $0x28] sm:$0xf] %v4185_v60  ;;  %2298 = vmatmul.mubr.bf16.vlgmr.msra.gmra.mrb[88].mxu0 %v2243_v53  ;;  %2341 = vmatmul.mubr.bf16.vlgmr.msra.gmra.mrb[88].mxu1 %v2243_v53  ;;  %v2214_v42 = vadd.f32 1.0, %v4494_v29  ;;  %v4496_v63 = vpop.eup %4495  ;;  %v7065_v40 = vld [vmem:[#allocation99_spill] sm:$0xff]  ;;  %v7066_v53 = vld [vmem:[#allocation21_spill] sm:$0xff] }
 0x3fe   :  { %4505 = vpow2.f32 %v4091_v62  ;;  %2352 = vmatpush1.bf16.msra.mxu0 %v5820_v55  ;;  %2395 = vmatpush1.bf16.msra.mxu1 %v5823_v57  ;;  %v4498_v55 = vpop.eup %4497  ;;  %v7064_v62 = vld [vmem:[#allocation98_spill] sm:$0xff]  ;;  %v2447_v60 = vunpack.c.l.bf16 %v7066_v53 }
 0x3ff   :  { %4507 = vrcp.f32 %v2202_v58  ;;  %2353 = vmatprep.subr.bf16.mxu0 %v5826_v50  ;;  %2396 = vmatprep.subr.bf16.mxu1 %v5829_v35  ;;  %v4500_v57 = vpop.eup %4499  ;;  %v2227_v27 = vadd.f32 1.0, %v4498_v55  ;;  %v2449_v58 = vunpack.c.l.bf16 %v7067_v4 }
 0x400   :  { %2383 = vmatprep.mubr.bf16.mxu0 %v6955_v32  ;;  %2426 = vmatprep.mubr.bf16.mxu1 %v6955_v32  ;;  %4509 = vrcp.f32 %v2214_v42 }
 0x401   :  { %4511 = vrcp.f32 %v2227_v27 }
 0x402   :  { %2354 = vmatpush1.bf16.msra.mxu0 %v5834_v34  ;;  %2397 = vmatpush1.bf16.msra.mxu1 %v5837_v7 }
 0x403   :  { %2355 = vmatprep.subr.bf16.mxu0 %v5840_v20  ;;  %2398 = vmatprep.subr.bf16.mxu1 %v5843_v10 }
 0x406   :  { %v4502_v1 = vpop.eup %4501  ;;  %2356 = vmatpush1.bf16.msra.mxu0 %v5846_v49  ;;  %2399 = vmatpush1.bf16.msra.mxu1 %v5849_v24 }
 0x407   :  { %v4504_v50 = vpop.eup %4503  ;;  %v2235_v35 = vmul.f32 %v4502_v1, %v4496_v63  ;;  %2357 = vmatprep.subr.bf16.mxu0 %v5852_v39  ;;  %2400 = vmatprep.subr.bf16.mxu1 %v5855_v56  ;;  %v7068_v63 = vld [vmem:[#allocation22_spill] sm:$0xff] }
 0x408   :  { %v4506_v34 = vpop.eup %4505  ;;  %v2233_v7 = vmul.f32 %v4504_v50, %v6061_v43  ;;  %v7043_v43 = vld [vmem:[#allocation77_spill] sm:$0xff]  ;;  %v2448_v55 = vunpack.c.l.bf16 %v7068_v63 }
 0x409   :  { %v4508_v20 = vpop.eup %4507  ;;  %v2228_v24 = vadd.f32 1.0, %v4506_v34 }
 0x40a   :  { %v6161_v30 = vadd.f32 %v2235_v35, %v2233_v7  ;;  %v2236_v10 = vmul.f32 %v4508_v20, %v4500_v57  ;;  %2358 = vmatpush1.bf16.msra.mxu0 %v5860_v37  ;;  %2401 = vmatpush1.bf16.msra.mxu1 %v5863_v22  ;;  %v4510_v49 = vpop.eup %4509  ;;  %v7069_v57 = vld [vmem:[#allocation24_spill] sm:$0xff]  ;;  %v2451_v7 = vunpack.c.h.bf16 %v7066_v53  ;;  %v2453_v20 = vunpack.c.h.bf16 %v7067_v4 }
 0x40b   :  { %2359 = vmatprep.subr.bf16.mxu0 %v5867_v26  ;;  %2402 = vmatprep.subr.bf16.mxu1 %v5870_v31  ;;  %v2234_v39 = vmul.f32 %v4510_v49, %v6069_v5  ;;  %v4512_v37 = vpop.eup %4511  ;;  %v7044_v5 = vld [vmem:[#allocation78_spill] sm:$0xff]  ;;  %v2450_v1 = vunpack.c.l.bf16 %v7069_v57 }
 0x40c   :  { %4513 = vtanh.f32 %v6161_v30 }
 0x40d   :  { %v6169_v56 = vadd.f32 %v2236_v10, %v2234_v39  ;;  %4515 = vrcp.f32 %v2228_v24 }
 0x40e   :  { %2360 = vmatpush1.bf16.msra.mxu0 %v5875_v23  ;;  %2403 = vmatpush1.bf16.msra.mxu1 %v5878_v12 }
 0x40f   :  { %2361 = vmatprep.subr.bf16.mxu0 %v5882_v33  ;;  %2404 = vmatprep.subr.bf16.mxu1 %v5885_v6  ;;  %4517 = vtanh.f32 %v6169_v56  ;;  %v7038_v6 = vld [vmem:[#allocation72_spill] sm:$0xff] }
 0x412   :  { %2362 = vmatpush1.bf16.msra.mxu0 %v5888_v8  ;;  %2405 = vmatpush1.bf16.msra.mxu1 %v5891_v9  ;;  %v7039_v8 = vld [vmem:[#allocation73_spill] sm:$0xff]  ;;  %v7040_v9 = vld [vmem:[#allocation74_spill] sm:$0xff] }
 0x413   :  { %2363 = vmatprep.subr.bf16.mxu0 %v5894_v47  ;;  %2406 = vmatprep.subr.bf16.mxu1 %v5897_v48  ;;  %v7041_v47 = vld [vmem:[#allocation75_spill] sm:$0xff]  ;;  %v7042_v48 = vld [vmem:[#allocation76_spill] sm:$0xff] }
 0x416   :  { %v4514_v22 = vpop.eup %4513  ;;  %2364 = vmatpush1.bf16.msra.mxu0 %v5900_v2  ;;  %2407 = vmatpush1.bf16.msra.mxu1 %v5903_v17 }
 0x417   :  { %2365 = vmatprep.subr.bf16.mxu0 %v5906_v3  ;;  %2408 = vmatprep.subr.bf16.mxu1 %v5909_v44  ;;  %v2241_v26 = vmul.f32 %v4514_v22, %v4512_v37  ;;  %v4516_v31 = vpop.eup %4515  ;;  %v7035_v3 = vld [vmem:[#allocation69_spill] sm:$0xff]  ;;  %v7036_v44 = vld [vmem:[#allocation70_spill] sm:$0xff]  ;;  %v2452_v37 = vunpack.c.h.bf16 %v7068_v63  ;;  %v2454_v22 = vunpack.c.h.bf16 %v7069_v57 }
 0x419   :  { %v4186_v23 = vpack.c.bf16 %v2241_v26, %v2241_v26  ;;  %v4518_v12 = vpop.eup %4517 }
 0x41a   :  { %2366 = vmatpush1.bf16.msra.mxu0 %v5912_v38  ;;  %2409 = vmatpush1.bf16.msra.mxu1 %v6991_v45  ;;  %v2242_v33 = vmul.f32 %v4518_v12, %v4516_v31  ;;  %v7037_v38 = vld [vmem:[#allocation71_spill] sm:$0xff] }
 0x41b   :  { %2263 = vst [vmem:[#allocation12 + $0x54] sm:$0xf] %v4186_v23  ;;  %2597 = vmatprep.subr.bf16.mxu0 %v6992_v14  ;;  %2640 = vmatprep.subr.bf16.mxu1 %v6993_v16  ;;  %v7045_v45 = vld [vmem:[#allocation79_spill] sm:$0xff]  ;;  %v7046_v14 = vld [vmem:[#allocation80_spill] sm:$0xff]  ;;  %v7047_v16 = vld [vmem:[#allocation81_spill] sm:$0xff] }
 0x41c   :  { %v2244_v2 = vpack.c.bf16 %v2242_v33, %v2241_v26  ;;  %v4187_v17 = vpack.c.bf16 %v2242_v33, %v2242_v33 }
 0x41e   :  { %2264 = vst [vmem:[#allocation12 + $0x5c] sm:$0xf] %v4187_v17  ;;  %2384 = vmatmul.mubr.bf16.vlgmr.msra.gmra.mrb[92].mxu0 %v2244_v2  ;;  %2427 = vmatmul.mubr.bf16.vlgmr.msra.gmra.mrb[92].mxu1 %v2244_v2 }
 0x41f   :  { %2598 = vmatpush1.bf16.msra.mxu0 %v6994_v46  ;;  %2641 = vmatpush1.bf16.msra.mxu1 %v7035_v3  ;;  %v7048_v46 = vld [vmem:[#allocation82_spill] sm:$0xff] }
 0x420   :  { %2599 = vmatprep.subr.bf16.mxu0 %v7036_v44  ;;  %2642 = vmatprep.subr.bf16.mxu1 %v7037_v38 }
 0x421   :  { %2629 = vmatprep.mubr.bf16.mxu0 %v6955_v32  ;;  %2672 = vmatprep.mubr.bf16.mxu1 %v6955_v32 }
 0x423   :  { %2600 = vmatpush1.bf16.msra.mxu0 %v7038_v6  ;;  %2643 = vmatpush1.bf16.msra.mxu1 %v7039_v8 }
 0x424   :  { %2601 = vmatprep.subr.bf16.mxu0 %v7040_v9  ;;  %2644 = vmatprep.subr.bf16.mxu1 %v7041_v47 }
 0x427   :  { %2602 = vmatpush1.bf16.msra.mxu0 %v7042_v48  ;;  %2645 = vmatpush1.bf16.msra.mxu1 %v7043_v43 }
 0x428   :  { %2603 = vmatprep.subr.bf16.mxu0 %v7044_v5  ;;  %2646 = vmatprep.subr.bf16.mxu1 %v7045_v45 }
 0x42b   :  { %2604 = vmatpush1.bf16.msra.mxu0 %v7046_v14  ;;  %2647 = vmatpush1.bf16.msra.mxu1 %v7047_v16 }
 0x42c   :  { %2605 = vmatprep.subr.bf16.mxu0 %v7048_v46  ;;  %2648 = vmatprep.subr.bf16.mxu1 %v7049_v0 }
 0x42f   :  { %2606 = vmatpush1.bf16.msra.mxu0 %v7050_v18  ;;  %2649 = vmatpush1.bf16.msra.mxu1 %v7051_v51 }
 0x430   :  { %2607 = vmatprep.subr.bf16.mxu0 %v7052_v61  ;;  %2650 = vmatprep.subr.bf16.mxu1 %v7053_v54 }
 0x433   :  { %2608 = vmatpush1.bf16.msra.mxu0 %v7054_v21  ;;  %2651 = vmatpush1.bf16.msra.mxu1 %v7055_v41 }
 0x434   :  { %2609 = vmatprep.subr.bf16.mxu0 %v7056_v13  ;;  %2652 = vmatprep.subr.bf16.mxu1 %v7057_v52  ;;  %v7070_v13 = vld [vmem:[#allocation65_spill] sm:$0xff] }
 0x437   :  { %2610 = vmatpush1.bf16.msra.mxu0 %v7058_v11  ;;  %2653 = vmatpush1.bf16.msra.mxu1 %v7059_v15 }
 0x438   :  { %2611 = vmatprep.subr.bf16.mxu0 %v7060_v19  ;;  %2654 = vmatprep.subr.bf16.mxu1 %v7061_v59  ;;  %v7071_v59 = vld [vmem:[#allocation57_spill] sm:$0xff] }
 0x43b   :  { %2612 = vmatpush1.bf16.msra.mxu0 %v7062_v28  ;;  %2655 = vmatpush1.bf16.msra.mxu1 %v7063_v25  ;;  %v2463_v28 = vunpack.c.l.bf16 %v7071_v59 }
 0x43c   :  { %2683 = vmatprep.subr.bf16.mxu0 %v7064_v62  ;;  %2726 = vmatprep.subr.bf16.mxu1 %v7065_v40  ;;  %v7072_v40 = vld [vmem:[#allocation59_spill] sm:$0xff] }
 0x43d   :  { %v2465_v53 = vunpack.c.l.bf16 %v7072_v40 }
 0x4d0   :  { %v2299_v29 = vpop.f32.mrb[88].mxu0  ;;  %v2342_v42 = vpop.f32.mrb[88].mxu1 }
 0x4d1   :  { %v2455_v50 = vadd.f32 %v2447_v60, %v2299_v29  ;;  %v2457_v35 = vadd.f32 %v2449_v58, %v2342_v42  ;;  %v2301_v27 = vpop.f32.mrb[89].mxu0  ;;  %v2344_v34 = vpop.f32.mrb[89].mxu1  ;;  %v2467_v60 = vunpack.c.h.bf16 %v7071_v59  ;;  %v7073_v42 = vld [vmem:[#allocation58_spill] sm:$0xff]  ;;  %v6263_v59 = vld [vmem:[#allocation9 + $0x28] ss:$16 sps:$4 sm:$0xff]  }
 0x4d2   :  { %v2456_v10 = vadd.f32 %v2448_v55, %v2301_v27  ;;  %v2458_v49 = vadd.f32 %v2450_v1, %v2344_v34  ;;  %v2303_v24 = vpop.f32.mrb[90].mxu0  ;;  %v2346_v39 = vpop.f32.mrb[90].mxu1  ;;  %v2464_v63 = vunpack.c.l.bf16 %v7073_v42  ;;  %v7074_v55 = vld [vmem:[#allocation60_spill] sm:$0xff]  ;;  %v2469_v34 = vunpack.c.h.bf16 %v7072_v40 }
 0x4d3   :  { %v4096_v26 = vmul.f32 -1.442695, %v2455_v50  ;;  %v2459_v31 = vadd.f32 %v2451_v7, %v2303_v24  ;;  %v2461_v23 = vadd.f32 %v2453_v20, %v2346_v39  ;;  %v2305_v12 = vpop.f32.mrb[91].mxu0  ;;  %v2348_v33 = vpop.f32.mrb[91].mxu1  ;;  %v2466_v57 = vunpack.c.l.bf16 %v7074_v55 }
 0x4d4   :  { %v4098_v2 = vmul.f32 -1.442695, %v2456_v10  ;;  %v2460_v17 = vadd.f32 %v2452_v37, %v2305_v12  ;;  %v2462_v3 = vadd.f32 %v2454_v22, %v2348_v33  ;;  %v4100_v6 = vmul.f32 -1.442695, %v2458_v49 }
 0x4d5   :  { %4519 = vpow2.f32 %v4096_v26  ;;  %v4097_v44 = vmul.f32 -1.442695, %v2459_v31  ;;  %v2468_v7 = vunpack.c.h.bf16 %v7073_v42  ;;  %v2470_v39 = vunpack.c.h.bf16 %v7074_v55  ;;  %v6278_v55 = vld [vmem:[#allocation9 + $0x64] ss:$16 sps:$4 sm:$0xff]  }
 0x4d6   :  { %4521 = vpow2.f32 %v4098_v2  ;;  %v4099_v38 = vmul.f32 -1.442695, %v2460_v17  ;;  %v4101_v48 = vmul.f32 -1.442695, %v2462_v3 }
 0x4d7   :  { %4523 = vpow2.f32 %v4097_v44 }
 0x4d8   :  { %4525 = vpow2.f32 %v4099_v38 }
 0x4d9   :  { %4527 = vtanh.f32 %v2457_v35 }
 0x4da   :  { %4529 = vpow2.f32 %v4100_v6 }
 0x4db   :  { %4531 = vtanh.f32 %v2461_v23 }
 0x4df   :  { %v4520_v8 = vpop.eup %4519 }
 0x4e0   :  { %v4522_v9 = vpop.eup %4521  ;;  %v2485_v47 = vadd.f32 1.0, %v4520_v8 }
 0x4e1   :  { %v2497_v43 = vadd.f32 1.0, %v4522_v9  ;;  %v4524_v5 = vpop.eup %4523 }
 0x4e2   :  { %4533 = vrcp.f32 %v2485_v47  ;;  %v2486_v45 = vadd.f32 1.0, %v4524_v5  ;;  %v4526_v14 = vpop.eup %4525 }
 0x4e3   :  { %4535 = vrcp.f32 %v2497_v43  ;;  %v2498_v16 = vadd.f32 1.0, %v4526_v14  ;;  %v4528_v46 = vpop.eup %4527 }
 0x4e4   :  { %4537 = vpow2.f32 %v4101_v48  ;;  %v4530_v0 = vpop.eup %4529 }
 0x4e5   :  { %4539 = vrcp.f32 %v2486_v45  ;;  %v4532_v18 = vpop.eup %4531  ;;  %v2511_v21 = vadd.f32 1.0, %v4530_v0 }
 0x4e6   :  { %4541 = vrcp.f32 %v2498_v16 }
 0x4e7   :  { %4543 = vrcp.f32 %v2511_v21  ;;  %v6246_v21 = vld [vmem:[#allocation9] ss:$16 sps:$4 sm:$0xff]  }
 0x4ec   :  { %v4534_v51 = vpop.eup %4533 }
 0x4ed   :  { %v4536_v61 = vpop.eup %4535  ;;  %v2519_v54 = vmul.f32 %v4534_v51, %v4528_v46 }
 0x4ee   :  { %v4538_v41 = vpop.eup %4537  ;;  %v2517_v52 = vmul.f32 %v4536_v61, %v7070_v13 }
 0x4ef   :  { %v4540_v11 = vpop.eup %4539  ;;  %v2512_v62 = vadd.f32 1.0, %v4538_v41  ;;  %v6249_v41 = vld [vmem:[#allocation9 + $0x8] ss:$16 sps:$4 sm:$0xff]  }
 0x4f0   :  { %v6231_v15 = vadd.f32 %v2519_v54, %v2517_v52  ;;  %v2520_v19 = vmul.f32 %v4540_v11, %v4532_v18  ;;  %v4542_v25 = vpop.eup %4541  ;;  %v6252_v52 = vld [vmem:[#allocation9 + $0x24] ss:$16 sps:$4 sm:$0xff]   ;;  %v6255_v11 = vld [vmem:[#allocation9 + $0x2c] ss:$16 sps:$4 sm:$0xff]  }
 0x4f1   :  { %v2518_v4 = vmul.f32 %v4542_v25, %v6142_v36  ;;  %v2385_v58 = vpop.f32.mrb[92].mxu0  ;;  %v2428_v29 = vpop.f32.mrb[92].mxu1  ;;  %v6266_v25 = vld [vmem:[#allocation9 + $0x44] ss:$16 sps:$4 sm:$0xff]  }
 0x4f2   :  { %4545 = vtanh.f32 %v6231_v15  ;;  %v2471_v1 = vadd.f32 %v2463_v28, %v2385_v58  ;;  %v2473_v50 = vadd.f32 %v2465_v53, %v2428_v29  ;;  %v2387_v35 = vpop.f32.mrb[93].mxu0  ;;  %v2430_v27 = vpop.f32.mrb[93].mxu1  ;;  %v6275_v58 = vld [vmem:[#allocation9 + $0x48] ss:$16 sps:$4 sm:$0xff]  }
 0x4f3   :  { %v6242_v20 = vadd.f32 %v2520_v19, %v2518_v4  ;;  %v2472_v10 = vadd.f32 %v2464_v63, %v2387_v35  ;;  %v2474_v49 = vadd.f32 %v2466_v57, %v2430_v27  ;;  %v2389_v24 = vpop.f32.mrb[94].mxu0  ;;  %v2432_v36 = vpop.f32.mrb[94].mxu1  ;;  %4547 = vrcp.f32 %v2512_v62  ;;  %v6260_v19 = vld [vmem:[#allocation9 + $0x20] ss:$16 sps:$4 sm:$0xff]   ;;  %v6269_v62 = vld [vmem:[#allocation9 + $0x4c] ss:$16 sps:$4 sm:$0xff]  }
 0x4f4   :  { %v4102_v37 = vmul.f32 -1.442695, %v2471_v1  ;;  %v2475_v22 = vadd.f32 %v2467_v60, %v2389_v24  ;;  %v2477_v26 = vadd.f32 %v2469_v34, %v2432_v36  ;;  %v2391_v31 = vpop.f32.mrb[95].mxu0  ;;  %v2434_v23 = vpop.f32.mrb[95].mxu1  ;;  %v6272_v4 = vld [vmem:[#allocation9 + $0x40] ss:$16 sps:$4 sm:$0xff]  }
 0x4f5   :  { %4549 = vtanh.f32 %v6242_v20  ;;  %v4104_v12 = vmul.f32 -1.442695, %v2472_v10  ;;  %v2476_v33 = vadd.f32 %v2468_v7, %v2391_v31  ;;  %v2478_v17 = vadd.f32 %v2470_v39, %v2434_v23  ;;  %v4544_v44 = vpop.eup %4543  ;;  %v6281_v57 = vld [vmem:[#allocation9 + $0x6c] ss:$16 sps:$4 sm:$0xff]   ;;  %v6287_v7 = vld [vmem:[#allocation9 + $0x60] ss:$16 sps:$4 sm:$0xff]  }
 0x4f6   :  { %4551 = vpow2.f32 %v4102_v37  ;;  %v4103_v2 = vmul.f32 -1.442695, %v2475_v22  ;;  %v4106_v8 = vmul.f32 -1.442695, %v2474_v49  ;;  %v6290_v10 = vld [vmem:[#allocation9 + $0x68] ss:$16 sps:$4 sm:$0xff]  }
 0x4f7   :  { %4553 = vpow2.f32 %v4104_v12  ;;  %v4105_v3 = vmul.f32 -1.442695, %v2476_v33  ;;  %v4107_v16 = vmul.f32 -1.442695, %v2478_v17  ;;  %v6293_v36 = vld [vmem:[#allocation9 + $0x84] ss:$16 sps:$4 sm:$0xff]  }
 0x4f8   :  { %4555 = vpow2.f32 %v4103_v2  ;;  %v6303_v22 = vld [vmem:[#allocation9 + $0x80] ss:$16 sps:$4 sm:$0xff]   ;;  %v6309_v31 = vld [vmem:[#allocation9 + $0xa4] ss:$16 sps:$4 sm:$0xff]   ;;  %v6312_v23 = vld [vmem:[#allocation9 + $0xac] ss:$16 sps:$4 sm:$0xff]  }
 0x4f9   :  { %4557 = vpow2.f32 %v4105_v3  ;;  %v6319_v12 = vld [vmem:[#allocation9 + $0xa8] ss:$16 sps:$4 sm:$0xff]   ;;  %v6322_v33 = vld [vmem:[#allocation9 + $0xc4] ss:$16 sps:$4 sm:$0xff]   ;;  %v6325_v2 = vld [vmem:[#allocation9 + $0xcc] ss:$16 sps:$4 sm:$0xff]  }
 0x4fa   :  { %4559 = vtanh.f32 %v2473_v50 }
 0x4fb   :  { %4561 = vpow2.f32 %v4106_v8  ;;  %v6337_v8 = vld [vmem:[#allocation9 + $0xec] ss:$16 sps:$4 sm:$0xff]  }
 0x4fc   :  { %v4546_v38 = vpop.eup %4545  ;;  %4563 = vtanh.f32 %v2477_v26  ;;  %v6306_v26 = vld [vmem:[#allocation9 + $0x88] ss:$16 sps:$4 sm:$0xff]  }
 0x4fd   :  { %v2525_v6 = vmul.f32 %v4546_v38, %v4544_v44  ;;  %v4548_v9 = vpop.eup %4547  ;;  %v6328_v44 = vld [vmem:[#allocation9 + $0xc0] ss:$16 sps:$4 sm:$0xff]   ;;  %v6331_v38 = vld [vmem:[#allocation9 + $0xc8] ss:$16 sps:$4 sm:$0xff]  }
 0x4ff   :  { %v4188_v47 = vpack.c.bf16 %v2525_v6, %v2525_v6  ;;  %v4550_v48 = vpop.eup %4549 }
 0x500   :  { %v4552_v43 = vpop.eup %4551  ;;  %v2526_v5 = vmul.f32 %v4550_v48, %v4548_v9 }
 0x501   :  { %2585 = vst [vmem:[#allocation12 + $0x30] sm:$0xf] %v4188_v47  ;;  %v4554_v45 = vpop.eup %4553  ;;  %v2533_v14 = vadd.f32 1.0, %v4552_v43 }
 0x502   :  { %v2545_v46 = vadd.f32 1.0, %v4554_v45  ;;  %v2575_v0 = vpack.c.bf16 %v2526_v5, %v2525_v6  ;;  %v4189_v18 = vpack.c.bf16 %v2526_v5, %v2526_v5  ;;  %v4556_v51 = vpop.eup %4555  ;;  %v6334_v6 = vld [vmem:[#allocation9 + $0xe4] ss:$16 sps:$4 sm:$0xff]   ;;  %v6340_v5 = vld [vmem:[#allocation9 + $0xe0] ss:$16 sps:$4 sm:$0xff]  }
 0x503   :  { %4565 = vrcp.f32 %v2533_v14  ;;  %v2534_v61 = vadd.f32 1.0, %v4556_v51  ;;  %v4558_v54 = vpop.eup %4557  ;;  %v6343_v45 = vld [vmem:[#allocation9 + $0xe8] ss:$16 sps:$4 sm:$0xff]   ;;  %v6352_v51 = vld [vmem:[#allocation8] ss:$16 sps:$4 sm:$0xff]  }
 0x504   :  { %4567 = vrcp.f32 %v2545_v46  ;;  %2586 = vst [vmem:[#allocation12 + $0x38] sm:$0xf] %v4189_v18  ;;  %2630 = vmatmul.mubr.bf16.vlgmr.msra.gmra.mrb[96].mxu0 %v2575_v0  ;;  %2673 = vmatmul.mubr.bf16.vlgmr.msra.gmra.mrb[96].mxu1 %v2575_v0  ;;  %v2546_v13 = vadd.f32 1.0, %v4558_v54  ;;  %v4560_v28 = vpop.eup %4559  ;;  %v6349_v46 = vld [vmem:[#allocation8 + $0xc] ss:$16 sps:$4 sm:$0xff]  }
 0x505   :  { %4569 = vpow2.f32 %v4107_v16  ;;  %2684 = vmatpush1.bf16.msra.mxu0 %v6246_v21  ;;  %2727 = vmatpush1.bf16.msra.mxu1 %v6249_v41  ;;  %v4562_v40 = vpop.eup %4561  ;;  %v6346_v16 = vld [vmem:[#allocation8 + $0x4] ss:$16 sps:$4 sm:$0xff]  }
 0x506   :  { %4571 = vrcp.f32 %v2534_v61  ;;  %2685 = vmatprep.subr.bf16.mxu0 %v6252_v52  ;;  %2728 = vmatprep.subr.bf16.mxu1 %v6255_v11  ;;  %v4564_v53 = vpop.eup %4563  ;;  %v2559_v63 = vadd.f32 1.0, %v4562_v40  ;;  %v6355_v61 = vld [vmem:[#allocation8 + $0x8] ss:$16 sps:$4 sm:$0xff]   ;;  %v6358_v54 = vld [vmem:[#allocation8 + $0x24] ss:$16 sps:$4 sm:$0xff]  }
 0x507   :  { %2715 = vmatprep.mubr.bf16.mxu0 %v6955_v32  ;;  %2758 = vmatprep.mubr.bf16.mxu1 %v6955_v32  ;;  %4573 = vrcp.f32 %v2546_v13  ;;  %7075 = vst [vmem:[#allocation66_spill] sm:$0xff] %v6355_v61  ;;  %7076 = vst [vmem:[#allocation67_spill] sm:$0xff] %v6358_v54  ;;  %v6361_v13 = vld [vmem:[#allocation8 + $0x2c] ss:$16 sps:$4 sm:$0xff]   ;;  %v6369_v40 = vld [vmem:[#allocation8 + $0x28] ss:$16 sps:$4 sm:$0xff]  }
 0x508   :  { %4575 = vrcp.f32 %v2559_v63  ;;  %7077 = vst [vmem:[#allocation68_spill] sm:$0xff] %v6361_v13  ;;  %7079 = vst [vmem:[#allocation19_spill] sm:$0xff] %v6369_v40  ;;  %v6384_v63 = vld [vmem:[#allocation8 + $0x64] ss:$16 sps:$4 sm:$0xff]  }
 0x509   :  { %2686 = vmatpush1.bf16.msra.mxu0 %v6260_v19  ;;  %2729 = vmatpush1.bf16.msra.mxu1 %v6263_v59  ;;  %7084 = vst [vmem:[#allocation62_spill] sm:$0xff] %v6384_v63 }
 0x50a   :  { %2687 = vmatprep.subr.bf16.mxu0 %v6266_v25  ;;  %2730 = vmatprep.subr.bf16.mxu1 %v6269_v62 }
 0x50d   :  { %v4566_v60 = vpop.eup %4565  ;;  %2688 = vmatpush1.bf16.msra.mxu0 %v6272_v4  ;;  %2731 = vmatpush1.bf16.msra.mxu1 %v6275_v58 }
 0x50e   :  { %v4568_v29 = vpop.eup %4567  ;;  %v2567_v42 = vmul.f32 %v4566_v60, %v4560_v28  ;;  %2689 = vmatprep.subr.bf16.mxu0 %v6278_v55  ;;  %2732 = vmatprep.subr.bf16.mxu1 %v6281_v57  ;;  %v6366_v28 = vld [vmem:[#allocation8 + $0x20] ss:$16 sps:$4 sm:$0xff]   ;;  %v6375_v60 = vld [vmem:[#allocation8 + $0x4c] ss:$16 sps:$4 sm:$0xff]  }
 0x50f   :  { %v4570_v1 = vpop.eup %4569  ;;  %v2565_v50 = vmul.f32 %v4568_v29, %v6161_v30  ;;  %v6296_v30 = vld [vmem:[#allocation9 + $0x8c] ss:$16 sps:$4 sm:$0xff]   ;;  %7078 = vst [vmem:[#allocation17_spill] sm:$0xff] %v6366_v28  ;;  %7081 = vst [vmem:[#allocation20_spill] sm:$0xff] %v6375_v60  ;;  %v6378_v29 = vld [vmem:[#allocation8 + $0x40] ss:$16 sps:$4 sm:$0xff]  }
 0x510   :  { %v4572_v35 = vpop.eup %4571  ;;  %v2560_v24 = vadd.f32 1.0, %v4570_v1  ;;  %7082 = vst [vmem:[#allocation61_spill] sm:$0xff] %v6378_v29  ;;  %v6387_v1 = vld [vmem:[#allocation8 + $0x6c] ss:$16 sps:$4 sm:$0xff]  }
 0x511   :  { %v6285_v27 = vadd.f32 %v2567_v42, %v2565_v50  ;;  %v2568_v34 = vmul.f32 %v4572_v35, %v4564_v53  ;;  %2690 = vmatpush1.bf16.msra.mxu0 %v6287_v7  ;;  %2733 = vmatpush1.bf16.msra.mxu1 %v6290_v10  ;;  %v4574_v49 = vpop.eup %4573  ;;  %v6372_v53 = vld [vmem:[#allocation8 + $0x44] ss:$16 sps:$4 sm:$0xff]   ;;  %v6381_v42 = vld [vmem:[#allocation8 + $0x48] ss:$16 sps:$4 sm:$0xff]   ;;  %7085 = vst [vmem:[#allocation64_spill] sm:$0xff] %v6387_v1 }
 0x512   :  { %2691 = vmatprep.subr.bf16.mxu0 %v6293_v36  ;;  %2734 = vmatprep.subr.bf16.mxu1 %v6296_v30  ;;  %v2566_v39 = vmul.f32 %v4574_v49, %v6169_v56  ;;  %v6316_v56 = vld [vmem:[#allocation9 + $0xa0] ss:$16 sps:$4 sm:$0xff]   ;;  %v4576_v17 = vpop.eup %4575  ;;  %7080 = vst [vmem:[#allocation18_spill] sm:$0xff] %v6372_v53  ;;  %7083 = vst [vmem:[#allocation63_spill] sm:$0xff] %v6381_v42  ;;  %v6393_v35 = vld [vmem:[#allocation8 + $0x68] ss:$16 sps:$4 sm:$0xff]  }
 0x513   :  { %4577 = vtanh.f32 %v6285_v27  ;;  %v6390_v50 = vld [vmem:[#allocation8 + $0x60] ss:$16 sps:$4 sm:$0xff]   ;;  %7087 = vst [vmem:[#allocation70_spill] sm:$0xff] %v6393_v35  ;;  %v6399_v49 = vld [vmem:[#allocation8 + $0x8c] ss:$16 sps:$4 sm:$0xff]  }
 0x514   :  { %v6301_v37 = vadd.f32 %v2568_v34, %v2566_v39  ;;  %4579 = vrcp.f32 %v2560_v24  ;;  %7086 = vst [vmem:[#allocation69_spill] sm:$0xff] %v6390_v50  ;;  %v6396_v34 = vld [vmem:[#allocation8 + $0x84] ss:$16 sps:$4 sm:$0xff]   ;;  %7089 = vst [vmem:[#allocation72_spill] sm:$0xff] %v6399_v49  ;;  %v6402_v24 = vld [vmem:[#allocation8 + $0x80] ss:$16 sps:$4 sm:$0xff]  }
 0x515   :  { %2692 = vmatpush1.bf16.msra.mxu0 %v6303_v22  ;;  %2735 = vmatpush1.bf16.msra.mxu1 %v6306_v26  ;;  %7088 = vst [vmem:[#allocation71_spill] sm:$0xff] %v6396_v34  ;;  %7090 = vst [vmem:[#allocation73_spill] sm:$0xff] %v6402_v24  ;;  %v6405_v39 = vld [vmem:[#allocation8 + $0x88] ss:$16 sps:$4 sm:$0xff]  }
 0x516   :  { %2693 = vmatprep.subr.bf16.mxu0 %v6309_v31  ;;  %2736 = vmatprep.subr.bf16.mxu1 %v6312_v23  ;;  %4581 = vtanh.f32 %v6301_v37  ;;  %7091 = vst [vmem:[#allocation74_spill] sm:$0xff] %v6405_v39 }
 0x519   :  { %2694 = vmatpush1.bf16.msra.mxu0 %v6316_v56  ;;  %2737 = vmatpush1.bf16.msra.mxu1 %v6319_v12 }
 0x51a   :  { %2695 = vmatprep.subr.bf16.mxu0 %v6322_v33  ;;  %2738 = vmatprep.subr.bf16.mxu1 %v6325_v2 }
 0x51d   :  { %v4578_v3 = vpop.eup %4577  ;;  %2696 = vmatpush1.bf16.msra.mxu0 %v6328_v44  ;;  %2739 = vmatpush1.bf16.msra.mxu1 %v6331_v38 }
 0x51e   :  { %2697 = vmatprep.subr.bf16.mxu0 %v6334_v6  ;;  %2740 = vmatprep.subr.bf16.mxu1 %v6337_v8  ;;  %v2573_v9 = vmul.f32 %v4578_v3, %v4576_v17  ;;  %v4580_v47 = vpop.eup %4579  ;;  %v6408_v17 = vld [vmem:[#allocation8 + $0xa4] ss:$16 sps:$4 sm:$0xff]   ;;  %v6411_v3 = vld [vmem:[#allocation8 + $0xac] ss:$16 sps:$4 sm:$0xff]  }
 0x51f   :  { %7092 = vst [vmem:[#allocation75_spill] sm:$0xff] %v6408_v17  ;;  %7093 = vst [vmem:[#allocation76_spill] sm:$0xff] %v6411_v3 }
 0x520   :  { %v4190_v48 = vpack.c.bf16 %v2573_v9, %v2573_v9  ;;  %v4582_v43 = vpop.eup %4581 }
 0x521   :  { %2698 = vmatpush1.bf16.msra.mxu0 %v6340_v5  ;;  %2741 = vmatpush1.bf16.msra.mxu1 %v6343_v45  ;;  %v2574_v14 = vmul.f32 %v4582_v43, %v4580_v47  ;;  %v6417_v47 = vld [vmem:[#allocation8 + $0xa8] ss:$16 sps:$4 sm:$0xff]   ;;  %v6423_v43 = vld [vmem:[#allocation8 + $0xcc] ss:$16 sps:$4 sm:$0xff]  }
 0x522   :  { %2595 = vst [vmem:[#allocation12 + $0x44] sm:$0xf] %v4190_v48  ;;  %2925 = vmatprep.subr.bf16.mxu0 %v6346_v16  ;;  %2968 = vmatprep.subr.bf16.mxu1 %v6349_v46  ;;  %7095 = vst [vmem:[#allocation78_spill] sm:$0xff] %v6417_v47  ;;  %v6420_v48 = vld [vmem:[#allocation8 + $0xc4] ss:$16 sps:$4 sm:$0xff]  }
 0x523   :  { %v2576_v0 = vpack.c.bf16 %v2574_v14, %v2573_v9  ;;  %v4191_v18 = vpack.c.bf16 %v2574_v14, %v2574_v14  ;;  %v6414_v9 = vld [vmem:[#allocation8 + $0xa0] ss:$16 sps:$4 sm:$0xff]   ;;  %7096 = vst [vmem:[#allocation79_spill] sm:$0xff] %v6420_v48  ;;  %7097 = vst [vmem:[#allocation80_spill] sm:$0xff] %v6423_v43 }
 0x524   :  { %7094 = vst [vmem:[#allocation77_spill] sm:$0xff] %v6414_v9  ;;  %v6426_v14 = vld [vmem:[#allocation8 + $0xc0] ss:$16 sps:$4 sm:$0xff]  }
 0x525   :  { %2596 = vst [vmem:[#allocation12 + $0x4c] sm:$0xf] %v4191_v18  ;;  %2716 = vmatmul.mubr.bf16.vlgmr.msra.gmra.mrb[100].mxu0 %v2576_v0  ;;  %2759 = vmatmul.mubr.bf16.vlgmr.msra.gmra.mrb[100].mxu1 %v2576_v0  ;;  %7098 = vst [vmem:[#allocation81_spill] sm:$0xff] %v6426_v14  ;;  %v6429_v0 = vld [vmem:[#allocation8 + $0xc8] ss:$16 sps:$4 sm:$0xff]  }
 0x526   :  { %2926 = vmatpush1.bf16.msra.mxu0 %v6352_v51  ;;  %2969 = vmatpush1.bf16.msra.mxu1 %v6355_v61  ;;  %7099 = vst [vmem:[#allocation82_spill] sm:$0xff] %v6429_v0  ;;  %v6432_v18 = vld [vmem:[#allocation8 + $0xe4] ss:$16 sps:$4 sm:$0xff]  }
 0x527   :  { %2927 = vmatprep.subr.bf16.mxu0 %v6358_v54  ;;  %2970 = vmatprep.subr.bf16.mxu1 %v6361_v13  ;;  %7100 = vst [vmem:[#allocation83_spill] sm:$0xff] %v6432_v18 }
 0x528   :  { %2957 = vmatprep.mubr.bf16.mxu0 %v6955_v32  ;;  %3000 = vmatprep.mubr.bf16.mxu1 %v6955_v32 }
 0x52a   :  { %2928 = vmatpush1.bf16.msra.mxu0 %v6366_v28  ;;  %2971 = vmatpush1.bf16.msra.mxu1 %v6369_v40 }
 0x52b   :  { %2929 = vmatprep.subr.bf16.mxu0 %v6372_v53  ;;  %2972 = vmatprep.subr.bf16.mxu1 %v6375_v60 }
 0x52e   :  { %2930 = vmatpush1.bf16.msra.mxu0 %v6378_v29  ;;  %2973 = vmatpush1.bf16.msra.mxu1 %v6381_v42 }
 0x52f   :  { %2931 = vmatprep.subr.bf16.mxu0 %v6384_v63  ;;  %2974 = vmatprep.subr.bf16.mxu1 %v6387_v1 }
 0x532   :  { %2932 = vmatpush1.bf16.msra.mxu0 %v6390_v50  ;;  %2975 = vmatpush1.bf16.msra.mxu1 %v6393_v35 }
 0x533   :  { %2933 = vmatprep.subr.bf16.mxu0 %v6396_v34  ;;  %2976 = vmatprep.subr.bf16.mxu1 %v6399_v49  ;;  %v7109_v49 = vld [vmem:[#allocation28_spill] sm:$0xff] }
 0x534   :  { %v2780_v34 = vunpack.c.l.bf16 %v7109_v49  ;;  %v2784_v40 = vunpack.c.h.bf16 %v7109_v49 }
 0x536   :  { %2934 = vmatpush1.bf16.msra.mxu0 %v6402_v24  ;;  %2977 = vmatpush1.bf16.msra.mxu1 %v6405_v39  ;;  %v7108_v24 = vld [vmem:[#allocation26_spill] sm:$0xff] }
 0x537   :  { %2935 = vmatprep.subr.bf16.mxu0 %v6408_v17  ;;  %2978 = vmatprep.subr.bf16.mxu1 %v6411_v3  ;;  %v7107_v3 = vld [vmem:[#allocation27_spill] sm:$0xff]  ;;  %v2782_v53 = vunpack.c.h.bf16 %v7108_v24 }
 0x538   :  { %v2783_v63 = vunpack.c.h.bf16 %v7107_v3 }
 0x53a   :  { %2936 = vmatpush1.bf16.msra.mxu0 %v6414_v9  ;;  %2979 = vmatpush1.bf16.msra.mxu1 %v6417_v47  ;;  %v6435_v47 = vld [vmem:[#allocation8 + $0xec] ss:$16 sps:$4 sm:$0xff]  }
 0x53b   :  { %2937 = vmatprep.subr.bf16.mxu0 %v6420_v48  ;;  %2980 = vmatprep.subr.bf16.mxu1 %v6423_v43  ;;  %7101 = vst [vmem:[#allocation84_spill] sm:$0xff] %v6435_v47  ;;  %v6438_v48 = vld [vmem:[#allocation8 + $0xe0] ss:$16 sps:$4 sm:$0xff]   ;;  %v6441_v43 = vld [vmem:[#allocation8 + $0xe8] ss:$16 sps:$4 sm:$0xff]  }
 0x53c   :  { %7102 = vst [vmem:[#allocation85_spill] sm:$0xff] %v6438_v48  ;;  %7103 = vst [vmem:[#allocation86_spill] sm:$0xff] %v6441_v43 }
 0x53e   :  { %2938 = vmatpush1.bf16.msra.mxu0 %v6426_v14  ;;  %2981 = vmatpush1.bf16.msra.mxu1 %v6429_v0  ;;  %v6444_v14 = vld [vmem:[#allocation9 + $0x4] ss:$16 sps:$4 sm:$0xff]   ;;  %v6447_v0 = vld [vmem:[#allocation9 + $0xc] ss:$16 sps:$4 sm:$0xff]  }
 0x53f   :  { %2939 = vmatprep.subr.bf16.mxu0 %v6432_v18  ;;  %2982 = vmatprep.subr.bf16.mxu1 %v6435_v47  ;;  %7104 = vst [vmem:[#allocation87_spill] sm:$0xff] %v6444_v14  ;;  %7105 = vst [vmem:[#allocation88_spill] sm:$0xff] %v6447_v0  ;;  %v7106_v18 = vld [vmem:[#allocation25_spill] sm:$0xff]  ;;  %v2779_v47 = vunpack.c.l.bf16 %v7107_v3 }
 0x540   :  { %v2777_v9 = vunpack.c.l.bf16 %v7106_v18 }
 0x542   :  { %2940 = vmatpush1.bf16.msra.mxu0 %v6438_v48  ;;  %2983 = vmatpush1.bf16.msra.mxu1 %v6441_v43  ;;  %v2778_v48 = vunpack.c.l.bf16 %v7108_v24 }
 0x543   :  { %3011 = vmatprep.subr.bf16.mxu0 %v6444_v14  ;;  %3054 = vmatprep.subr.bf16.mxu1 %v6447_v0  ;;  %v2781_v14 = vunpack.c.h.bf16 %v7106_v18 }
 0x5d7   :  { %v2631_v17 = vpop.f32.mrb[96].mxu0  ;;  %v2674_v39 = vpop.f32.mrb[96].mxu1 }
 0x5d8   :  { %v2785_v35 = vadd.f32 %v2777_v9, %v2631_v17  ;;  %v2787_v43 = vadd.f32 %v2779_v47, %v2674_v39  ;;  %v2633_v50 = vpop.f32.mrb[97].mxu0  ;;  %v2676_v1 = vpop.f32.mrb[97].mxu1 }
 0x5d9   :  { %v2786_v42 = vadd.f32 %v2778_v48, %v2633_v50  ;;  %v2788_v0 = vadd.f32 %v2780_v34, %v2676_v1  ;;  %v2635_v29 = vpop.f32.mrb[98].mxu0  ;;  %v2678_v60 = vpop.f32.mrb[98].mxu1 }
 0x5da   :  { %v4112_v28 = vmul.f32 -1.442695, %v2785_v35  ;;  %v2789_v13 = vadd.f32 %v2781_v14, %v2635_v29  ;;  %v2791_v54 = vadd.f32 %v2783_v63, %v2678_v60  ;;  %v2637_v61 = vpop.f32.mrb[99].mxu0  ;;  %v2680_v17 = vpop.f32.mrb[99].mxu1 }
 0x5db   :  { %v4114_v39 = vmul.f32 -1.442695, %v2786_v42  ;;  %v2790_v9 = vadd.f32 %v2782_v53, %v2637_v61  ;;  %v2792_v47 = vadd.f32 %v2784_v40, %v2680_v17  ;;  %v4116_v1 = vmul.f32 -1.442695, %v2788_v0 }
 0x5dc   :  { %4583 = vpow2.f32 %v4112_v28  ;;  %v4113_v18 = vmul.f32 -1.442695, %v2789_v13 }
 0x5dd   :  { %4585 = vpow2.f32 %v4114_v39  ;;  %v4115_v3 = vmul.f32 -1.442695, %v2790_v9  ;;  %v4117_v35 = vmul.f32 -1.442695, %v2792_v47  ;;  %v7111_v9 = vld [vmem:[#allocation53_spill] sm:$0xff] }
 0x5de   :  { %4587 = vpow2.f32 %v4113_v18  ;;  %v2793_v47 = vunpack.c.l.bf16 %v7111_v9 }
 0x5df   :  { %4589 = vpow2.f32 %v4115_v3 }
 0x5e0   :  { %4591 = vtanh.f32 %v2787_v43 }
 0x5e1   :  { %4593 = vpow2.f32 %v4116_v1  ;;  %v7112_v1 = vld [vmem:[#allocation55_spill] sm:$0xff] }
 0x5e2   :  { %4595 = vtanh.f32 %v2791_v54 }
 0x5e6   :  { %v4584_v50 = vpop.eup %4583 }
 0x5e7   :  { %v4586_v34 = vpop.eup %4585  ;;  %v2815_v24 = vadd.f32 1.0, %v4584_v50  ;;  %v2795_v50 = vunpack.c.l.bf16 %v7112_v1 }
 0x5e8   :  { %v2827_v29 = vadd.f32 1.0, %v4586_v34  ;;  %v4588_v60 = vpop.eup %4587  ;;  %v2797_v34 = vunpack.c.h.bf16 %v7111_v9 }
 0x5e9   :  { %4597 = vrcp.f32 %v2815_v24  ;;  %v2816_v61 = vadd.f32 1.0, %v4588_v60  ;;  %v4590_v40 = vpop.eup %4589 }
 0x5ea   :  { %4599 = vrcp.f32 %v2827_v29  ;;  %v2828_v13 = vadd.f32 1.0, %v4590_v40  ;;  %v4592_v28 = vpop.eup %4591 }
 0x5eb   :  { %4601 = vpow2.f32 %v4117_v35  ;;  %v4594_v53 = vpop.eup %4593 }
 0x5ec   :  { %4603 = vrcp.f32 %v2816_v61  ;;  %v4596_v42 = vpop.eup %4595  ;;  %v2841_v43 = vadd.f32 1.0, %v4594_v53  ;;  %v7114_v61 = vld [vmem:[#allocation56_spill] sm:$0xff] }
 0x5ed   :  { %4605 = vrcp.f32 %v2828_v13  ;;  %v2796_v40 = vunpack.c.l.bf16 %v7114_v61 }
 0x5ee   :  { %4607 = vrcp.f32 %v2841_v43 }
 0x5f3   :  { %v4598_v63 = vpop.eup %4597 }
 0x5f4   :  { %v4600_v49 = vpop.eup %4599  ;;  %v2849_v48 = vmul.f32 %v4598_v63, %v4592_v28  ;;  %v2799_v63 = vunpack.c.h.bf16 %v7112_v1 }
 0x5f5   :  { %v4602_v14 = vpop.eup %4601  ;;  %v2847_v0 = vmul.f32 %v4600_v49, %v6231_v15  ;;  %v7113_v15 = vld [vmem:[#allocation54_spill] sm:$0xff] }
 0x5f6   :  { %v4604_v54 = vpop.eup %4603  ;;  %v2842_v3 = vadd.f32 1.0, %v4602_v14  ;;  %v2794_v60 = vunpack.c.l.bf16 %v7113_v15  ;;  %v2798_v49 = vunpack.c.h.bf16 %v7113_v15 }
 0x5f7   :  { %v6459_v17 = vadd.f32 %v2849_v48, %v2847_v0  ;;  %v2850_v39 = vmul.f32 %v4604_v54, %v4596_v42  ;;  %v4606_v18 = vpop.eup %4605  ;;  %v2800_v54 = vunpack.c.h.bf16 %v7114_v61 }
 0x5f8   :  { %v2848_v24 = vmul.f32 %v4606_v18, %v6242_v20  ;;  %v2717_v35 = vpop.f32.mrb[100].mxu0  ;;  %v2760_v29 = vpop.f32.mrb[100].mxu1 }
 0x5f9   :  { %7110 = vst [vmem:[#allocation89_spill] sm:$0xff] %v6459_v17  ;;  %4609 = vtanh.f32 %v6459_v17  ;;  %v2801_v13 = vadd.f32 %v2793_v47, %v2717_v35  ;;  %v2803_v28 = vadd.f32 %v2795_v50, %v2760_v29  ;;  %v2719_v53 = vpop.f32.mrb[101].mxu0  ;;  %v2762_v42 = vpop.f32.mrb[101].mxu1 }
 0x5fa   :  { %v6470_v48 = vadd.f32 %v2850_v39, %v2848_v24  ;;  %v2802_v43 = vadd.f32 %v2794_v60, %v2719_v53  ;;  %v2804_v14 = vadd.f32 %v2796_v40, %v2762_v42  ;;  %v2721_v0 = vpop.f32.mrb[102].mxu0  ;;  %v2764_v20 = vpop.f32.mrb[102].mxu1  ;;  %4611 = vrcp.f32 %v2842_v3 }
 0x5fb   :  { %v4118_v9 = vmul.f32 -1.442695, %v2801_v13  ;;  %v2805_v18 = vadd.f32 %v2797_v34, %v2721_v0  ;;  %v2807_v17 = vadd.f32 %v2799_v63, %v2764_v20  ;;  %v2723_v47 = vpop.f32.mrb[103].mxu0  ;;  %v2766_v50 = vpop.f32.mrb[103].mxu1 }
 0x5fc   :  { %4613 = vtanh.f32 %v6470_v48  ;;  %v4120_v35 = vmul.f32 -1.442695, %v2802_v43  ;;  %v2806_v1 = vadd.f32 %v2798_v49, %v2723_v47  ;;  %v2808_v39 = vadd.f32 %v2800_v54, %v2766_v50  ;;  %v4608_v15 = vpop.eup %4607 }
 0x5fd   :  { %4615 = vpow2.f32 %v4118_v9  ;;  %v4119_v29 = vmul.f32 -1.442695, %v2805_v18  ;;  %v4122_v3 = vmul.f32 -1.442695, %v2804_v14 }
 0x5fe   :  { %4617 = vpow2.f32 %v4120_v35  ;;  %v4121_v24 = vmul.f32 -1.442695, %v2806_v1  ;;  %v4123_v43 = vmul.f32 -1.442695, %v2808_v39 }
 0x5ff   :  { %4619 = vpow2.f32 %v4119_v29 }
 0x600   :  { %4621 = vpow2.f32 %v4121_v24 }
 0x601   :  { %4623 = vtanh.f32 %v2803_v28 }
 0x602   :  { %4625 = vpow2.f32 %v4122_v3 }
 0x603   :  { %v4610_v60 = vpop.eup %4609  ;;  %4627 = vtanh.f32 %v2807_v17 }
 0x604   :  { %v2855_v61 = vmul.f32 %v4610_v60, %v4608_v15  ;;  %v4612_v40 = vpop.eup %4611 }
 0x606   :  { %v4192_v34 = vpack.c.bf16 %v2855_v61, %v2855_v61  ;;  %v4614_v13 = vpop.eup %4613 }
 0x607   :  { %v4616_v53 = vpop.eup %4615  ;;  %v2856_v42 = vmul.f32 %v4614_v13, %v4612_v40 }
 0x608   :  { %2914 = vst [vmem:[#allocation12 + $0x40] sm:$0xf] %v4192_v34  ;;  %v4618_v63 = vpop.eup %4617  ;;  %v2863_v49 = vadd.f32 1.0, %v4616_v53 }
 0x609   :  { %v2875_v0 = vadd.f32 1.0, %v4618_v63  ;;  %v2905_v20 = vpack.c.bf16 %v2856_v42, %v2855_v61  ;;  %v4193_v54 = vpack.c.bf16 %v2856_v42, %v2856_v42  ;;  %v4620_v9 = vpop.eup %4619 }
 0x60a   :  { %4629 = vrcp.f32 %v2863_v49  ;;  %v2864_v18 = vadd.f32 1.0, %v4620_v9  ;;  %v4622_v14 = vpop.eup %4621  ;;  %v7115_v9 = vld [vmem:[#allocation66_spill] sm:$0xff] }
 0x60b   :  { %4631 = vrcp.f32 %v2875_v0  ;;  %2915 = vst [vmem:[#allocation12 + $0x48] sm:$0xf] %v4193_v54  ;;  %2958 = vmatmul.mubr.bf16.vlgmr.msra.gmra.mrb[104].mxu0 %v2905_v20  ;;  %3001 = vmatmul.mubr.bf16.vlgmr.msra.gmra.mrb[104].mxu1 %v2905_v20  ;;  %v2876_v28 = vadd.f32 1.0, %v4622_v14  ;;  %v4624_v17 = vpop.eup %4623  ;;  %v7117_v14 = vld [vmem:[#allocation68_spill] sm:$0xff] }
 0x60c   :  { %4633 = vpow2.f32 %v4123_v43  ;;  %3012 = vmatpush1.bf16.msra.mxu0 %v6246_v21  ;;  %3055 = vmatpush1.bf16.msra.mxu1 %v6249_v41  ;;  %v4626_v47 = vpop.eup %4625 }
 0x60d   :  { %4635 = vrcp.f32 %v2864_v18  ;;  %3013 = vmatprep.subr.bf16.mxu0 %v6252_v52  ;;  %3056 = vmatprep.subr.bf16.mxu1 %v6255_v11  ;;  %v4628_v50 = vpop.eup %4627  ;;  %v2889_v39 = vadd.f32 1.0, %v4626_v47  ;;  %v7116_v18 = vld [vmem:[#allocation67_spill] sm:$0xff]  ;;  %v7120_v47 = vld [vmem:[#allocation18_spill] sm:$0xff] }
 0x60e   :  { %3043 = vmatprep.mubr.bf16.mxu0 %v6955_v32  ;;  %3086 = vmatprep.mubr.bf16.mxu1 %v6955_v32  ;;  %4637 = vrcp.f32 %v2876_v28  ;;  %v7118_v28 = vld [vmem:[#allocation17_spill] sm:$0xff] }
 0x60f   :  { %4639 = vrcp.f32 %v2889_v39  ;;  %v7125_v39 = vld [vmem:[#allocation64_spill] sm:$0xff] }
 0x610   :  { %3014 = vmatpush1.bf16.msra.mxu0 %v6260_v19  ;;  %3057 = vmatpush1.bf16.msra.mxu1 %v6263_v59 }
 0x611   :  { %3015 = vmatprep.subr.bf16.mxu0 %v6266_v25  ;;  %3058 = vmatprep.subr.bf16.mxu1 %v6269_v62 }
 0x614   :  { %v4630_v35 = vpop.eup %4629  ;;  %3016 = vmatpush1.bf16.msra.mxu0 %v6272_v4  ;;  %3059 = vmatpush1.bf16.msra.mxu1 %v6275_v58 }
 0x615   :  { %v4632_v1 = vpop.eup %4631  ;;  %v2897_v29 = vmul.f32 %v4630_v35, %v4624_v17  ;;  %3017 = vmatprep.subr.bf16.mxu0 %v6278_v55  ;;  %3060 = vmatprep.subr.bf16.mxu1 %v6281_v57  ;;  %v7119_v17 = vld [vmem:[#allocation19_spill] sm:$0xff]  ;;  %v7122_v35 = vld [vmem:[#allocation61_spill] sm:$0xff] }
 0x616   :  { %v4634_v24 = vpop.eup %4633  ;;  %v2895_v15 = vmul.f32 %v4632_v1, %v6285_v27  ;;  %v7123_v1 = vld [vmem:[#allocation63_spill] sm:$0xff] }
 0x617   :  { %v4636_v60 = vpop.eup %4635  ;;  %v2890_v34 = vadd.f32 1.0, %v4634_v24  ;;  %v7126_v24 = vld [vmem:[#allocation69_spill] sm:$0xff] }
 0x618   :  { %v6489_v61 = vadd.f32 %v2897_v29, %v2895_v15  ;;  %v2898_v3 = vmul.f32 %v4636_v60, %v4628_v50  ;;  %3018 = vmatpush1.bf16.msra.mxu0 %v6287_v7  ;;  %3061 = vmatpush1.bf16.msra.mxu1 %v6290_v10  ;;  %v4638_v40 = vpop.eup %4637  ;;  %v7121_v50 = vld [vmem:[#allocation20_spill] sm:$0xff]  ;;  %v7124_v29 = vld [vmem:[#allocation62_spill] sm:$0xff]  ;;  %v7128_v60 = vld [vmem:[#allocation71_spill] sm:$0xff] }
 0x619   :  { %3019 = vmatprep.subr.bf16.mxu0 %v6293_v36  ;;  %3062 = vmatprep.subr.bf16.mxu1 %v6296_v30  ;;  %v2896_v13 = vmul.f32 %v4638_v40, %v6301_v37  ;;  %v4640_v37 = vpop.eup %4639  ;;  %v7127_v15 = vld [vmem:[#allocation70_spill] sm:$0xff]  ;;  %v7130_v40 = vld [vmem:[#allocation73_spill] sm:$0xff] }
 0x61a   :  { %4641 = vtanh.f32 %v6489_v61 }
 0x61b   :  { %v6497_v27 = vadd.f32 %v2898_v3, %v2896_v13  ;;  %4643 = vrcp.f32 %v2890_v34  ;;  %v7129_v3 = vld [vmem:[#allocation72_spill] sm:$0xff]  ;;  %v7131_v34 = vld [vmem:[#allocation74_spill] sm:$0xff]  ;;  %v7132_v13 = vld [vmem:[#allocation75_spill] sm:$0xff] }
 0x61c   :  { %3020 = vmatpush1.bf16.msra.mxu0 %v6303_v22  ;;  %3063 = vmatpush1.bf16.msra.mxu1 %v6306_v26 }
 0x61d   :  { %3021 = vmatprep.subr.bf16.mxu0 %v6309_v31  ;;  %3064 = vmatprep.subr.bf16.mxu1 %v6312_v23  ;;  %4645 = vtanh.f32 %v6497_v27 }
 0x620   :  { %3022 = vmatpush1.bf16.msra.mxu0 %v6316_v56  ;;  %3065 = vmatpush1.bf16.msra.mxu1 %v6319_v12 }
 0x621   :  { %3023 = vmatprep.subr.bf16.mxu0 %v6322_v33  ;;  %3066 = vmatprep.subr.bf16.mxu1 %v6325_v2 }
 0x624   :  { %v4642_v53 = vpop.eup %4641  ;;  %3024 = vmatpush1.bf16.msra.mxu0 %v6328_v44  ;;  %3067 = vmatpush1.bf16.msra.mxu1 %v6331_v38 }
 0x625   :  { %3025 = vmatprep.subr.bf16.mxu0 %v6334_v6  ;;  %3068 = vmatprep.subr.bf16.mxu1 %v6337_v8  ;;  %v2903_v42 = vmul.f32 %v4642_v53, %v4640_v37  ;;  %v4644_v63 = vpop.eup %4643  ;;  %v7133_v37 = vld [vmem:[#allocation76_spill] sm:$0xff]  ;;  %v7134_v53 = vld [vmem:[#allocation77_spill] sm:$0xff] }
 0x627   :  { %v4194_v49 = vpack.c.bf16 %v2903_v42, %v2903_v42  ;;  %v4646_v43 = vpop.eup %4645 }
 0x628   :  { %3026 = vmatpush1.bf16.msra.mxu0 %v6340_v5  ;;  %3069 = vmatpush1.bf16.msra.mxu1 %v6343_v45  ;;  %v2904_v0 = vmul.f32 %v4646_v43, %v4644_v63  ;;  %v7136_v63 = vld [vmem:[#allocation79_spill] sm:$0xff]  ;;  %v7138_v43 = vld [vmem:[#allocation81_spill] sm:$0xff] }
 0x629   :  { %2923 = vst [vmem:[#allocation12 + $0x34] sm:$0xf] %v4194_v49  ;;  %3253 = vmatprep.subr.bf16.mxu0 %v6346_v16  ;;  %3296 = vmatprep.subr.bf16.mxu1 %v6349_v46  ;;  %v7137_v49 = vld [vmem:[#allocation80_spill] sm:$0xff] }
 0x62a   :  { %v2906_v20 = vpack.c.bf16 %v2904_v0, %v2903_v42  ;;  %v4195_v54 = vpack.c.bf16 %v2904_v0, %v2904_v0  ;;  %v7135_v42 = vld [vmem:[#allocation78_spill] sm:$0xff] }
 0x62b   :  { %v7139_v0 = vld [vmem:[#allocation82_spill] sm:$0xff] }
 0x62c   :  { %2924 = vst [vmem:[#allocation12 + $0x3c] sm:$0xf] %v4195_v54  ;;  %3044 = vmatmul.mubr.bf16.vlgmr.msra.gmra.mrb[108].mxu0 %v2906_v20  ;;  %3087 = vmatmul.mubr.bf16.vlgmr.msra.gmra.mrb[108].mxu1 %v2906_v20  ;;  %v7140_v20 = vld [vmem:[#allocation83_spill] sm:$0xff]  ;;  %v7141_v54 = vld [vmem:[#allocation84_spill] sm:$0xff] }
 0x62d   :  { %3254 = vmatpush1.bf16.msra.mxu0 %v6352_v51  ;;  %3297 = vmatpush1.bf16.msra.mxu1 %v7115_v9 }
 0x62e   :  { %3255 = vmatprep.subr.bf16.mxu0 %v7116_v18  ;;  %3298 = vmatprep.subr.bf16.mxu1 %v7117_v14 }
 0x62f   :  { %3285 = vmatprep.mubr.bf16.mxu0 %v6955_v32  ;;  %3328 = vmatprep.mubr.bf16.mxu1 %v6955_v32 }
 0x631   :  { %3256 = vmatpush1.bf16.msra.mxu0 %v7118_v28  ;;  %3299 = vmatpush1.bf16.msra.mxu1 %v7119_v17 }
 0x632   :  { %3257 = vmatprep.subr.bf16.mxu0 %v7120_v47  ;;  %3300 = vmatprep.subr.bf16.mxu1 %v7121_v50 }
 0x635   :  { %3258 = vmatpush1.bf16.msra.mxu0 %v7122_v35  ;;  %3301 = vmatpush1.bf16.msra.mxu1 %v7123_v1 }
 0x636   :  { %3259 = vmatprep.subr.bf16.mxu0 %v7124_v29  ;;  %3302 = vmatprep.subr.bf16.mxu1 %v7125_v39 }
 0x639   :  { %3260 = vmatpush1.bf16.msra.mxu0 %v7126_v24  ;;  %3303 = vmatpush1.bf16.msra.mxu1 %v7127_v15  ;;  %v7149_v15 = vld [vmem:[#allocation32_spill] sm:$0xff] }
 0x63a   :  { %3261 = vmatprep.subr.bf16.mxu0 %v7128_v60  ;;  %3304 = vmatprep.subr.bf16.mxu1 %v7129_v3  ;;  %v7148_v60 = vld [vmem:[#allocation30_spill] sm:$0xff]  ;;  %v3112_v47 = vunpack.c.h.bf16 %v7149_v15 }
 0x63b   :  { %v3110_v50 = vunpack.c.h.bf16 %v7148_v60 }
 0x63d   :  { %3262 = vmatpush1.bf16.msra.mxu0 %v7130_v40  ;;  %3305 = vmatpush1.bf16.msra.mxu1 %v7131_v34  ;;  %v7142_v34 = vld [vmem:[#allocation85_spill] sm:$0xff]  ;;  %v7147_v40 = vld [vmem:[#allocation31_spill] sm:$0xff] }
 0x63e   :  { %3263 = vmatprep.subr.bf16.mxu0 %v7132_v13  ;;  %3306 = vmatprep.subr.bf16.mxu1 %v7133_v37  ;;  %v7143_v13 = vld [vmem:[#allocation86_spill] sm:$0xff]  ;;  %v7144_v37 = vld [vmem:[#allocation87_spill] sm:$0xff] }
 0x641   :  { %3264 = vmatpush1.bf16.msra.mxu0 %v7134_v53  ;;  %3307 = vmatpush1.bf16.msra.mxu1 %v7135_v42  ;;  %v7145_v53 = vld [vmem:[#allocation88_spill] sm:$0xff]  ;;  %v7146_v42 = vld [vmem:[#allocation29_spill] sm:$0xff] }
 0x642   :  { %3265 = vmatprep.subr.bf16.mxu0 %v7136_v63  ;;  %3308 = vmatprep.subr.bf16.mxu1 %v7137_v49  ;;  %v3105_v63 = vunpack.c.l.bf16 %v7146_v42  ;;  %v3107_v49 = vunpack.c.l.bf16 %v7147_v40 }
 0x645   :  { %3266 = vmatpush1.bf16.msra.mxu0 %v7138_v43  ;;  %3309 = vmatpush1.bf16.msra.mxu1 %v7139_v0  ;;  %v3106_v0 = vunpack.c.l.bf16 %v7148_v60 }
 0x646   :  { %3267 = vmatprep.subr.bf16.mxu0 %v7140_v20  ;;  %3310 = vmatprep.subr.bf16.mxu1 %v7141_v54  ;;  %v3108_v20 = vunpack.c.l.bf16 %v7149_v15 }
 0x649   :  { %3268 = vmatpush1.bf16.msra.mxu0 %v7142_v34  ;;  %3311 = vmatpush1.bf16.msra.mxu1 %v7143_v13  ;;  %v3109_v13 = vunpack.c.h.bf16 %v7146_v42 }
 0x64a   :  { %3339 = vmatprep.subr.bf16.mxu0 %v7144_v37  ;;  %3382 = vmatprep.subr.bf16.mxu1 %v7145_v53  ;;  %v3111_v37 = vunpack.c.h.bf16 %v7147_v40 }
 0x6de   :  { %v2959_v3 = vpop.f32.mrb[104].mxu0  ;;  %v3002_v43 = vpop.f32.mrb[104].mxu1 }
 0x6df   :  { %v3113_v24 = vadd.f32 %v3105_v63, %v2959_v3  ;;  %v3115_v54 = vadd.f32 %v3107_v49, %v3002_v43  ;;  %v2961_v39 = vpop.f32.mrb[105].mxu0  ;;  %v3004_v34 = vpop.f32.mrb[105].mxu1 }
 0x6e0   :  { %v3114_v29 = vadd.f32 %v3106_v0, %v2961_v39  ;;  %v3116_v53 = vadd.f32 %v3108_v20, %v3004_v34  ;;  %v2963_v1 = vpop.f32.mrb[106].mxu0  ;;  %v3006_v35 = vpop.f32.mrb[106].mxu1 }
 0x6e1   :  { %v4128_v17 = vmul.f32 -1.442695, %v3113_v24  ;;  %v3117_v28 = vadd.f32 %v3109_v13, %v2963_v1  ;;  %v3119_v14 = vadd.f32 %v3111_v37, %v3006_v35  ;;  %v2965_v18 = vpop.f32.mrb[107].mxu0  ;;  %v3008_v3 = vpop.f32.mrb[107].mxu1 }
 0x6e2   :  { %v4130_v63 = vmul.f32 -1.442695, %v3114_v29  ;;  %v3118_v49 = vadd.f32 %v3110_v50, %v2965_v18  ;;  %v3120_v43 = vadd.f32 %v3112_v47, %v3008_v3  ;;  %v4132_v39 = vmul.f32 -1.442695, %v3116_v53 }
 0x6e3   :  { %4647 = vpow2.f32 %v4128_v17  ;;  %v4129_v42 = vmul.f32 -1.442695, %v3117_v28 }
 0x6e4   :  { %4649 = vpow2.f32 %v4130_v63  ;;  %v4131_v40 = vmul.f32 -1.442695, %v3118_v49  ;;  %v4133_v24 = vmul.f32 -1.442695, %v3120_v43  ;;  %v7152_v43 = vld [vmem:[#allocation49_spill] sm:$0xff] }
 0x6e5   :  { %4651 = vpow2.f32 %v4129_v42  ;;  %v3121_v42 = vunpack.c.l.bf16 %v7152_v43 }
 0x6e6   :  { %4653 = vpow2.f32 %v4131_v40 }
 0x6e7   :  { %4655 = vtanh.f32 %v3115_v54  ;;  %v7150_v54 = vld [vmem:[#allocation89_spill] sm:$0xff] }
 0x6e8   :  { %4657 = vpow2.f32 %v4132_v39 }
 0x6e9   :  { %4659 = vtanh.f32 %v3119_v14 }
 0x6ed   :  { %v4648_v34 = vpop.eup %4647 }
 0x6ee   :  { %v4650_v60 = vpop.eup %4649  ;;  %v3143_v0 = vadd.f32 1.0, %v4648_v34  ;;  %v7153_v34 = vld [vmem:[#allocation51_spill] sm:$0xff] }
 0x6ef   :  { %v3155_v1 = vadd.f32 1.0, %v4650_v60  ;;  %v4652_v35 = vpop.eup %4651  ;;  %v3123_v60 = vunpack.c.l.bf16 %v7153_v34 }
 0x6f0   :  { %4661 = vrcp.f32 %v3143_v0  ;;  %v3144_v18 = vadd.f32 1.0, %v4652_v35  ;;  %v4654_v47 = vpop.eup %4653  ;;  %v3125_v0 = vunpack.c.h.bf16 %v7152_v43 }
 0x6f1   :  { %4663 = vrcp.f32 %v3155_v1  ;;  %v3156_v28 = vadd.f32 1.0, %v4654_v47  ;;  %v4656_v17 = vpop.eup %4655 }
 0x6f2   :  { %4665 = vpow2.f32 %v4133_v24  ;;  %v4658_v50 = vpop.eup %4657 }
 0x6f3   :  { %4667 = vrcp.f32 %v3144_v18  ;;  %v4660_v29 = vpop.eup %4659  ;;  %v3169_v53 = vadd.f32 1.0, %v4658_v50  ;;  %v7154_v18 = vld [vmem:[#allocation50_spill] sm:$0xff] }
 0x6f4   :  { %4669 = vrcp.f32 %v3156_v28  ;;  %v3122_v47 = vunpack.c.l.bf16 %v7154_v18  ;;  %v7155_v28 = vld [vmem:[#allocation52_spill] sm:$0xff] }
 0x6f5   :  { %4671 = vrcp.f32 %v3169_v53  ;;  %v3126_v53 = vunpack.c.h.bf16 %v7154_v18  ;;  %v3128_v43 = vunpack.c.h.bf16 %v7155_v28 }
 0x6fa   :  { %v4662_v15 = vpop.eup %4661 }
 0x6fb   :  { %v4664_v13 = vpop.eup %4663  ;;  %v3177_v37 = vmul.f32 %v4662_v15, %v4656_v17  ;;  %v3124_v17 = vunpack.c.l.bf16 %v7155_v28 }
 0x6fc   :  { %v4666_v20 = vpop.eup %4665  ;;  %v3175_v3 = vmul.f32 %v4664_v13, %v7150_v54 }
 0x6fd   :  { %v4668_v14 = vpop.eup %4667  ;;  %v3170_v39 = vadd.f32 1.0, %v4666_v20 }
 0x6fe   :  { %v6559_v63 = vadd.f32 %v3177_v37, %v3175_v3  ;;  %v3178_v49 = vmul.f32 %v4668_v14, %v4660_v29  ;;  %v4670_v40 = vpop.eup %4669  ;;  %v3127_v37 = vunpack.c.h.bf16 %v7153_v34 }
 0x6ff   :  { %v3176_v24 = vmul.f32 %v4670_v40, %v6470_v48  ;;  %v3045_v1 = vpop.f32.mrb[108].mxu0  ;;  %v3088_v35 = vpop.f32.mrb[108].mxu1 }
 0x700   :  { %7151 = vst [vmem:[#allocation90_spill] sm:$0xff] %v6559_v63  ;;  %4673 = vtanh.f32 %v6559_v63  ;;  %v3129_v50 = vadd.f32 %v3121_v42, %v3045_v1  ;;  %v3131_v29 = vadd.f32 %v3123_v60, %v3088_v35  ;;  %v3047_v15 = vpop.f32.mrb[109].mxu0  ;;  %v3090_v13 = vpop.f32.mrb[109].mxu1 }
 0x701   :  { %v6570_v20 = vadd.f32 %v3178_v49, %v3176_v24  ;;  %v3130_v54 = vadd.f32 %v3122_v47, %v3047_v15  ;;  %v3132_v3 = vadd.f32 %v3124_v17, %v3090_v13  ;;  %v3049_v14 = vpop.f32.mrb[110].mxu0  ;;  %v3092_v48 = vpop.f32.mrb[110].mxu1  ;;  %4675 = vrcp.f32 %v3170_v39 }
 0x702   :  { %v4134_v40 = vmul.f32 -1.442695, %v3129_v50  ;;  %v3133_v63 = vadd.f32 %v3125_v0, %v3049_v14  ;;  %v3135_v9 = vadd.f32 %v3127_v37, %v3092_v48  ;;  %v3051_v42 = vpop.f32.mrb[111].mxu0  ;;  %v3094_v60 = vpop.f32.mrb[111].mxu1 }
 0x703   :  { %4677 = vtanh.f32 %v6570_v20  ;;  %v4136_v1 = vmul.f32 -1.442695, %v3130_v54  ;;  %v3134_v34 = vadd.f32 %v3126_v53, %v3051_v42  ;;  %v3136_v49 = vadd.f32 %v3128_v43, %v3094_v60  ;;  %v4672_v18 = vpop.eup %4671 }
 0x704   :  { %4679 = vpow2.f32 %v4134_v40  ;;  %v4135_v35 = vmul.f32 -1.442695, %v3133_v63  ;;  %v4138_v39 = vmul.f32 -1.442695, %v3132_v3 }
 0x705   :  { %4681 = vpow2.f32 %v4136_v1  ;;  %v4137_v24 = vmul.f32 -1.442695, %v3134_v34  ;;  %v4139_v63 = vmul.f32 -1.442695, %v3136_v49  ;;  %v7170_v34 = vld [vmem:[#allocation72_spill] sm:$0xff]  ;;  %v7172_v49 = vld [vmem:[#allocation74_spill] sm:$0xff] }
 0x706   :  { %4683 = vpow2.f32 %v4135_v35  ;;  %v7171_v35 = vld [vmem:[#allocation73_spill] sm:$0xff] }
 0x707   :  { %4685 = vpow2.f32 %v4137_v24  ;;  %v7173_v24 = vld [vmem:[#allocation75_spill] sm:$0xff] }
 0x708   :  { %4687 = vtanh.f32 %v3131_v29 }
 0x709   :  { %4689 = vpow2.f32 %v4138_v39  ;;  %v7177_v39 = vld [vmem:[#allocation79_spill] sm:$0xff] }
 0x70a   :  { %v4674_v47 = vpop.eup %4673  ;;  %4691 = vtanh.f32 %v3135_v9 }
 0x70b   :  { %v3183_v28 = vmul.f32 %v4674_v47, %v4672_v18  ;;  %v4676_v17 = vpop.eup %4675  ;;  %v7174_v18 = vld [vmem:[#allocation76_spill] sm:$0xff]  ;;  %v7175_v47 = vld [vmem:[#allocation77_spill] sm:$0xff] }
 0x70d   :  { %v4196_v0 = vpack.c.bf16 %v3183_v28, %v3183_v28  ;;  %v4678_v50 = vpop.eup %4677 }
 0x70e   :  { %v4680_v15 = vpop.eup %4679  ;;  %v3184_v13 = vmul.f32 %v4678_v50, %v4676_v17  ;;  %v7178_v17 = vld [vmem:[#allocation80_spill] sm:$0xff]  ;;  %v7180_v50 = vld [vmem:[#allocation82_spill] sm:$0xff] }
 0x70f   :  { %3242 = vst [vmem:[#allocation12 + $0x50] sm:$0xf] %v4196_v0  ;;  %v4682_v37 = vpop.eup %4681  ;;  %v3191_v53 = vadd.f32 1.0, %v4680_v15  ;;  %v7179_v0 = vld [vmem:[#allocation81_spill] sm:$0xff]  ;;  %v7181_v15 = vld [vmem:[#allocation83_spill] sm:$0xff] }
 0x710   :  { %v3203_v54 = vadd.f32 1.0, %v4682_v37  ;;  %v3233_v14 = vpack.c.bf16 %v3184_v13, %v3183_v28  ;;  %v4197_v48 = vpack.c.bf16 %v3184_v13, %v3184_v13  ;;  %v4684_v43 = vpop.eup %4683  ;;  %v7176_v28 = vld [vmem:[#allocation78_spill] sm:$0xff]  ;;  %v7182_v13 = vld [vmem:[#allocation84_spill] sm:$0xff]  ;;  %v7183_v37 = vld [vmem:[#allocation85_spill] sm:$0xff] }
 0x711   :  { %4693 = vrcp.f32 %v3191_v53  ;;  %v3192_v40 = vadd.f32 1.0, %v4684_v43  ;;  %v4686_v3 = vpop.eup %4685  ;;  %v7184_v53 = vld [vmem:[#allocation86_spill] sm:$0xff]  ;;  %v7188_v43 = vld [vmem:[#allocation35_spill] sm:$0xff] }
 0x712   :  { %4695 = vrcp.f32 %v3203_v54  ;;  %3243 = vst [vmem:[#allocation12 + $0x58] sm:$0xf] %v4197_v48  ;;  %3286 = vmatmul.mubr.bf16.vlgmr.msra.gmra.mrb[112].mxu0 %v3233_v14  ;;  %3329 = vmatmul.mubr.bf16.vlgmr.msra.gmra.mrb[112].mxu1 %v3233_v14  ;;  %v3204_v29 = vadd.f32 1.0, %v4686_v3  ;;  %v4688_v9 = vpop.eup %4687  ;;  %v7186_v54 = vld [vmem:[#allocation88_spill] sm:$0xff]  ;;  %v7187_v14 = vld [vmem:[#allocation33_spill] sm:$0xff] }
 0x713   :  { %4697 = vpow2.f32 %v4139_v63  ;;  %3340 = vmatpush1.bf16.msra.mxu0 %v6246_v21  ;;  %3383 = vmatpush1.bf16.msra.mxu1 %v6249_v41  ;;  %v4690_v21 = vpop.eup %4689  ;;  %v7185_v63 = vld [vmem:[#allocation87_spill] sm:$0xff]  ;;  %v3433_v48 = vunpack.c.l.bf16 %v7187_v14 }
 0x714   :  { %4699 = vrcp.f32 %v3192_v40  ;;  %3341 = vmatprep.subr.bf16.mxu0 %v6252_v52  ;;  %3384 = vmatprep.subr.bf16.mxu1 %v6255_v11  ;;  %v4692_v41 = vpop.eup %4691  ;;  %v3217_v60 = vadd.f32 1.0, %v4690_v21  ;;  %v3435_v40 = vunpack.c.l.bf16 %v7188_v43 }
 0x715   :  { %3371 = vmatprep.mubr.bf16.mxu0 %v6955_v32  ;;  %3414 = vmatprep.mubr.bf16.mxu1 %v6955_v32  ;;  %4701 = vrcp.f32 %v3204_v29 }
 0x716   :  { %4703 = vrcp.f32 %v3217_v60 }
 0x717   :  { %3342 = vmatpush1.bf16.msra.mxu0 %v6260_v19  ;;  %3385 = vmatpush1.bf16.msra.mxu1 %v6263_v59 }
 0x718   :  { %3343 = vmatprep.subr.bf16.mxu0 %v6266_v25  ;;  %3386 = vmatprep.subr.bf16.mxu1 %v6269_v62 }
 0x71b   :  { %v4694_v42 = vpop.eup %4693  ;;  %3344 = vmatpush1.bf16.msra.mxu0 %v6272_v4  ;;  %3387 = vmatpush1.bf16.msra.mxu1 %v6275_v58 }
 0x71c   :  { %v4696_v52 = vpop.eup %4695  ;;  %v3225_v11 = vmul.f32 %v4694_v42, %v4688_v9  ;;  %3345 = vmatprep.subr.bf16.mxu0 %v6278_v55  ;;  %3388 = vmatprep.subr.bf16.mxu1 %v6281_v57  ;;  %v7189_v9 = vld [vmem:[#allocation34_spill] sm:$0xff] }
 0x71d   :  { %v4698_v19 = vpop.eup %4697  ;;  %v3223_v59 = vmul.f32 %v4696_v52, %v6489_v61  ;;  %v7168_v61 = vld [vmem:[#allocation70_spill] sm:$0xff]  ;;  %v3434_v21 = vunpack.c.l.bf16 %v7189_v9 }
 0x71e   :  { %v4700_v25 = vpop.eup %4699  ;;  %v3218_v58 = vadd.f32 1.0, %v4698_v19 }
 0x71f   :  { %v6589_v1 = vadd.f32 %v3225_v11, %v3223_v59  ;;  %v3226_v62 = vmul.f32 %v4700_v25, %v4692_v41  ;;  %3346 = vmatpush1.bf16.msra.mxu0 %v6287_v7  ;;  %3389 = vmatpush1.bf16.msra.mxu1 %v6290_v10  ;;  %v4702_v4 = vpop.eup %4701  ;;  %v7190_v41 = vld [vmem:[#allocation36_spill] sm:$0xff]  ;;  %v3437_v59 = vunpack.c.h.bf16 %v7187_v14  ;;  %v3439_v25 = vunpack.c.h.bf16 %v7188_v43 }
 0x720   :  { %3347 = vmatprep.subr.bf16.mxu0 %v6293_v36  ;;  %3390 = vmatprep.subr.bf16.mxu1 %v6296_v30  ;;  %v3224_v55 = vmul.f32 %v4702_v4, %v6497_v27  ;;  %v4704_v7 = vpop.eup %4703  ;;  %v7169_v27 = vld [vmem:[#allocation71_spill] sm:$0xff]  ;;  %v3436_v42 = vunpack.c.l.bf16 %v7190_v41 }
 0x721   :  { %4705 = vtanh.f32 %v6589_v1 }
 0x722   :  { %v6597_v57 = vadd.f32 %v3226_v62, %v3224_v55  ;;  %4707 = vrcp.f32 %v3218_v58 }
 0x723   :  { %3348 = vmatpush1.bf16.msra.mxu0 %v6303_v22  ;;  %3391 = vmatpush1.bf16.msra.mxu1 %v6306_v26 }
 0x724   :  { %3349 = vmatprep.subr.bf16.mxu0 %v6309_v31  ;;  %3392 = vmatprep.subr.bf16.mxu1 %v6312_v23  ;;  %4709 = vtanh.f32 %v6597_v57 }
 0x727   :  { %3350 = vmatpush1.bf16.msra.mxu0 %v6316_v56  ;;  %3393 = vmatpush1.bf16.msra.mxu1 %v6319_v12  ;;  %v7156_v12 = vld [vmem:[#allocation66_spill] sm:$0xff] }
 0x728   :  { %3351 = vmatprep.subr.bf16.mxu0 %v6322_v33  ;;  %3394 = vmatprep.subr.bf16.mxu1 %v6325_v2  ;;  %v7157_v33 = vld [vmem:[#allocation67_spill] sm:$0xff]  ;;  %v7158_v2 = vld [vmem:[#allocation68_spill] sm:$0xff] }
 0x72b   :  { %v4706_v10 = vpop.eup %4705  ;;  %3352 = vmatpush1.bf16.msra.mxu0 %v6328_v44  ;;  %3395 = vmatpush1.bf16.msra.mxu1 %v6331_v38  ;;  %v7159_v44 = vld [vmem:[#allocation17_spill] sm:$0xff]  ;;  %v7160_v38 = vld [vmem:[#allocation19_spill] sm:$0xff] }
 0x72c   :  { %3353 = vmatprep.subr.bf16.mxu0 %v6334_v6  ;;  %3396 = vmatprep.subr.bf16.mxu1 %v6337_v8  ;;  %v3231_v36 = vmul.f32 %v4706_v10, %v4704_v7  ;;  %v4708_v30 = vpop.eup %4707  ;;  %v7161_v6 = vld [vmem:[#allocation18_spill] sm:$0xff]  ;;  %v7162_v8 = vld [vmem:[#allocation20_spill] sm:$0xff]  ;;  %v3438_v7 = vunpack.c.h.bf16 %v7189_v9  ;;  %v3440_v10 = vunpack.c.h.bf16 %v7190_v41 }
 0x72e   :  { %v4198_v22 = vpack.c.bf16 %v3231_v36, %v3231_v36  ;;  %v4710_v26 = vpop.eup %4709 }
 0x72f   :  { %3354 = vmatpush1.bf16.msra.mxu0 %v6340_v5  ;;  %3397 = vmatpush1.bf16.msra.mxu1 %v6343_v45  ;;  %v3232_v31 = vmul.f32 %v4710_v26, %v4708_v30  ;;  %v7163_v5 = vld [vmem:[#allocation61_spill] sm:$0xff]  ;;  %v7164_v45 = vld [vmem:[#allocation63_spill] sm:$0xff] }
 0x730   :  { %3251 = vst [vmem:[#allocation12 + $0x24] sm:$0xf] %v4198_v22  ;;  %3581 = vmatprep.subr.bf16.mxu0 %v6346_v16  ;;  %3624 = vmatprep.subr.bf16.mxu1 %v6349_v46  ;;  %v7165_v16 = vld [vmem:[#allocation62_spill] sm:$0xff]  ;;  %v7166_v46 = vld [vmem:[#allocation64_spill] sm:$0xff] }
 0x731   :  { %v3234_v23 = vpack.c.bf16 %v3232_v31, %v3231_v36  ;;  %v4199_v56 = vpack.c.bf16 %v3232_v31, %v3232_v31 }
 0x733   :  { %3252 = vst [vmem:[#allocation12 + $0x2c] sm:$0xf] %v4199_v56  ;;  %3372 = vmatmul.mubr.bf16.vlgmr.msra.gmra.mrb[116].mxu0 %v3234_v23  ;;  %3415 = vmatmul.mubr.bf16.vlgmr.msra.gmra.mrb[116].mxu1 %v3234_v23 }
 0x734   :  { %3582 = vmatpush1.bf16.msra.mxu0 %v6352_v51  ;;  %3625 = vmatpush1.bf16.msra.mxu1 %v7156_v12  ;;  %v7167_v51 = vld [vmem:[#allocation69_spill] sm:$0xff] }
 0x735   :  { %3583 = vmatprep.subr.bf16.mxu0 %v7157_v33  ;;  %3626 = vmatprep.subr.bf16.mxu1 %v7158_v2 }
 0x736   :  { %3613 = vmatprep.mubr.bf16.mxu0 %v6955_v32  ;;  %3656 = vmatprep.mubr.bf16.mxu1 %v6955_v32 }
 0x738   :  { %3584 = vmatpush1.bf16.msra.mxu0 %v7159_v44  ;;  %3627 = vmatpush1.bf16.msra.mxu1 %v7160_v38 }
 0x739   :  { %3585 = vmatprep.subr.bf16.mxu0 %v7161_v6  ;;  %3628 = vmatprep.subr.bf16.mxu1 %v7162_v8 }
 0x73c   :  { %3586 = vmatpush1.bf16.msra.mxu0 %v7163_v5  ;;  %3629 = vmatpush1.bf16.msra.mxu1 %v7164_v45 }
 0x73d   :  { %3587 = vmatprep.subr.bf16.mxu0 %v7165_v16  ;;  %3630 = vmatprep.subr.bf16.mxu1 %v7166_v46 }
 0x740   :  { %3588 = vmatpush1.bf16.msra.mxu0 %v7167_v51  ;;  %3631 = vmatpush1.bf16.msra.mxu1 %v7168_v61 }
 0x741   :  { %3589 = vmatprep.subr.bf16.mxu0 %v7169_v27  ;;  %3632 = vmatprep.subr.bf16.mxu1 %v7170_v34 }
 0x744   :  { %3590 = vmatpush1.bf16.msra.mxu0 %v7171_v35  ;;  %3633 = vmatpush1.bf16.msra.mxu1 %v7172_v49 }
 0x745   :  { %3591 = vmatprep.subr.bf16.mxu0 %v7173_v24  ;;  %3634 = vmatprep.subr.bf16.mxu1 %v7174_v18 }
 0x748   :  { %3592 = vmatpush1.bf16.msra.mxu0 %v7175_v47  ;;  %3635 = vmatpush1.bf16.msra.mxu1 %v7176_v28 }
 0x749   :  { %3593 = vmatprep.subr.bf16.mxu0 %v7177_v39  ;;  %3636 = vmatprep.subr.bf16.mxu1 %v7178_v17  ;;  %v7191_v39 = vld [vmem:[#allocation90_spill] sm:$0xff] }
 0x74c   :  { %3594 = vmatpush1.bf16.msra.mxu0 %v7179_v0  ;;  %3637 = vmatpush1.bf16.msra.mxu1 %v7180_v50 }
 0x74d   :  { %3595 = vmatprep.subr.bf16.mxu0 %v7181_v15  ;;  %3638 = vmatprep.subr.bf16.mxu1 %v7182_v13  ;;  %v7192_v13 = vld [vmem:[#allocation45_spill] sm:$0xff] }
 0x750   :  { %3596 = vmatpush1.bf16.msra.mxu0 %v7183_v37  ;;  %3639 = vmatpush1.bf16.msra.mxu1 %v7184_v53  ;;  %v3449_v37 = vunpack.c.l.bf16 %v7192_v13 }
 0x751   :  { %3667 = vmatprep.subr.bf16.mxu0 %v7185_v63  ;;  %3710 = vmatprep.subr.bf16.mxu1 %v7186_v54  ;;  %v7193_v54 = vld [vmem:[#allocation47_spill] sm:$0xff] }
 0x752   :  { %v3451_v14 = vunpack.c.l.bf16 %v7193_v54 }
 0x7e5   :  { %v3287_v3 = vpop.f32.mrb[112].mxu0  ;;  %v3330_v29 = vpop.f32.mrb[112].mxu1 }
 0x7e6   :  { %v3441_v52 = vadd.f32 %v3433_v48, %v3287_v3  ;;  %v3443_v11 = vadd.f32 %v3435_v40, %v3330_v29  ;;  %v3289_v60 = vpop.f32.mrb[113].mxu0  ;;  %v3332_v19 = vpop.f32.mrb[113].mxu1  ;;  %v3453_v48 = vunpack.c.h.bf16 %v7192_v13  ;;  %v7194_v29 = vld [vmem:[#allocation46_spill] sm:$0xff]  ;;  %v4972_v13 = vld [vmem:[#allocation9 + $0x28] ss:$16 sps:$4 sm:$0xff]  }
 0x7e7   :  { %v3442_v62 = vadd.f32 %v3434_v21, %v3289_v60  ;;  %v3444_v4 = vadd.f32 %v3436_v42, %v3332_v19  ;;  %v3291_v58 = vpop.f32.mrb[114].mxu0  ;;  %v3334_v55 = vpop.f32.mrb[114].mxu1  ;;  %v3450_v9 = vunpack.c.l.bf16 %v7194_v29  ;;  %v7195_v21 = vld [vmem:[#allocation48_spill] sm:$0xff]  ;;  %v3455_v19 = vunpack.c.h.bf16 %v7193_v54 }
 0x7e8   :  { %v4144_v36 = vmul.f32 -1.442695, %v3441_v52  ;;  %v3445_v30 = vadd.f32 %v3437_v59, %v3291_v58  ;;  %v3447_v22 = vadd.f32 %v3439_v25, %v3334_v55  ;;  %v3293_v26 = vpop.f32.mrb[115].mxu0  ;;  %v3336_v31 = vpop.f32.mrb[115].mxu1  ;;  %v3452_v41 = vunpack.c.l.bf16 %v7195_v21 }
 0x7e9   :  { %v4146_v23 = vmul.f32 -1.442695, %v3442_v62  ;;  %v3446_v56 = vadd.f32 %v3438_v7, %v3293_v26  ;;  %v3448_v12 = vadd.f32 %v3440_v10, %v3336_v31  ;;  %v4148_v44 = vmul.f32 -1.442695, %v3444_v4 }
 0x7ea   :  { %4711 = vpow2.f32 %v4144_v36  ;;  %v4145_v33 = vmul.f32 -1.442695, %v3445_v30  ;;  %v3454_v59 = vunpack.c.h.bf16 %v7194_v29  ;;  %v3456_v55 = vunpack.c.h.bf16 %v7195_v21  ;;  %v4978_v21 = vld [vmem:[#allocation9 + $0x6c] ss:$16 sps:$4 sm:$0xff]  }
 0x7eb   :  { %4713 = vpow2.f32 %v4146_v23  ;;  %v4147_v2 = vmul.f32 -1.442695, %v3446_v56  ;;  %v4149_v5 = vmul.f32 -1.442695, %v3448_v12 }
 0x7ec   :  { %4715 = vpow2.f32 %v4145_v33 }
 0x7ed   :  { %4717 = vpow2.f32 %v4147_v2 }
 0x7ee   :  { %4719 = vtanh.f32 %v3443_v11 }
 0x7ef   :  { %4721 = vpow2.f32 %v4148_v44 }
 0x7f0   :  { %4723 = vtanh.f32 %v3447_v22 }
 0x7f4   :  { %v4712_v38 = vpop.eup %4711 }
 0x7f5   :  { %v4714_v6 = vpop.eup %4713  ;;  %v3471_v8 = vadd.f32 1.0, %v4712_v38 }
 0x7f6   :  { %v3483_v45 = vadd.f32 1.0, %v4714_v6  ;;  %v4716_v16 = vpop.eup %4715 }
 0x7f7   :  { %4725 = vrcp.f32 %v3471_v8  ;;  %v3472_v46 = vadd.f32 1.0, %v4716_v16  ;;  %v4718_v51 = vpop.eup %4717 }
 0x7f8   :  { %4727 = vrcp.f32 %v3483_v45  ;;  %v3484_v61 = vadd.f32 1.0, %v4718_v51  ;;  %v4720_v27 = vpop.eup %4719 }
 0x7f9   :  { %4729 = vpow2.f32 %v4149_v5  ;;  %v4722_v34 = vpop.eup %4721 }
 0x7fa   :  { %4731 = vrcp.f32 %v3472_v46  ;;  %v4724_v35 = vpop.eup %4723  ;;  %v3497_v47 = vadd.f32 1.0, %v4722_v34 }
 0x7fb   :  { %4733 = vrcp.f32 %v3484_v61 }
 0x7fc   :  { %4735 = vrcp.f32 %v3497_v47  ;;  %v4967_v47 = vld [vmem:[#allocation9] ss:$16 sps:$4 sm:$0xff]  }
 0x801   :  { %v4726_v49 = vpop.eup %4725 }
 0x802   :  { %v4728_v24 = vpop.eup %4727  ;;  %v3505_v18 = vmul.f32 %v4726_v49, %v4720_v27 }
 0x803   :  { %v4730_v28 = vpop.eup %4729  ;;  %v3503_v17 = vmul.f32 %v4728_v24, %v7191_v39 }
 0x804   :  { %v4732_v0 = vpop.eup %4731  ;;  %v3498_v63 = vadd.f32 1.0, %v4730_v28  ;;  %v4968_v28 = vld [vmem:[#allocation9 + $0x8] ss:$16 sps:$4 sm:$0xff]  }
 0x805   :  { %v6659_v50 = vadd.f32 %v3505_v18, %v3503_v17  ;;  %v3506_v15 = vmul.f32 %v4732_v0, %v4724_v35  ;;  %v4734_v53 = vpop.eup %4733  ;;  %v4969_v17 = vld [vmem:[#allocation9 + $0x24] ss:$16 sps:$4 sm:$0xff]   ;;  %v4970_v0 = vld [vmem:[#allocation9 + $0x2c] ss:$16 sps:$4 sm:$0xff]  }
 0x806   :  { %v3504_v43 = vmul.f32 %v4734_v53, %v6570_v20  ;;  %v3373_v40 = vpop.f32.mrb[116].mxu0  ;;  %v3416_v3 = vpop.f32.mrb[116].mxu1  ;;  %v4973_v53 = vld [vmem:[#allocation9 + $0x44] ss:$16 sps:$4 sm:$0xff]  }
 0x807   :  { %4737 = vtanh.f32 %v6659_v50  ;;  %v3457_v42 = vadd.f32 %v3449_v37, %v3373_v40  ;;  %v3459_v52 = vadd.f32 %v3451_v14, %v3416_v3  ;;  %v3375_v11 = vpop.f32.mrb[117].mxu0  ;;  %v3418_v60 = vpop.f32.mrb[117].mxu1  ;;  %v4976_v40 = vld [vmem:[#allocation9 + $0x48] ss:$16 sps:$4 sm:$0xff]  }
 0x808   :  { %v6670_v25 = vadd.f32 %v3506_v15, %v3504_v43  ;;  %v3458_v62 = vadd.f32 %v3450_v9, %v3375_v11  ;;  %v3460_v4 = vadd.f32 %v3452_v41, %v3418_v60  ;;  %v3377_v58 = vpop.f32.mrb[118].mxu0  ;;  %v3420_v20 = vpop.f32.mrb[118].mxu1  ;;  %4739 = vrcp.f32 %v3498_v63  ;;  %v4971_v15 = vld [vmem:[#allocation9 + $0x20] ss:$16 sps:$4 sm:$0xff]   ;;  %v4974_v63 = vld [vmem:[#allocation9 + $0x4c] ss:$16 sps:$4 sm:$0xff]  }
 0x809   :  { %v4150_v7 = vmul.f32 -1.442695, %v3457_v42  ;;  %v3461_v10 = vadd.f32 %v3453_v48, %v3377_v58  ;;  %v3463_v36 = vadd.f32 %v3455_v19, %v3420_v20  ;;  %v3379_v30 = vpop.f32.mrb[119].mxu0  ;;  %v3422_v22 = vpop.f32.mrb[119].mxu1  ;;  %v4975_v43 = vld [vmem:[#allocation9 + $0x40] ss:$16 sps:$4 sm:$0xff]  }
 0x80a   :  { %4741 = vtanh.f32 %v6670_v25  ;;  %v4152_v26 = vmul.f32 -1.442695, %v3458_v62  ;;  %v3462_v31 = vadd.f32 %v3454_v59, %v3379_v30  ;;  %v3464_v56 = vadd.f32 %v3456_v55, %v3422_v22  ;;  %v4736_v33 = vpop.eup %4735  ;;  %v4977_v9 = vld [vmem:[#allocation9 + $0x64] ss:$16 sps:$4 sm:$0xff]   ;;  %v4979_v19 = vld [vmem:[#allocation9 + $0x60] ss:$16 sps:$4 sm:$0xff]  }
 0x80b   :  { %4743 = vpow2.f32 %v4150_v7  ;;  %v4151_v23 = vmul.f32 -1.442695, %v3461_v10  ;;  %v4154_v38 = vmul.f32 -1.442695, %v3460_v4  ;;  %v4980_v59 = vld [vmem:[#allocation9 + $0x68] ss:$16 sps:$4 sm:$0xff]  }
 0x80c   :  { %4745 = vpow2.f32 %v4152_v26  ;;  %v4153_v12 = vmul.f32 -1.442695, %v3462_v31  ;;  %v4155_v61 = vmul.f32 -1.442695, %v3464_v56  ;;  %v4981_v58 = vld [vmem:[#allocation9 + $0x84] ss:$16 sps:$4 sm:$0xff]  }
 0x80d   :  { %4747 = vpow2.f32 %v4151_v23  ;;  %v4982_v20 = vld [vmem:[#allocation9 + $0x8c] ss:$16 sps:$4 sm:$0xff]   ;;  %v4983_v7 = vld [vmem:[#allocation9 + $0x80] ss:$16 sps:$4 sm:$0xff]   ;;  %v4984_v10 = vld [vmem:[#allocation9 + $0x88] ss:$16 sps:$4 sm:$0xff]  }
 0x80e   :  { %4749 = vpow2.f32 %v4153_v12  ;;  %v4986_v30 = vld [vmem:[#allocation9 + $0xac] ss:$16 sps:$4 sm:$0xff]   ;;  %v4987_v22 = vld [vmem:[#allocation9 + $0xa0] ss:$16 sps:$4 sm:$0xff]   ;;  %v4988_v26 = vld [vmem:[#allocation9 + $0xa8] ss:$16 sps:$4 sm:$0xff]  }
 0x80f   :  { %4751 = vtanh.f32 %v3459_v52  ;;  %v4989_v31 = vld [vmem:[#allocation9 + $0xc4] ss:$16 sps:$4 sm:$0xff]   ;;  %v4991_v12 = vld [vmem:[#allocation9 + $0xc0] ss:$16 sps:$4 sm:$0xff]  }
 0x810   :  { %4753 = vpow2.f32 %v4154_v38 }
 0x811   :  { %v4738_v2 = vpop.eup %4737  ;;  %4755 = vtanh.f32 %v3463_v36  ;;  %v4985_v36 = vld [vmem:[#allocation9 + $0xa4] ss:$16 sps:$4 sm:$0xff]  }
 0x812   :  { %v3511_v44 = vmul.f32 %v4738_v2, %v4736_v33  ;;  %v4740_v6 = vpop.eup %4739  ;;  %v4992_v33 = vld [vmem:[#allocation9 + $0xc8] ss:$16 sps:$4 sm:$0xff]   ;;  %v4993_v2 = vld [vmem:[#allocation9 + $0xe4] ss:$16 sps:$4 sm:$0xff]  }
 0x814   :  { %v4200_v8 = vpack.c.bf16 %v3511_v44, %v3511_v44  ;;  %v4742_v5 = vpop.eup %4741 }
 0x815   :  { %v4744_v45 = vpop.eup %4743  ;;  %v3512_v16 = vmul.f32 %v4742_v5, %v4740_v6 }
 0x816   :  { %3570 = vst [vmem:[#allocation12 + $0x60] sm:$0xf] %v4200_v8  ;;  %v4746_v46 = vpop.eup %4745  ;;  %v3519_v51 = vadd.f32 1.0, %v4744_v45  ;;  %v4995_v45 = vld [vmem:[#allocation9 + $0xe0] ss:$16 sps:$4 sm:$0xff]  }
 0x817   :  { %v3531_v27 = vadd.f32 1.0, %v4746_v46  ;;  %v3561_v34 = vpack.c.bf16 %v3512_v16, %v3511_v44  ;;  %v4201_v35 = vpack.c.bf16 %v3512_v16, %v3512_v16  ;;  %v4748_v49 = vpop.eup %4747  ;;  %v4994_v44 = vld [vmem:[#allocation9 + $0xec] ss:$16 sps:$4 sm:$0xff]   ;;  %v4996_v16 = vld [vmem:[#allocation9 + $0xe8] ss:$16 sps:$4 sm:$0xff]  }
 0x818   :  { %4757 = vrcp.f32 %v3519_v51  ;;  %v3520_v24 = vadd.f32 1.0, %v4748_v49  ;;  %v4750_v18 = vpop.eup %4749 }
 0x819   :  { %4759 = vrcp.f32 %v3531_v27  ;;  %3571 = vst [vmem:[#allocation12 + $0x68] sm:$0xf] %v4201_v35  ;;  %3614 = vmatmul.mubr.bf16.vlgmr.msra.gmra.mrb[120].mxu0 %v3561_v34  ;;  %3657 = vmatmul.mubr.bf16.vlgmr.msra.gmra.mrb[120].mxu1 %v3561_v34  ;;  %v3532_v39 = vadd.f32 1.0, %v4750_v18  ;;  %v4752_v37 = vpop.eup %4751  ;;  %v7196_v27 = vld [vmem:[#allocation37_spill] sm:$0xff]  ;;  %v7197_v35 = vld [vmem:[#allocation39_spill] sm:$0xff] }
 0x81a   :  { %4761 = vpow2.f32 %v4155_v61  ;;  %3668 = vmatpush1.bf16.msra.mxu0 %v4967_v47  ;;  %3711 = vmatpush1.bf16.msra.mxu1 %v4968_v28  ;;  %v4754_v54 = vpop.eup %4753  ;;  %v3761_v34 = vunpack.c.l.bf16 %v7196_v27  ;;  %v3763_v49 = vunpack.c.l.bf16 %v7197_v35  ;;  %v7198_v47 = vld [vmem:[#allocation38_spill] sm:$0xff] }
 0x81b   :  { %4763 = vrcp.f32 %v3520_v24  ;;  %3669 = vmatprep.subr.bf16.mxu0 %v4969_v17  ;;  %3712 = vmatprep.subr.bf16.mxu1 %v4970_v0  ;;  %v4756_v14 = vpop.eup %4755  ;;  %v3762_v28 = vunpack.c.l.bf16 %v7198_v47 }
 0x81c   :  { %3699 = vmatprep.mubr.bf16.mxu0 %v6955_v32  ;;  %3742 = vmatprep.mubr.bf16.mxu1 %v6955_v32  ;;  %4765 = vrcp.f32 %v3532_v39  ;;  %v3545_v32 = vadd.f32 1.0, %v4754_v54  ;;  %v7199_v39 = vld [vmem:[#allocation40_spill] sm:$0xff] }
 0x81d   :  { %v3764_v17 = vunpack.c.l.bf16 %v7199_v39 }
 0x81e   :  { %3670 = vmatpush1.bf16.msra.mxu0 %v4971_v15  ;;  %3713 = vmatpush1.bf16.msra.mxu1 %v4972_v13  ;;  %4767 = vrcp.f32 %v3545_v32 }
 0x81f   :  { %3671 = vmatprep.subr.bf16.mxu0 %v4973_v53  ;;  %3714 = vmatprep.subr.bf16.mxu1 %v4974_v63  ;;  %v3765_v53 = vunpack.c.h.bf16 %v7196_v27  ;;  %v3767_v63 = vunpack.c.h.bf16 %v7197_v35 }
 0x822   :  { %v4758_v48 = vpop.eup %4757  ;;  %3672 = vmatpush1.bf16.msra.mxu0 %v4975_v43  ;;  %3715 = vmatpush1.bf16.msra.mxu1 %v4976_v40  ;;  %v3766_v40 = vunpack.c.h.bf16 %v7198_v47 }
 0x823   :  { %v4760_v3 = vpop.eup %4759  ;;  %v3553_v29 = vmul.f32 %v4758_v48, %v4752_v37  ;;  %3673 = vmatprep.subr.bf16.mxu0 %v4977_v9  ;;  %3716 = vmatprep.subr.bf16.mxu1 %v4978_v21 }
 0x824   :  { %v4762_v41 = vpop.eup %4761  ;;  %v3551_v42 = vmul.f32 %v4760_v3, %v6589_v1  ;;  %v3768_v3 = vunpack.c.h.bf16 %v7199_v39 }
 0x825   :  { %v4764_v52 = vpop.eup %4763  ;;  %v3546_v4 = vadd.f32 1.0, %v4762_v41 }
 0x826   :  { %v6677_v11 = vadd.f32 %v3553_v29, %v3551_v42  ;;  %v3554_v60 = vmul.f32 %v4764_v52, %v4756_v14  ;;  %3674 = vmatpush1.bf16.msra.mxu0 %v4979_v19  ;;  %3717 = vmatpush1.bf16.msra.mxu1 %v4980_v59  ;;  %v4766_v62 = vpop.eup %4765 }
 0x827   :  { %3675 = vmatprep.subr.bf16.mxu0 %v4981_v58  ;;  %3718 = vmatprep.subr.bf16.mxu1 %v4982_v20  ;;  %v3552_v55 = vmul.f32 %v4766_v62, %v6597_v57  ;;  %v4990_v57 = vld [vmem:[#allocation9 + $0xcc] ss:$16 sps:$4 sm:$0xff]  }
 0x828   :  { %4769 = vtanh.f32 %v6677_v11  ;;  %v4768_v23 = vpop.eup %4767 }
 0x829   :  { %v6681_v1 = vadd.f32 %v3554_v60, %v3552_v55  ;;  %4771 = vrcp.f32 %v3546_v4 }
 0x82a   :  { %3676 = vmatpush1.bf16.msra.mxu0 %v4983_v7  ;;  %3719 = vmatpush1.bf16.msra.mxu1 %v4984_v10 }
 0x82b   :  { %3677 = vmatprep.subr.bf16.mxu0 %v4985_v36  ;;  %3720 = vmatprep.subr.bf16.mxu1 %v4986_v30  ;;  %4773 = vtanh.f32 %v6681_v1 }
 0x82e   :  { %3678 = vmatpush1.bf16.msra.mxu0 %v4987_v22  ;;  %3721 = vmatpush1.bf16.msra.mxu1 %v4988_v26 }
 0x82f   :  { %3679 = vmatprep.subr.bf16.mxu0 %v4989_v31  ;;  %3722 = vmatprep.subr.bf16.mxu1 %v4990_v57 }
 0x832   :  { %v4770_v56 = vpop.eup %4769  ;;  %3680 = vmatpush1.bf16.msra.mxu0 %v4991_v12  ;;  %3723 = vmatpush1.bf16.msra.mxu1 %v4992_v33 }
 0x833   :  { %3681 = vmatprep.subr.bf16.mxu0 %v4993_v2  ;;  %3724 = vmatprep.subr.bf16.mxu1 %v4994_v44  ;;  %v3559_v38 = vmul.f32 %v4770_v56, %v4768_v23  ;;  %v4772_v6 = vpop.eup %4771 }
 0x835   :  { %v4202_v8 = vpack.c.bf16 %v3559_v38, %v3559_v38  ;;  %v4774_v5 = vpop.eup %4773 }
 0x836   :  { %3682 = vmatpush1.bf16.msra.mxu0 %v4995_v45  ;;  %3725 = vmatpush1.bf16.msra.mxu1 %v4996_v16  ;;  %v3560_v46 = vmul.f32 %v4774_v5, %v4772_v6  ;;  %v7200_v5 = vld [vmem:[#allocation41_spill] sm:$0xff] }
 0x837   :  { %3579 = vst [vmem:[#allocation12 + $0x14] sm:$0xf] %v4202_v8  ;;  %v3777_v45 = vunpack.c.l.bf16 %v7200_v5  ;;  %v3781_v27 = vunpack.c.h.bf16 %v7200_v5 }
 0x838   :  { %v3562_v51 = vpack.c.bf16 %v3560_v46, %v3559_v38  ;;  %v4203_v61 = vpack.c.bf16 %v3560_v46, %v3560_v46 }
 0x83a   :  { %3580 = vst [vmem:[#allocation12 + $0x1c] sm:$0xf] %v4203_v61  ;;  %3700 = vmatmul.mubr.bf16.vlgmr.msra.gmra.mrb[124].mxu0 %v3562_v51  ;;  %3743 = vmatmul.mubr.bf16.vlgmr.msra.gmra.mrb[124].mxu1 %v3562_v51  ;;  %v7201_v51 = vld [vmem:[#allocation43_spill] sm:$0xff] }
 0x83b   :  { %v3779_v61 = vunpack.c.l.bf16 %v7201_v51 }
 0x8ec   :  { %v3615_v24 = vpop.f32.mrb[120].mxu0  ;;  %v3658_v18 = vpop.f32.mrb[120].mxu1 }
 0x8ed   :  { %v3769_v0 = vadd.f32 %v3761_v34, %v3615_v24  ;;  %v3771_v15 = vadd.f32 %v3763_v49, %v3658_v18  ;;  %v3617_v13 = vpop.f32.mrb[121].mxu0  ;;  %v3660_v37 = vpop.f32.mrb[121].mxu1  ;;  %v7202_v24 = vld [vmem:[#allocation42_spill] sm:$0xff] }
 0x8ee   :  { %v3770_v54 = vadd.f32 %v3762_v28, %v3617_v13  ;;  %v3772_v14 = vadd.f32 %v3764_v17, %v3660_v37  ;;  %v3619_v48 = vpop.f32.mrb[122].mxu0  ;;  %v3662_v43 = vpop.f32.mrb[122].mxu1  ;;  %v3778_v18 = vunpack.c.l.bf16 %v7202_v24  ;;  %v3782_v13 = vunpack.c.h.bf16 %v7202_v24 }
 0x8ef   :  { %v4160_v29 = vmul.f32 -1.442695, %v3769_v0  ;;  %v3773_v32 = vadd.f32 %v3765_v53, %v3619_v48  ;;  %v3775_v9 = vadd.f32 %v3767_v63, %v3662_v43  ;;  %v3621_v21 = vpop.f32.mrb[123].mxu0  ;;  %v3664_v41 = vpop.f32.mrb[123].mxu1 }
 0x8f0   :  { %v4162_v42 = vmul.f32 -1.442695, %v3770_v54  ;;  %v3774_v52 = vadd.f32 %v3766_v40, %v3621_v21  ;;  %v3776_v60 = vadd.f32 %v3768_v3, %v3664_v41  ;;  %v4164_v62 = vmul.f32 -1.442695, %v3772_v14 }
 0x8f1   :  { %4775 = vpow2.f32 %v4160_v29  ;;  %v4161_v19 = vmul.f32 -1.442695, %v3773_v32 }
 0x8f2   :  { %4777 = vpow2.f32 %v4162_v42  ;;  %v4163_v59 = vmul.f32 -1.442695, %v3774_v52  ;;  %v4165_v55 = vmul.f32 -1.442695, %v3776_v60 }
 0x8f3   :  { %4779 = vpow2.f32 %v4161_v19 }
 0x8f4   :  { %4781 = vpow2.f32 %v4163_v59 }
 0x8f5   :  { %4783 = vtanh.f32 %v3771_v15  ;;  %v3783_v15 = vunpack.c.h.bf16 %v7201_v51 }
 0x8f6   :  { %4785 = vpow2.f32 %v4164_v62 }
 0x8f7   :  { %4787 = vtanh.f32 %v3775_v9 }
 0x8fb   :  { %v4776_v4 = vpop.eup %4775 }
 0x8fc   :  { %v4778_v58 = vpop.eup %4777  ;;  %v3799_v20 = vadd.f32 1.0, %v4776_v4 }
 0x8fd   :  { %v3811_v7 = vadd.f32 1.0, %v4778_v58  ;;  %v4780_v10 = vpop.eup %4779 }
 0x8fe   :  { %4789 = vrcp.f32 %v3799_v20  ;;  %v3800_v36 = vadd.f32 1.0, %v4780_v10  ;;  %v4782_v30 = vpop.eup %4781 }
 0x8ff   :  { %4791 = vrcp.f32 %v3811_v7  ;;  %v3812_v22 = vadd.f32 1.0, %v4782_v30  ;;  %v4784_v26 = vpop.eup %4783 }
 0x900   :  { %4793 = vpow2.f32 %v4165_v55  ;;  %v4786_v31 = vpop.eup %4785 }
 0x901   :  { %4795 = vrcp.f32 %v3800_v36  ;;  %v4788_v57 = vpop.eup %4787  ;;  %v3825_v33 = vadd.f32 1.0, %v4786_v31 }
 0x902   :  { %4797 = vrcp.f32 %v3812_v22 }
 0x903   :  { %4799 = vrcp.f32 %v3825_v33 }
 0x908   :  { %v4790_v23 = vpop.eup %4789 }
 0x909   :  { %v4792_v56 = vpop.eup %4791  ;;  %v3833_v12 = vmul.f32 %v4790_v23, %v4784_v26 }
 0x90a   :  { %v4794_v2 = vpop.eup %4793  ;;  %v3831_v44 = vmul.f32 %v4792_v56, %v6659_v50  ;;  %v7203_v50 = vld [vmem:[#allocation44_spill] sm:$0xff] }
 0x90b   :  { %v4796_v38 = vpop.eup %4795  ;;  %v3826_v46 = vadd.f32 1.0, %v4794_v2  ;;  %v3780_v47 = vunpack.c.l.bf16 %v7203_v50 }
 0x90c   :  { %v3835_v6 = vadd.f32 %v3833_v12, %v3831_v44  ;;  %v3834_v8 = vmul.f32 %v4796_v38, %v4788_v57  ;;  %v4798_v16 = vpop.eup %4797 }
 0x90d   :  { %v3832_v34 = vmul.f32 %v4798_v16, %v6670_v25  ;;  %v3701_v35 = vpop.f32.mrb[124].mxu0  ;;  %v3744_v49 = vpop.f32.mrb[124].mxu1  ;;  %v3784_v25 = vunpack.c.h.bf16 %v7203_v50 }
 0x90e   :  { %4801 = vtanh.f32 %v3835_v6  ;;  %v3785_v28 = vadd.f32 %v3777_v45, %v3701_v35  ;;  %v3787_v39 = vadd.f32 %v3779_v61, %v3744_v49  ;;  %v3703_v17 = vpop.f32.mrb[125].mxu0  ;;  %v3746_v0 = vpop.f32.mrb[125].mxu1 }
 0x90f   :  { %v3836_v37 = vadd.f32 %v3834_v8, %v3832_v34  ;;  %v3786_v53 = vadd.f32 %v3778_v18, %v3703_v17  ;;  %v3788_v63 = vadd.f32 %v3780_v47, %v3746_v0  ;;  %v3705_v54 = vpop.f32.mrb[126].mxu0  ;;  %v3748_v14 = vpop.f32.mrb[126].mxu1  ;;  %4803 = vrcp.f32 %v3826_v46 }
 0x910   :  { %v4166_v48 = vmul.f32 -1.442695, %v3785_v28  ;;  %v3789_v43 = vadd.f32 %v3781_v27, %v3705_v54  ;;  %v3791_v40 = vadd.f32 %v3783_v15, %v3748_v14  ;;  %v3707_v3 = vpop.f32.mrb[127].mxu0  ;;  %v3750_v29 = vpop.f32.mrb[127].mxu1 }
 0x911   :  { %4805 = vtanh.f32 %v3836_v37  ;;  %v4168_v32 = vmul.f32 -1.442695, %v3786_v53  ;;  %v3790_v9 = vadd.f32 %v3782_v13, %v3707_v3  ;;  %v3792_v41 = vadd.f32 %v3784_v25, %v3750_v29  ;;  %v4800_v52 = vpop.eup %4799 }
 0x912   :  { %4807 = vpow2.f32 %v4166_v48  ;;  %v4167_v21 = vmul.f32 -1.442695, %v3789_v43  ;;  %v4170_v59 = vmul.f32 -1.442695, %v3788_v63 }
 0x913   :  { %4809 = vpow2.f32 %v4168_v32  ;;  %v4169_v42 = vmul.f32 -1.442695, %v3790_v9  ;;  %v4171_v36 = vmul.f32 -1.442695, %v3792_v41 }
 0x914   :  { %4811 = vpow2.f32 %v4167_v21 }
 0x915   :  { %4813 = vpow2.f32 %v4169_v42 }
 0x916   :  { %4815 = vtanh.f32 %v3787_v39 }
 0x917   :  { %4817 = vpow2.f32 %v4170_v59 }
 0x918   :  { %v4802_v60 = vpop.eup %4801  ;;  %4819 = vtanh.f32 %v3791_v40 }
 0x919   :  { %v3839_v19 = vmul.f32 %v4802_v60, %v4800_v52  ;;  %v4804_v62 = vpop.eup %4803 }
 0x91b   :  { %v4204_v4 = vpack.c.bf16 %v3839_v19, %v3839_v19  ;;  %v4806_v58 = vpop.eup %4805 }
 0x91c   :  { %v4808_v20 = vpop.eup %4807  ;;  %v3840_v55 = vmul.f32 %v4806_v58, %v4804_v62 }
 0x91d   :  { %3898 = vst [vmem:[#allocation12 + $0x70] sm:$0xf] %v4204_v4  ;;  %v4810_v7 = vpop.eup %4809  ;;  %v3847_v10 = vadd.f32 1.0, %v4808_v20 }
 0x91e   :  { %v4205_v30 = vpack.c.bf16 %v3840_v55, %v3840_v55  ;;  %v3859_v22 = vadd.f32 1.0, %v4810_v7  ;;  %v4812_v26 = vpop.eup %4811 }
 0x91f   :  { %4821 = vrcp.f32 %v3847_v10  ;;  %v3848_v31 = vadd.f32 1.0, %v4812_v26  ;;  %v4814_v57 = vpop.eup %4813 }
 0x920   :  { %3899 = vst [vmem:[#allocation12 + $0x78] sm:$0xf] %v4205_v30  ;;  %4823 = vrcp.f32 %v3859_v22  ;;  %v3860_v23 = vadd.f32 1.0, %v4814_v57  ;;  %v4816_v56 = vpop.eup %4815 }
 0x921   :  { %4825 = vpow2.f32 %v4171_v36  ;;  %v4818_v12 = vpop.eup %4817 }
 0x922   :  { %4827 = vrcp.f32 %v3848_v31  ;;  %v4820_v33 = vpop.eup %4819  ;;  %v3873_v6 = vadd.f32 1.0, %v4818_v12 }
 0x923   :  { %4829 = vrcp.f32 %v3860_v23 }
 0x924   :  { %4831 = vrcp.f32 %v3873_v6 }
 0x929   :  { %v4822_v2 = vpop.eup %4821 }
 0x92a   :  { %v4824_v44 = vpop.eup %4823  ;;  %v3881_v38 = vmul.f32 %v4822_v2, %v4816_v56 }
 0x92b   :  { %v4826_v8 = vpop.eup %4825  ;;  %v3879_v5 = vmul.f32 %v4824_v44, %v6677_v11 }
 0x92c   :  { %v4828_v45 = vpop.eup %4827  ;;  %v3874_v61 = vadd.f32 1.0, %v4826_v8 }
 0x92d   :  { %v3883_v16 = vadd.f32 %v3881_v38, %v3879_v5  ;;  %v3882_v46 = vmul.f32 %v4828_v45, %v4820_v33  ;;  %v4830_v51 = vpop.eup %4829 }
 0x92e   :  { %v3880_v27 = vmul.f32 %v4830_v51, %v6681_v1  ;;  %v4832_v35 = vpop.eup %4831 }
 0x92f   :  { %4833 = vtanh.f32 %v3883_v16 }
 0x930   :  { %v3884_v34 = vadd.f32 %v3882_v46, %v3880_v27  ;;  %4835 = vrcp.f32 %v3874_v61 }
 0x932   :  { %4837 = vtanh.f32 %v3884_v34 }
 0x939   :  { %v4834_v49 = vpop.eup %4833 }
 0x93a   :  { %v3887_v24 = vmul.f32 %v4834_v49, %v4832_v35  ;;  %v4836_v18 = vpop.eup %4835 }
 0x93c   :  { %v4206_v50 = vpack.c.bf16 %v3887_v24, %v3887_v24  ;;  %v4838_v47 = vpop.eup %4837 }
 0x93d   :  { %v3888_v11 = vmul.f32 %v4838_v47, %v4836_v18 }
 0x93e   :  { %3907 = vst [vmem:[#allocation12 + $0x4] sm:$0xf] %v4206_v50 }
 0x93f   :  { %v4207_v28 = vpack.c.bf16 %v3888_v11, %v3888_v11 }
 0x941   :  { %3908 = vst [vmem:[#allocation12 + $0xc] sm:$0xf] %v4207_v28 }
 0x942   :  { %5118 = shalt.err (!%p5115_p2)
}
 0x943   :  { %s5119_s7 = scalar_lea.hbm %s6721_s5, 2048 }
 0x944   :  { %p5120_p3 = scmp.ne.s32.totalorder %s6721_s5, %s5119_s7  ;;  %p5123_p4 = scmp.lt.u32.totalorder %s5119_s7, %s6721_s5 }
 0x946   :  { %p5125_p5 = pnand %p5123_p4, %p5120_p3 }
 0x948   :  { %5128 = shalt.err (!%p5125_p5)
}
 0x949   :  { %s5150_s13 = smov 128   ;;  %s5151_s14 = smov 8  }
 0x94a   :  { %3920 = dma.vmem_to_hbm [thread:$0]  %s3915_s19, 2048, %s6721_s5, [#allocation5], %s5150_s13, %s5150_s13, %s5151_s14  }
 0x94b   :  { %5135 = dma.done.wait [#allocation5], 2048  }
 0x94c   :  { %5136 = vsyncadd [#allocation5], 4294965248 }
 0x94d   :  { %3924 = vsyncpa [#allocation4], 1 }
 0x94e   :  { %3925 = vsyncpa [#allocation7], 1 }
 0x94f   :  { %3926 = vsyncpa [#allocation10], 1 }
 0x950   :  { %3927 = vsyncpa [#allocation5], 1 }

</bundles_post_ra>
